<compile_context>
chip_gen: v7x
topology: tpu7x:2x2x1
jax: 0.10.0
libtpu: 0.0.40
codegen_flags: <defaults>
</compile_context>

<pallas_src>
import jax
import jax.numpy as jnp
from jax.experimental import pallas as pl
from jax.experimental.pallas import tpu as pltpu


def _round_up(n: int, m: int) -> int:
    return ((n + m - 1) // m) * m


# ----------------------------- Pallas kernel ------------------------------ #
def cvae_kernel(
    x_ref, c_ref, eps_ref,
    w1x_ref, w1c_ref, b1_ref,
    wmulv_ref, bmulv_ref,
    w2z_ref, w2c_ref, b2_ref,
    w3_ref, b3_ref,
    xrec_ref, mulv_ref,
):
    x = x_ref[...]                            # (TB, Din) bf16
    c = c_ref[...].astype(jnp.bfloat16)       # (TB, C)   (one-hot -> exact)
    eps = eps_ref[...]                        # (TB, L)   f32
    latent = eps.shape[1]

    # ---- encoder: h = relu([x, c] @ W1 + b1) ----------------------------- #
    # Split contraction: big x-side matmul + tiny-K (K=cond_dim) c-side
    # matmul, both on the MXU with f32 accumulation.
    h = (jnp.dot(x, w1x_ref[...], preferred_element_type=jnp.float32)
         + jnp.dot(c, w1c_ref[...], preferred_element_type=jnp.float32)
         + b1_ref[...])
    h = jnp.maximum(h, 0.0)

    # ---- fused mu / logvar projection: one (H, 2L) matmul ---------------- #
    mulv = (jnp.dot(h.astype(jnp.bfloat16), wmulv_ref[...],
                    preferred_element_type=jnp.float32) + bmulv_ref[...])
    mu = mulv[:, :latent]
    logvar = mulv[:, latent:]

    # ---- reparameterize: z = mu + eps * exp(0.5 * logvar) ---------------- #
    z = mu + eps * jnp.exp(0.5 * logvar)

    # ---- decoder: h2 = relu([z, c] @ W2 + b2) ---------------------------- #
    # c-side (K=10) on the MXU; z-side (K=latent=2) as two cheap VPU FMAs.
    h2 = (jnp.dot(c, w2c_ref[...], preferred_element_type=jnp.float32)
          + b2_ref[...])
    w2z = w2z_ref[...].astype(jnp.float32)    # (L, H)
    for j in range(latent):
        h2 = h2 + z[:, j:j + 1] * w2z[j:j + 1, :]
    h2 = jnp.maximum(h2, 0.0)

    # ---- x_recon = sigmoid(h2 @ W3 + b3), stored bf16 --------------------- #
    logits = (jnp.dot(h2.astype(jnp.bfloat16), w3_ref[...],
                      preferred_element_type=jnp.float32) + b3_ref[...])
    xrec_ref[...] = jax.nn.sigmoid(logits).astype(xrec_ref.dtype)
    mulv_ref[...] = mulv


# ------------------------------- wrapper ---------------------------------- #
def cvae_forward(x, c, eps, kparams, *, tile_b=128):
    """Fused CVAE forward.

    x:(B,D_in) bf16, c:(B,D_c) f32, eps:(B,D_lat) f32.
    Returns (x_recon bf16, mu f32, logvar f32).
    tile_b: 128 is a good default (v5e MXU width; keeps grid length 2 at B=256
    so v7x's two TensorCores both get work).  On v6e, 256 fills the MXU better.
    """
    B, d_in = x.shape
    cdim = c.shape[1]
    latent = eps.shape[1]

    tile_b = min(tile_b, _round_up(B, 8))
    b_pad = _round_up(B, tile_b)
    if b_pad != B:                            # batch pad only (no feature pad)
        x = jnp.pad(x, ((0, b_pad - B), (0, 0)))
        c = jnp.pad(c, ((0, b_pad - B), (0, 0)))
        eps = jnp.pad(eps, ((0, b_pad - B), (0, 0)))

    grid = (b_pad // tile_b,)

    def batch_spec(n):                        # blocked on the batch axis
        return pl.BlockSpec((tile_b, n), lambda i: (i, 0))

    def resident(arr):                        # weights stay resident in VMEM
        return pl.BlockSpec(arr.shape, lambda i: (0, 0))

    in_specs = [
        batch_spec(d_in),                     # x (bf16, full 784-wide block)
        batch_spec(cdim),                     # c
        batch_spec(latent),                   # eps
        resident(kparams["w1x"]), resident(kparams["w1c"]),
        resident(kparams["b1"]),
        resident(kparams["wmulv"]), resident(kparams["bmulv"]),
        resident(kparams["w2z"]), resident(kparams["w2c"]),
        resident(kparams["b2"]),
        resident(kparams["w3"]), resident(kparams["b3"]),
    ]
    out_specs = [
        batch_spec(d_in),                     # x_recon (bf16)
        batch_spec(2 * latent),               # [mu | logvar] (f32)
    ]
    out_shapes = (
        jax.ShapeDtypeStruct((b_pad, d_in), jnp.bfloat16),
        jax.ShapeDtypeStruct((b_pad, 2 * latent), jnp.float32),
    )

    xrec, mulv = pl.pallas_call(
        cvae_kernel,
        grid=grid,
        in_specs=in_specs,
        out_specs=out_specs,
        out_shape=out_shapes,
        compiler_params=pltpu.CompilerParams(
            dimension_semantics=("parallel",),
            vmem_limit_bytes=32 * 1024 * 1024,
        ),
    )(
        x, c, eps,
        kparams["w1x"], kparams["w1c"], kparams["b1"],
        kparams["wmulv"], kparams["bmulv"],
        kparams["w2z"], kparams["w2c"], kparams["b2"],
        kparams["w3"], kparams["b3"],
    )

    if b_pad != B:
        xrec = xrec[:B]
        mulv = mulv[:B]
    mu = mulv[:, :latent]
    logvar = mulv[:, latent:]
    return xrec, mu, logvar


# ---------------------------- param construction -------------------------- #
def init_params(key, input_dim, condition_dim, hidden_dim, latent_dim):
    """Deterministic synthetic f32 parameters (weights stored as (in, out))."""
    keys = jax.random.split(key, 10)

    def lin(kw, kb, fan_in, fan_out):
        lim = 1.0 / jnp.sqrt(fan_in)
        w = jax.random.uniform(kw, (fan_in, fan_out), jnp.float32, -lim, lim)
        b = jax.random.uniform(kb, (1, fan_out), jnp.float32, -lim, lim)
        return w, b

    w1, b1 = lin(keys[0], keys[1], input_dim + condition_dim, hidden_dim)
    wmu, bmu = lin(keys[2], keys[3], hidden_dim, latent_dim)
    wlv, blv = lin(keys[4], keys[5], hidden_dim, latent_dim)
    w2, b2 = lin(keys[6], keys[7], latent_dim + condition_dim, hidden_dim)
    w3, b3 = lin(keys[8], keys[9], hidden_dim, input_dim)
    return {
        "w1x": w1[:input_dim], "w1c": w1[input_dim:], "b1": b1,
        "wmu": wmu, "bmu": bmu, "wlv": wlv, "blv": blv,
        "w2z": w2[:latent_dim], "w2c": w2[latent_dim:], "b2": b2,
        "w3": w3, "b3": b3,
    }


def prepare_kernel_params(p):
    """Kernel-side layout: bf16 weights, f32 biases, fused mu|logvar weight."""
    bf16 = jnp.bfloat16
    return {
        "w1x": p["w1x"].astype(bf16),                                # (Din,H)
        "w1c": p["w1c"].astype(bf16),                                # (C,H)
        "b1": p["b1"],                                               # f32
        "wmulv": jnp.concatenate([p["wmu"], p["wlv"]], axis=1).astype(bf16),
        "bmulv": jnp.concatenate([p["bmu"], p["blv"]], axis=1),      # f32
        "w2z": p["w2z"].astype(bf16),                                # (L,H)
        "w2c": p["w2c"].astype(bf16),                                # (C,H)
        "b2": p["b2"],                                               # f32
        "w3": p["w3"].astype(bf16),                                  # (H,Din)
        "b3": p["b3"],                                               # f32
    }


# ------------------------------ reference --------------------------------- #
def cvae_reference(x_bf16, c, eps, kp):
    """Pure-JAX reference: same bf16 weights / bf16 x, f32 activation math."""
    f32 = lambda a: a.astype(jnp.float32)
    latent = eps.shape[1]
    x = f32(x_bf16)
    h = jax.nn.relu(x @ f32(kp["w1x"]) + c @ f32(kp["w1c"]) + kp["b1"])
    mulv = h @ f32(kp["wmulv"]) + kp["bmulv"]
    mu, logvar = mulv[:, :latent], mulv[:, latent:]
    z = mu + eps * jnp.exp(0.5 * logvar)
    h2 = jax.nn.relu(z @ f32(kp["w2z"]) + c @ f32(kp["w2c"]) + kp["b2"])
    x_recon = jax.nn.sigmoid(h2 @ f32(kp["w3"]) + kp["b3"])
    return x_recon, mu, logvar


# -------------------------------- main ------------------------------------ #
if __name__ == "__main__":
    # module defaults: input_dim=784, condition_dim=10, hidden_dim=512, latent_dim=2
    INPUT_DIM, COND_DIM, HIDDEN_DIM, LATENT_DIM = 784, 10, 512, 2
    BATCH = 256   # 2 grid steps of TILE_B=128 -> batch pipelining / 2 TCs on v7x

    key = jax.random.PRNGKey(0)
    kx, kc, keps, kp = jax.random.split(key, 4)

    # x mimics flattened 28x28 images (fed to the kernel in bf16); c is one-hot.
    x = jax.random.uniform(kx, (BATCH, INPUT_DIM), jnp.float32)
    x_bf16 = x.astype(jnp.bfloat16)
    c_idx = jax.random.randint(kc, (BATCH,), 0, COND_DIM)
    c = jax.nn.one_hot(c_idx, COND_DIM, dtype=jnp.float32)
    # eps corresponds to torch.randn_like(std) in reparameterize; generated
    # deterministically outside the kernel so the forward is reproducible.
    eps = jax.random.normal(keps, (BATCH, LATENT_DIM), jnp.float32)

    params = init_params(kp, INPUT_DIM, COND_DIM, HIDDEN_DIM, LATENT_DIM)
    kparams = prepare_kernel_params(params)

    x_recon, mu, logvar = cvae_forward(x_bf16, c, eps, kparams)
    jax.block_until_ready((x_recon, mu, logvar))

    # correctness check (bf16 weights/activations -> looser tolerance)
    xr_ref, mu_ref, lv_ref = cvae_reference(x_bf16, c, eps, kparams)
    assert x_recon.shape == (BATCH, INPUT_DIM) and x_recon.dtype == jnp.bfloat16
    assert mu.shape == (BATCH, LATENT_DIM) and logvar.shape == (BATCH, LATENT_DIM)
    assert jnp.allclose(x_recon.astype(jnp.float32), xr_ref, atol=2e-2, rtol=2e-2)
    assert jnp.allclose(mu, mu_ref, atol=2e-2, rtol=2e-2)
    assert jnp.allclose(logvar, lv_ref, atol=2e-2, rtol=2e-2)

    print("KERNEL_OK")
</pallas_src>

<mosaic_0001>
module attributes {stable_mosaic.version = 11 : i64} {
  func.func @cvae_kernel(%arg0: i32, %arg1: memref<128x784xbf16, #tpu.memory_space<vmem>>, %arg2: memref<128x10xf32, #tpu.memory_space<vmem>>, %arg3: memref<128x2xf32, #tpu.memory_space<vmem>>, %arg4: memref<784x512xbf16, #tpu.memory_space<vmem>>, %arg5: memref<10x512xbf16, #tpu.memory_space<vmem>>, %arg6: memref<1x512xf32, #tpu.memory_space<vmem>>, %arg7: memref<512x4xbf16, #tpu.memory_space<vmem>>, %arg8: memref<1x4xf32, #tpu.memory_space<vmem>>, %arg9: memref<2x512xbf16, #tpu.memory_space<vmem>>, %arg10: memref<10x512xbf16, #tpu.memory_space<vmem>>, %arg11: memref<1x512xf32, #tpu.memory_space<vmem>>, %arg12: memref<512x784xbf16, #tpu.memory_space<vmem>>, %arg13: memref<1x784xf32, #tpu.memory_space<vmem>>, %arg14: memref<128x784xbf16, #tpu.memory_space<vmem>>, %arg15: memref<128x4xf32, #tpu.memory_space<vmem>>) attributes {dimension_semantics = [#tpu.dimension_semantics<parallel>], iteration_bounds = array<i64: 2>, scalar_prefetch = 0 : i64, scratch_operands = 0 : i64, tpu.core_type = #tpu.core_type<tc>, window_params = [{transform_indices = @transform_0, window_bounds = array<i64: 128, 784>}, {transform_indices = @transform_1, window_bounds = array<i64: 128, 10>}, {transform_indices = @transform_2, window_bounds = array<i64: 128, 2>}, {pipeline_mode = #tpu.pipeline_mode<synchronous>, transform_indices = @transform_3, window_bounds = array<i64: 784, 512>}, {pipeline_mode = #tpu.pipeline_mode<synchronous>, transform_indices = @transform_4, window_bounds = array<i64: 10, 512>}, {pipeline_mode = #tpu.pipeline_mode<synchronous>, transform_indices = @transform_5, window_bounds = array<i64: 1, 512>}, {pipeline_mode = #tpu.pipeline_mode<synchronous>, transform_indices = @transform_6, window_bounds = array<i64: 512, 4>}, {pipeline_mode = #tpu.pipeline_mode<synchronous>, transform_indices = @transform_7, window_bounds = array<i64: 1, 4>}, {pipeline_mode = #tpu.pipeline_mode<synchronous>, transform_indices = @transform_8, window_bounds = array<i64: 2, 512>}, {pipeline_mode = #tpu.pipeline_mode<synchronous>, transform_indices = @transform_9, window_bounds = array<i64: 10, 512>}, {pipeline_mode = #tpu.pipeline_mode<synchronous>, transform_indices = @transform_10, window_bounds = array<i64: 1, 512>}, {pipeline_mode = #tpu.pipeline_mode<synchronous>, transform_indices = @transform_11, window_bounds = array<i64: 512, 784>}, {pipeline_mode = #tpu.pipeline_mode<synchronous>, transform_indices = @transform_12, window_bounds = array<i64: 1, 784>}, {transform_indices = @transform_13, window_bounds = array<i64: 128, 784>}, {transform_indices = @transform_14, window_bounds = array<i64: 128, 4>}]} {
    %c0 = arith.constant 0 : index
    %c0_0 = arith.constant 0 : index
    %0 = vector.load %arg1[%c0, %c0_0] : memref<128x784xbf16, #tpu.memory_space<vmem>>, vector<128x784xbf16>
    %c0_1 = arith.constant 0 : index
    %c0_2 = arith.constant 0 : index
    %1 = vector.load %arg2[%c0_1, %c0_2] : memref<128x10xf32, #tpu.memory_space<vmem>>, vector<128x10xf32>
    %2 = arith.truncf %1 : vector<128x10xf32> to vector<128x10xbf16>
    %c0_3 = arith.constant 0 : index
    %c0_4 = arith.constant 0 : index
    %3 = vector.load %arg3[%c0_3, %c0_4] : memref<128x2xf32, #tpu.memory_space<vmem>>, vector<128x2xf32>
    %c0_5 = arith.constant 0 : index
    %c0_6 = arith.constant 0 : index
    %4 = vector.load %arg4[%c0_5, %c0_6] : memref<784x512xbf16, #tpu.memory_space<vmem>>, vector<784x512xbf16>
    %cst = arith.constant dense<0.000000e+00> : vector<128x512xf32>
    %5 = tpu.matmul %0, %4, %cst {dimension_numbers = #tpu.dot_dimension_numbers<[1], [0], [0], [1], [0, 0, 1, 1], [], []>} : vector<128x784xbf16>, vector<784x512xbf16>, vector<128x512xf32> -> vector<128x512xf32>
    %c0_7 = arith.constant 0 : index
    %c0_8 = arith.constant 0 : index
    %6 = vector.load %arg5[%c0_7, %c0_8] : memref<10x512xbf16, #tpu.memory_space<vmem>>, vector<10x512xbf16>
    %cst_9 = arith.constant dense<0.000000e+00> : vector<128x512xf32>
    %7 = tpu.matmul %2, %6, %cst_9 {dimension_numbers = #tpu.dot_dimension_numbers<[1], [0], [0], [1], [0, 0, 1, 1], [], []>} : vector<128x10xbf16>, vector<10x512xbf16>, vector<128x512xf32> -> vector<128x512xf32>
    %8 = arith.addf %5, %7 : vector<128x512xf32>
    %c0_10 = arith.constant 0 : index
    %c0_11 = arith.constant 0 : index
    %9 = vector.load %arg6[%c0_10, %c0_11] : memref<1x512xf32, #tpu.memory_space<vmem>>, vector<1x512xf32>
    %10 = vector.broadcast %9 : vector<1x512xf32> to vector<128x512xf32>
    %11 = arith.addf %8, %10 : vector<128x512xf32>
    %cst_12 = arith.constant 0.000000e+00 : f32
    %12 = vector.broadcast %cst_12 : f32 to vector<128x512xf32>
    %13 = arith.maximumf %11, %12 : vector<128x512xf32>
    %14 = arith.truncf %13 : vector<128x512xf32> to vector<128x512xbf16>
    %c0_13 = arith.constant 0 : index
    %c0_14 = arith.constant 0 : index
    %15 = vector.load %arg7[%c0_13, %c0_14] : memref<512x4xbf16, #tpu.memory_space<vmem>>, vector<512x4xbf16>
    %cst_15 = arith.constant dense<0.000000e+00> : vector<128x4xf32>
    %16 = tpu.matmul %14, %15, %cst_15 {dimension_numbers = #tpu.dot_dimension_numbers<[1], [0], [0], [1], [0, 0, 1, 1], [], []>} : vector<128x512xbf16>, vector<512x4xbf16>, vector<128x4xf32> -> vector<128x4xf32>
    %c0_16 = arith.constant 0 : index
    %c0_17 = arith.constant 0 : index
    %17 = vector.load %arg8[%c0_16, %c0_17] : memref<1x4xf32, #tpu.memory_space<vmem>>, vector<1x4xf32>
    %18 = vector.broadcast %17 : vector<1x4xf32> to vector<128x4xf32>
    %19 = arith.addf %16, %18 : vector<128x4xf32>
    %20 = vector.extract_strided_slice %19 {offsets = [0, 0], sizes = [128, 2], strides = [1, 1]} : vector<128x4xf32> to vector<128x2xf32>
    %21 = vector.extract_strided_slice %19 {offsets = [0, 2], sizes = [128, 2], strides = [1, 1]} : vector<128x4xf32> to vector<128x2xf32>
    %cst_18 = arith.constant 5.000000e-01 : f32
    %22 = vector.broadcast %cst_18 : f32 to vector<128x2xf32>
    %23 = arith.mulf %22, %21 : vector<128x2xf32>
    %24 = math.exp %23 : vector<128x2xf32>
    %25 = arith.mulf %3, %24 : vector<128x2xf32>
    %26 = arith.addf %20, %25 : vector<128x2xf32>
    %c0_19 = arith.constant 0 : index
    %c0_20 = arith.constant 0 : index
    %27 = vector.load %arg10[%c0_19, %c0_20] : memref<10x512xbf16, #tpu.memory_space<vmem>>, vector<10x512xbf16>
    %cst_21 = arith.constant dense<0.000000e+00> : vector<128x512xf32>
    %28 = tpu.matmul %2, %27, %cst_21 {dimension_numbers = #tpu.dot_dimension_numbers<[1], [0], [0], [1], [0, 0, 1, 1], [], []>} : vector<128x10xbf16>, vector<10x512xbf16>, vector<128x512xf32> -> vector<128x512xf32>
    %c0_22 = arith.constant 0 : index
    %c0_23 = arith.constant 0 : index
    %29 = vector.load %arg11[%c0_22, %c0_23] : memref<1x512xf32, #tpu.memory_space<vmem>>, vector<1x512xf32>
    %30 = vector.broadcast %29 : vector<1x512xf32> to vector<128x512xf32>
    %31 = arith.addf %28, %30 : vector<128x512xf32>
    %c0_24 = arith.constant 0 : index
    %c0_25 = arith.constant 0 : index
    %32 = vector.load %arg9[%c0_24, %c0_25] : memref<2x512xbf16, #tpu.memory_space<vmem>>, vector<2x512xbf16>
    %33 = arith.extf %32 : vector<2x512xbf16> to vector<2x512xf32>
    %34 = vector.extract_strided_slice %26 {offsets = [0, 0], sizes = [128, 1], strides = [1, 1]} : vector<128x2xf32> to vector<128x1xf32>
    %35 = vector.extract_strided_slice %33 {offsets = [0, 0], sizes = [1, 512], strides = [1, 1]} : vector<2x512xf32> to vector<1x512xf32>
    %36 = vector.broadcast %34 : vector<128x1xf32> to vector<128x512xf32>
    %37 = vector.broadcast %35 : vector<1x512xf32> to vector<128x512xf32>
    %38 = arith.mulf %36, %37 : vector<128x512xf32>
    %39 = arith.addf %31, %38 : vector<128x512xf32>
    %40 = vector.extract_strided_slice %26 {offsets = [0, 1], sizes = [128, 1], strides = [1, 1]} : vector<128x2xf32> to vector<128x1xf32>
    %41 = vector.extract_strided_slice %33 {offsets = [1, 0], sizes = [1, 512], strides = [1, 1]} : vector<2x512xf32> to vector<1x512xf32>
    %42 = vector.broadcast %40 : vector<128x1xf32> to vector<128x512xf32>
    %43 = vector.broadcast %41 : vector<1x512xf32> to vector<128x512xf32>
    %44 = arith.mulf %42, %43 : vector<128x512xf32>
    %45 = arith.addf %39, %44 : vector<128x512xf32>
    %cst_26 = arith.constant 0.000000e+00 : f32
    %46 = vector.broadcast %cst_26 : f32 to vector<128x512xf32>
    %47 = arith.maximumf %45, %46 : vector<128x512xf32>
    %48 = arith.truncf %47 : vector<128x512xf32> to vector<128x512xbf16>
    %c0_27 = arith.constant 0 : index
    %c0_28 = arith.constant 0 : index
    %49 = vector.load %arg12[%c0_27, %c0_28] : memref<512x784xbf16, #tpu.memory_space<vmem>>, vector<512x784xbf16>
    %cst_29 = arith.constant dense<0.000000e+00> : vector<128x784xf32>
    %50 = tpu.matmul %48, %49, %cst_29 {dimension_numbers = #tpu.dot_dimension_numbers<[1], [0], [0], [1], [0, 0, 1, 1], [], []>} : vector<128x512xbf16>, vector<512x784xbf16>, vector<128x784xf32> -> vector<128x784xf32>
    %c0_30 = arith.constant 0 : index
    %c0_31 = arith.constant 0 : index
    %51 = vector.load %arg13[%c0_30, %c0_31] : memref<1x784xf32, #tpu.memory_space<vmem>>, vector<1x784xf32>
    %52 = vector.broadcast %51 : vector<1x784xf32> to vector<128x784xf32>
    %53 = arith.addf %50, %52 : vector<128x784xf32>
    %54 = arith.negf %53 : vector<128x784xf32>
    %55 = math.exp %54 : vector<128x784xf32>
    %cst_32 = arith.constant 1.000000e+00 : f32
    %56 = vector.broadcast %cst_32 : f32 to vector<128x784xf32>
    %57 = arith.addf %56, %55 : vector<128x784xf32>
    %58 = arith.divf %56, %57 : vector<128x784xf32>
    %59 = arith.truncf %58 : vector<128x784xf32> to vector<128x784xbf16>
    %c0_33 = arith.constant 0 : index
    %c0_34 = arith.constant 0 : index
    %60 = vector.load %arg14[%c0_33, %c0_34] : memref<128x784xbf16, #tpu.memory_space<vmem>>, vector<128x784xbf16>
    tpu.vector_store %arg14[%c0_33, %c0_34], %59 {strides = array<i32>} : memref<128x784xbf16, #tpu.memory_space<vmem>>, vector<128x784xbf16>,
    %c0_35 = arith.constant 0 : index
    %c0_36 = arith.constant 0 : index
    %61 = vector.load %arg15[%c0_35, %c0_36] : memref<128x4xf32, #tpu.memory_space<vmem>>, vector<128x4xf32>
    tpu.vector_store %arg15[%c0_35, %c0_36], %19 {strides = array<i32>} : memref<128x4xf32, #tpu.memory_space<vmem>>, vector<128x4xf32>,
    return
  }
  func.func @transform_0(%arg0: i32) -> (i32, i32) {
    %c0_i32 = arith.constant 0 : i32
    %c0_i32_0 = arith.constant 0 : i32
    return %arg0, %c0_i32 : i32, i32
  }
  func.func @transform_1(%arg0: i32) -> (i32, i32) {
    %c0_i32 = arith.constant 0 : i32
    %c0_i32_0 = arith.constant 0 : i32
    return %arg0, %c0_i32 : i32, i32
  }
  func.func @transform_2(%arg0: i32) -> (i32, i32) {
    %c0_i32 = arith.constant 0 : i32
    %c0_i32_0 = arith.constant 0 : i32
    return %arg0, %c0_i32 : i32, i32
  }
  func.func @transform_3(%arg0: i32) -> (i32, i32) {
    %c0_i32 = arith.constant 0 : i32
    %c0_i32_0 = arith.constant 0 : i32
    %c0_i32_1 = arith.constant 0 : i32
    return %c0_i32, %c0_i32_0 : i32, i32
  }
  func.func @transform_4(%arg0: i32) -> (i32, i32) {
    %c0_i32 = arith.constant 0 : i32
    %c0_i32_0 = arith.constant 0 : i32
    %c0_i32_1 = arith.constant 0 : i32
    return %c0_i32, %c0_i32_0 : i32, i32
  }
  func.func @transform_5(%arg0: i32) -> (i32, i32) {
    %c0_i32 = arith.constant 0 : i32
    %c0_i32_0 = arith.constant 0 : i32
    %c0_i32_1 = arith.constant 0 : i32
    return %c0_i32, %c0_i32_0 : i32, i32
  }
  func.func @transform_6(%arg0: i32) -> (i32, i32) {
    %c0_i32 = arith.constant 0 : i32
    %c0_i32_0 = arith.constant 0 : i32
    %c0_i32_1 = arith.constant 0 : i32
    return %c0_i32, %c0_i32_0 : i32, i32
  }
  func.func @transform_7(%arg0: i32) -> (i32, i32) {
    %c0_i32 = arith.constant 0 : i32
    %c0_i32_0 = arith.constant 0 : i32
    %c0_i32_1 = arith.constant 0 : i32
    return %c0_i32, %c0_i32_0 : i32, i32
  }
  func.func @transform_8(%arg0: i32) -> (i32, i32) {
    %c0_i32 = arith.constant 0 : i32
    %c0_i32_0 = arith.constant 0 : i32
    %c0_i32_1 = arith.constant 0 : i32
    return %c0_i32, %c0_i32_0 : i32, i32
  }
  func.func @transform_9(%arg0: i32) -> (i32, i32) {
    %c0_i32 = arith.constant 0 : i32
    %c0_i32_0 = arith.constant 0 : i32
    %c0_i32_1 = arith.constant 0 : i32
    return %c0_i32, %c0_i32_0 : i32, i32
  }
  func.func @transform_10(%arg0: i32) -> (i32, i32) {
    %c0_i32 = arith.constant 0 : i32
    %c0_i32_0 = arith.constant 0 : i32
    %c0_i32_1 = arith.constant 0 : i32
    return %c0_i32, %c0_i32_0 : i32, i32
  }
  func.func @transform_11(%arg0: i32) -> (i32, i32) {
    %c0_i32 = arith.constant 0 : i32
    %c0_i32_0 = arith.constant 0 : i32
    %c0_i32_1 = arith.constant 0 : i32
    return %c0_i32, %c0_i32_0 : i32, i32
  }
  func.func @transform_12(%arg0: i32) -> (i32, i32) {
    %c0_i32 = arith.constant 0 : i32
    %c0_i32_0 = arith.constant 0 : i32
    %c0_i32_1 = arith.constant 0 : i32
    return %c0_i32, %c0_i32_0 : i32, i32
  }
  func.func @transform_13(%arg0: i32) -> (i32, i32) {
    %c0_i32 = arith.constant 0 : i32
    %c0_i32_0 = arith.constant 0 : i32
    return %arg0, %c0_i32 : i32, i32
  }
  func.func @transform_14(%arg0: i32) -> (i32, i32) {
    %c0_i32 = arith.constant 0 : i32
    %c0_i32_0 = arith.constant 0 : i32
    return %arg0, %c0_i32 : i32, i32
  }
}

</mosaic_0001>

<bundles_post_ra>
// kernel: tpu_custom_call.1
= control target key start
LH: loop header
LB: loop body
LE: loop exit
PB: predicated region body
PF: predicated region fallthrough
CT: control target
= control target key end

     0   :  { %s11344_s29 = smov 0   ;;  %s14716_s0 = inlined_call_operand.vmem [shape: bf16[256,784], index: 0, kind: input, shape index: {}]   ;;  %s14717_s1 = inlined_call_operand.vmem [shape: f32[256,10], index: 1, kind: input, shape index: {}]   ;;  %s14718_s2 = inlined_call_operand.vmem [shape: f32[256,2], index: 2, kind: input, shape index: {}]   ;;  %s14719_s3 = inlined_call_operand.vmem [shape: bf16[784,512], index: 3, kind: input, shape index: {}]   ;;  %s14720_s4 = inlined_call_operand.vmem [shape: bf16[10,512], index: 4, kind: input, shape index: {}]   ;;  %s14721_s5 = inlined_call_operand.vmem [shape: f32[1,512], index: 5, kind: input, shape index: {}]   ;;  %s14722_s6 = inlined_call_operand.vmem [shape: bf16[512,4], index: 6, kind: input, shape index: {}]   ;;  %s14723_s7 = inlined_call_operand.vmem [shape: f32[1,4], index: 7, kind: input, shape index: {}]   ;;  %s14724_s8 = inlined_call_operand.vmem [shape: bf16[2,512], index: 8, kind: input, shape index: {}]   ;;  %s14725_s9 = inlined_call_operand.vmem [shape: bf16[10,512], index: 9, kind: input, shape index: {}]   ;;  %s14726_s10 = inlined_call_operand.vmem [shape: f32[1,512], index: 10, kind: input, shape index: {}]   ;;  %s14727_s11 = inlined_call_operand.vmem [shape: bf16[512,784], index: 11, kind: input, shape index: {}]   ;;  %s14728_s12 = inlined_call_operand.vmem [shape: f32[1,784], index: 12, kind: input, shape index: {}]   ;;  %s14729_s13 = inlined_call_operand.vmem [shape: bf16[256,784], index: 13, kind: output, shape index: {0}]   ;;  %s14730_s14 = inlined_call_operand.vmem [shape: f32[256,4], index: 14, kind: output, shape index: {1}]  }
   0x1 LB: > { %s8481_s30 = sadd.s32 4294967295, %s11264_s29   ;;  %p8485_p0 = scmp.ge.s32.totalorder %s11264_s29, 1  ;;  %s11264_s29 = sphi %s11344_s29, %s25_s29  }
   0x2   : > { %p439_p1 = scmp.lt.s32.totalorder %s11264_s29, 3 }
   0x4   : > { %p440_p2 = pnand %p8485_p0, %p439_p1 }
   0x6   : > { %443 = sbr.rel (%p440_p2) target bundleno = 1550 (0x60e), region = 72 }
   0xd   : > { %v10040_v0 = vld [vmem:[%s14720_s4 + $0x4] ss:$16 sps:$4 sm:$0x1f]   ;;  %vm880_vm0 = vcmask 1044480   ;;  %v14733_v3 = vmov 0   ;;  %s8486_s23 = sshll.u32 %s8481_s30, 4 }
   0xe   : > { %v10042_v1 = vld [vmem:[%s14720_s4] ss:$16 sps:$4 sm:$0x1f]   ;;  %8500 = vmatprep.subr.msk.bf16.mxu0 %vm880_vm0, %v10040_v0  ;;  %v10043_v2 = vld [vmem:[%s14720_s4 + $0xc] ss:$16 sps:$4 sm:$0x1f]   ;;  %925 = vmatprep.mubr.bf16.mxu0 %v14733_v3 }
   0xf   : > { %v882_v4 = vsel %vm880_vm0, %v10042_v1, 0  ;;  %v10045_v5 = vld [vmem:[%s14720_s4 + $0x8] ss:$16 sps:$4 sm:$0x1f]   ;;  %1038 = vmatprep.mubr.bf16.mxu1 %v14733_v3  ;;  %10023 = vset.pattern.permute.xlu0 %v14733_v3  ;;  %v10048_v6 = vld [vmem:[%s14719_s3 + $0x4] ss:$16 sps:$4 sm:$0xff]  }
  0x10   : > { %894 = vmatpush1.bf16.msra.mxu0 %v882_v4  ;;  %8509 = vmatprep.subr.msk.bf16.mxu1 %vm880_vm0, %v10043_v2  ;;  %p503_p3 = scmp.lt.s32.totalorder %s8486_s23, 31  ;;  %v888_v7 = vsel %vm880_vm0, %v10045_v5, 0  ;;  %v10051_v8 = vld [vmem:[%s14719_s3 + $0xc] ss:$16 sps:$4 sm:$0xff]   ;;  %v10046_v9 = vld [vmem:[%s14719_s3] ss:$16 sps:$4 sm:$0xff]  }
  0x11   : > { %1007 = vmatpush1.bf16.msra.mxu1 %v888_v7  ;;  %2404 = vmatprep.subr.bf16.mxu0 %v10048_v6  ;;  %vm855_vm1 = vcmask 80896   ;;  %v10049_v12 = vld [vmem:[%s14719_s3 + $0x8] ss:$16 sps:$4 sm:$0xff]   ;;  %v10054_v14 = vld [vmem:[%s14719_s3 + $0x24] ss:$16 sps:$4 sm:$0xff]   ;;  %vm2379_vm2 = vcmask 130048  }
  0x12   : > { %s14892_s23 = smov (!%p503_p3, %s8486_s23), 31  ;;  %2856 = vmatprep.subr.bf16.mxu1 %v10051_v8  ;;  %v10057_v15 = vld [vmem:[%s14719_s3 + $0x2c] ss:$16 sps:$4 sm:$0xff]   ;;  %v10052_v16 = vld [vmem:[%s14719_s3 + $0x20] ss:$16 sps:$4 sm:$0xff]   ;;  %vm8348_vm3 = vcmask 31744  }
  0x13   : > { %s11380_s28 = sshll.u32 %s14892_s23, 3  ;;  %v10055_v17 = vld [vmem:[%s14719_s3 + $0x28] ss:$16 sps:$4 sm:$0xff]   ;;  %v10060_v20 = vld [vmem:[%s14719_s3 + $0x44] ss:$16 sps:$4 sm:$0xff]   ;;  %s10011_s21 = smul.u32 28, %s14892_s23 }
  0x14   : > { %s11389_s18 = scalar_lea.vmem %s14717_s1, %s11380_s28  ;;  %v10063_v21 = vld [vmem:[%s14719_s3 + $0x4c] ss:$16 sps:$4 sm:$0xff]   ;;  %v10058_v22 = vld [vmem:[%s14719_s3 + $0x40] ss:$16 sps:$4 sm:$0xff]   ;;  %v10061_v24 = vld [vmem:[%s14719_s3 + $0x48] ss:$16 sps:$4 sm:$0xff]   ;;  %s12674_s26 = scalar_lea.vmem %s14718_s2, %s11380_s28 }
  0x15   : > { %v599_v10 = vld [vmem:[%s11389_s18] sm:$0xff]  ;;  %v600_v11 = vld [vmem:[%s11389_s18 + $0x8] sm:$0xff]  ;;  %v601_v18 = vld [vmem:[%s11389_s18 + $0x10] sm:$0xff]  ;;  %s11571_s17 = scalar_lea.vmem %s14716_s0, %s10011_s21  ;;  %s11268_s22 = smov 126   ;;  %vm8286_vm4 = vcmask 125952  }
  0x16   : > { %v11396_v13 = vpack.c.bf16 %v600_v11, %v599_v10  ;;  %v602_v19 = vld [vmem:[%s11389_s18 + $0x18] sm:$0xff]  ;;  %v10066_v25 = vld [vmem:[%s14719_s3 + $0x64] ss:$16 sps:$4 sm:$0xff]   ;;  %v10064_v27 = vld [vmem:[%s14719_s3 + $0x60] ss:$16 sps:$4 sm:$0xff]   ;;  %s14283_s25 = scalar_lea.vmem %s14729_s13, %s10011_s21 }
  0x17   : > { %v11427_v23 = vpack.c.bf16 %v602_v19, %v601_v18  ;;  %v10069_v26 = vld [vmem:[%s14719_s3 + $0x6c] ss:$16 sps:$4 sm:$0xff]   ;;  %v10067_v28 = vld [vmem:[%s14719_s3 + $0x68] ss:$16 sps:$4 sm:$0xff]   ;;  %v603_v29 = vld [vmem:[%s11389_s18 + $0x20] sm:$0xff] }
  0x18   : > { %8501 = vmatmul.mubr.msk.bf16.vlgmr.msra.gmra.mrb[0].mxu0 %vm855_vm1, %v11396_v13  ;;  %8510 = vmatmul.mubr.msk.bf16.vlgmr.msra.gmra.mrb[0].mxu1 %vm855_vm1, %v11396_v13  ;;  %v604_v30 = vld [vmem:[%s11389_s18 + $0x28] sm:$0xff]  ;;  %v10072_v31 = vld [vmem:[%s14719_s3 + $0x84] ss:$16 sps:$4 sm:$0xff]   ;;  %v10070_v33 = vld [vmem:[%s14719_s3 + $0x80] ss:$16 sps:$4 sm:$0xff]  }
  0x19   : > { %2405 = vmatpush1.bf16.msra.mxu0 %v10046_v9  ;;  %2857 = vmatpush1.bf16.msra.mxu1 %v10049_v12  ;;  %v10075_v32 = vld [vmem:[%s14719_s3 + $0x8c] ss:$16 sps:$4 sm:$0xff]   ;;  %v11461_v34 = vpack.c.bf16 %v604_v30, %v603_v29  ;;  %v10073_v35 = vld [vmem:[%s14719_s3 + $0x88] ss:$16 sps:$4 sm:$0xff]   ;;  %v10078_v36 = vld [vmem:[%s14719_s3 + $0xa4] ss:$16 sps:$4 sm:$0xff]  }
  0x1a   : > { %2406 = vmatprep.subr.bf16.mxu0 %v10054_v14  ;;  %2858 = vmatprep.subr.bf16.mxu1 %v10057_v15  ;;  %v10081_v37 = vld [vmem:[%s14719_s3 + $0xac] ss:$16 sps:$4 sm:$0xff]   ;;  %v10076_v38 = vld [vmem:[%s14719_s3 + $0xa0] ss:$16 sps:$4 sm:$0xff]   ;;  %v10079_v39 = vld [vmem:[%s14719_s3 + $0xa8] ss:$16 sps:$4 sm:$0xff]  }
  0x1b   : > { %935 = vmatprep.mubr.bf16.mxu0 %v14733_v3  ;;  %1048 = vmatprep.mubr.bf16.mxu1 %v14733_v3  ;;  %v10084_v40 = vld [vmem:[%s14719_s3 + $0xc4] ss:$16 sps:$4 sm:$0xff]   ;;  %v606_v42 = vld [vmem:[%s11389_s18 + $0x38] sm:$0xff]  ;;  %v10082_v45 = vld [vmem:[%s14719_s3 + $0xc0] ss:$16 sps:$4 sm:$0xff]  }
  0x1c   : > { %v605_v41 = vld [vmem:[%s11389_s18 + $0x30] sm:$0xff]  ;;  %v10087_v43 = vld [vmem:[%s14719_s3 + $0xcc] ss:$16 sps:$4 sm:$0xff]   ;;  %v10085_v46 = vld [vmem:[%s14719_s3 + $0xc8] ss:$16 sps:$4 sm:$0xff]  }
  0x1d   : > { %2407 = vmatpush1.bf16.msra.mxu0 %v10052_v16  ;;  %2859 = vmatpush1.bf16.msra.mxu1 %v10055_v17  ;;  %v11492_v44 = vpack.c.bf16 %v606_v42, %v605_v41  ;;  %v10090_v47 = vld [vmem:[%s14719_s3 + $0xe4] ss:$16 sps:$4 sm:$0xff]   ;;  %v10093_v48 = vld [vmem:[%s14719_s3 + $0xec] ss:$16 sps:$4 sm:$0xff]   ;;  %v10088_v49 = vld [vmem:[%s14719_s3 + $0xe0] ss:$16 sps:$4 sm:$0xff]  }
  0x1e   : > { %2408 = vmatprep.subr.bf16.mxu0 %v10060_v20  ;;  %2860 = vmatprep.subr.bf16.mxu1 %v10063_v21  ;;  %v10091_v50 = vld [vmem:[%s14719_s3 + $0xe8] ss:$16 sps:$4 sm:$0xff]   ;;  %v607_v51 = vld [vmem:[%s11389_s18 + $0x40] sm:$0xff]  ;;  %v10099_v54 = vld [vmem:[%s14719_s3 + $0x10c] ss:$16 sps:$4 sm:$0xff]  }
  0x1f   : > { %v608_v52 = vld [vmem:[%s11389_s18 + $0x48] sm:$0xff]  ;;  %v10096_v53 = vld [vmem:[%s14719_s3 + $0x104] ss:$16 sps:$4 sm:$0xff]   ;;  %v10094_v55 = vld [vmem:[%s14719_s3 + $0x100] ss:$16 sps:$4 sm:$0xff]  }
  0x20   : > { %8502 = vmatmul.mubr.msk.bf16.gmra.mrb[4].mxu0 %vm855_vm1, %v11427_v23  ;;  %8511 = vmatmul.mubr.msk.bf16.gmra.mrb[4].mxu1 %vm855_vm1, %v11427_v23  ;;  %v11529_v56 = vpack.c.bf16 %v608_v52, %v607_v51  ;;  %v10097_v57 = vld [vmem:[%s14719_s3 + $0x108] ss:$16 sps:$4 sm:$0xff]   ;;  %v10102_v58 = vld [vmem:[%s14719_s3 + $0x124] ss:$16 sps:$4 sm:$0xff]   ;;  %v10105_v59 = vld [vmem:[%s14719_s3 + $0x12c] ss:$16 sps:$4 sm:$0xff]  }
  0x21   : > { %2409 = vmatpush1.bf16.msra.mxu0 %v10058_v22  ;;  %2861 = vmatpush1.bf16.msra.mxu1 %v10061_v24  ;;  %v10100_v60 = vld [vmem:[%s14719_s3 + $0x120] ss:$16 sps:$4 sm:$0xff]   ;;  %v10103_v61 = vld [vmem:[%s14719_s3 + $0x128] ss:$16 sps:$4 sm:$0xff]   ;;  %v10108_v0 = vld [vmem:[%s14719_s3 + $0x144] ss:$16 sps:$4 sm:$0xff]  }
  0x22   : > { %2410 = vmatprep.subr.bf16.mxu0 %v10066_v25  ;;  %2862 = vmatprep.subr.bf16.mxu1 %v10069_v26  ;;  %v609_v62 = vld [vmem:[%s11389_s18 + $0x50] sm:$0xff]  ;;  %v610_v63 = vld [vmem:[%s11389_s18 + $0x58] sm:$0xff]  ;;  %v611_v10 = vld [vmem:[%s11389_s18 + $0x60] sm:$0xff] }
  0x23   : > { %945 = vmatprep.mubr.bf16.mxu0 %v14733_v3  ;;  %1058 = vmatprep.mubr.bf16.mxu1 %v14733_v3  ;;  %v10111_v1 = vld [vmem:[%s14719_s3 + $0x14c] ss:$16 sps:$4 sm:$0xff]   ;;  %v10106_v2 = vld [vmem:[%s14719_s3 + $0x140] ss:$16 sps:$4 sm:$0xff]   ;;  %v11564_v4 = vpack.c.bf16 %v610_v63, %v609_v62  ;;  %v10109_v5 = vld [vmem:[%s14719_s3 + $0x148] ss:$16 sps:$4 sm:$0xff]  }
  0x24   : > { %v10114_v6 = vld [vmem:[%s14719_s3 + $0x164] ss:$16 sps:$4 sm:$0xff]   ;;  %v10117_v7 = vld [vmem:[%s14719_s3 + $0x16c] ss:$16 sps:$4 sm:$0xff]   ;;  %v10112_v8 = vld [vmem:[%s14719_s3 + $0x160] ss:$16 sps:$4 sm:$0xff]  }
  0x25   : > { %2411 = vmatpush1.bf16.msra.mxu0 %v10064_v27  ;;  %2863 = vmatpush1.bf16.msra.mxu1 %v10067_v28  ;;  %v10115_v9 = vld [vmem:[%s14719_s3 + $0x168] ss:$16 sps:$4 sm:$0xff]   ;;  %v10120_v12 = vld [vmem:[%s14719_s3 + $0x184] ss:$16 sps:$4 sm:$0xff]   ;;  %v10123_v14 = vld [vmem:[%s14719_s3 + $0x18c] ss:$16 sps:$4 sm:$0xff]  }
  0x26   : > { %2412 = vmatprep.subr.bf16.mxu0 %v10072_v31  ;;  %2864 = vmatprep.subr.bf16.mxu1 %v10075_v32  ;;  %v612_v11 = vld [vmem:[%s11389_s18 + $0x68] sm:$0xff]  ;;  %v10118_v15 = vld [vmem:[%s14719_s3 + $0x180] ss:$16 sps:$4 sm:$0xff]   ;;  %v10126_v18 = vld [vmem:[%s14719_s3 + $0x1a4] ss:$16 sps:$4 sm:$0xff]  }
  0x27   : > { %v11605_v16 = vpack.c.bf16 %v612_v11, %v611_v10  ;;  %v10121_v17 = vld [vmem:[%s14719_s3 + $0x188] ss:$16 sps:$4 sm:$0xff]   ;;  %v10129_v19 = vld [vmem:[%s14719_s3 + $0x1ac] ss:$16 sps:$4 sm:$0xff]   ;;  %v10124_v20 = vld [vmem:[%s14719_s3 + $0x1a0] ss:$16 sps:$4 sm:$0xff]  }
  0x28   : > { %8503 = vmatmul.mubr.msk.bf16.gmra.mrb[8].mxu0 %vm855_vm1, %v11461_v34  ;;  %8512 = vmatmul.mubr.msk.bf16.gmra.mrb[8].mxu1 %vm855_vm1, %v11461_v34  ;;  %v10127_v21 = vld [vmem:[%s14719_s3 + $0x1a8] ss:$16 sps:$4 sm:$0xff]   ;;  %v613_v22 = vld [vmem:[%s11389_s18 + $0x70] sm:$0xff]  ;;  %v10135_v26 = vld [vmem:[%s14719_s3 + $0x1cc] ss:$16 sps:$4 sm:$0xff]  }
  0x29   : > { %2413 = vmatpush1.bf16.msra.mxu0 %v10070_v33  ;;  %2865 = vmatpush1.bf16.msra.mxu1 %v10073_v35  ;;  %v614_v24 = vld [vmem:[%s11389_s18 + $0x78] sm:$0xff]  ;;  %v10132_v25 = vld [vmem:[%s14719_s3 + $0x1c4] ss:$16 sps:$4 sm:$0xff]   ;;  %v10130_v27 = vld [vmem:[%s14719_s3 + $0x1c0] ss:$16 sps:$4 sm:$0xff]   ;;  %s12410_s18 = scalar_lea.vmem %s14730_s14, %s11380_s28 }
  0x2a   : > { %2414 = vmatprep.subr.bf16.mxu0 %v10078_v36  ;;  %2866 = vmatprep.subr.bf16.mxu1 %v10081_v37  ;;  %v11639_v28 = vpack.c.bf16 %v614_v24, %v613_v22  ;;  %v10133_v29 = vld [vmem:[%s14719_s3 + $0x1c8] ss:$16 sps:$4 sm:$0xff]   ;;  %v10138_v30 = vld [vmem:[%s14719_s3 + $0x1e4] ss:$16 sps:$4 sm:$0xff]   ;;  %v10141_v31 = vld [vmem:[%s14719_s3 + $0x1ec] ss:$16 sps:$4 sm:$0xff]  }
  0x2b   : > { %955 = vmatprep.mubr.bf16.mxu0 %v14733_v3  ;;  %1068 = vmatprep.mubr.bf16.mxu1 %v14733_v3  ;;  %v10144_v32 = vld [vmem:[%s11571_s17 + $0x4] ss:$28 sps:$4 sm:$0xff]   ;;  %v10139_v35 = vld [vmem:[%s14719_s3 + $0x1e8] ss:$16 sps:$4 sm:$0xff]   ;;  %v10150_v37 = vld [vmem:[%s14719_s3 + $0x20c] ss:$16 sps:$4 sm:$0xff]  }
  0x2c   : > { %v10136_v33 = vld [vmem:[%s14719_s3 + $0x1e0] ss:$16 sps:$4 sm:$0xff]   ;;  %v10147_v36 = vld [vmem:[%s14719_s3 + $0x204] ss:$16 sps:$4 sm:$0xff]   ;;  %v10156_v42 = vld [vmem:[%s14719_s3 + $0x22c] ss:$16 sps:$4 sm:$0xff]  }
  0x2d   : > { %2415 = vmatpush1.bf16.msra.mxu0 %v10076_v38  ;;  %2867 = vmatpush1.bf16.msra.mxu1 %v10079_v39  ;;  %v10142_v38 = vld [vmem:[%s11571_s17] ss:$28 sps:$4 sm:$0xff]   ;;  %v10153_v41 = vld [vmem:[%s14719_s3 + $0x224] ss:$16 sps:$4 sm:$0xff]   ;;  %v10163_v51 = vld [vmem:[%s14719_s3 + $0x248] ss:$16 sps:$4 sm:$0xff]  }
  0x2e   : > { %2416 = vmatprep.subr.bf16.mxu0 %v10084_v40  ;;  %2868 = vmatprep.subr.bf16.mxu1 %v10087_v43  ;;  %v10145_v39 = vld [vmem:[%s14719_s3 + $0x200] ss:$16 sps:$4 sm:$0xff]   ;;  %v10148_v40 = vld [vmem:[%s14719_s3 + $0x208] ss:$16 sps:$4 sm:$0xff]   ;;  %v10168_v52 = vld [vmem:[%s14719_s3 + $0x264] ss:$16 sps:$4 sm:$0xff]  }
  0x2f   : > { %v10151_v43 = vld [vmem:[%s14719_s3 + $0x220] ss:$16 sps:$4 sm:$0xff]   ;;  %v10178_v62 = vld [vmem:[%s14719_s3 + $0x288] ss:$16 sps:$4 sm:$0xff]   ;;  %v10183_v63 = vld [vmem:[%s14719_s3 + $0x2a4] ss:$16 sps:$4 sm:$0xff]  }
  0x30   : > { %8504 = vmatmul.mubr.msk.bf16.gmra.mrb[12].mxu0 %vm855_vm1, %v11492_v44  ;;  %8513 = vmatmul.mubr.msk.bf16.gmra.mrb[12].mxu1 %vm855_vm1, %v11492_v44  ;;  %v10193_v10 = vld [vmem:[%s14719_s3 + $0x2c8] ss:$16 sps:$4 sm:$0xff]   ;;  %v10198_v11 = vld [vmem:[%s14719_s3 + $0x2e4] ss:$16 sps:$4 sm:$0xff]  }
  0x31   : > { %2417 = vmatpush1.bf16.msra.mxu0 %v10082_v45  ;;  %2869 = vmatpush1.bf16.msra.mxu1 %v10085_v46  ;;  %v10157_v45 = vld [vmem:[%s11571_s17 + $0x3c] ss:$28 sps:$4 sm:$0xff]   ;;  %v10213_v24 = vld [vmem:[%s14719_s3 + $0x324] ss:$16 sps:$4 sm:$0xff]  }
  0x32   : > { %2418 = vmatprep.subr.bf16.mxu0 %v10090_v47  ;;  %2870 = vmatprep.subr.bf16.mxu1 %v10093_v48  ;;  %v10154_v46 = vld [vmem:[%s14719_s3 + $0x228] ss:$16 sps:$4 sm:$0xff]   ;;  %v10161_v47 = vld [vmem:[%s14719_s3 + $0x244] ss:$16 sps:$4 sm:$0xff]   ;;  %v10165_v48 = vld [vmem:[%s14719_s3 + $0x24c] ss:$16 sps:$4 sm:$0xff]  }
  0x33   : > { %965 = vmatprep.mubr.bf16.mxu0 %v14733_v3  ;;  %1078 = vmatprep.mubr.bf16.mxu1 %v14733_v3  ;;  %v10208_v22 = vld [vmem:[%s14719_s3 + $0x308] ss:$16 sps:$4 sm:$0xff]  }
  0x35   : > { %2419 = vmatpush1.bf16.msra.mxu0 %v10088_v49  ;;  %2871 = vmatpush1.bf16.msra.mxu1 %v10091_v50  ;;  %v10159_v49 = vld [vmem:[%s14719_s3 + $0x240] ss:$16 sps:$4 sm:$0xff]   ;;  %v10162_v50 = vld [vmem:[%s11571_s17 + $0x38] ss:$28 sps:$4 sm:$0xff]  }
  0x36   : > { %2420 = vmatprep.subr.bf16.mxu0 %v10096_v53  ;;  %2872 = vmatprep.subr.bf16.mxu1 %v10099_v54  ;;  %v10171_v53 = vld [vmem:[%s14719_s3 + $0x26c] ss:$16 sps:$4 sm:$0xff]   ;;  %v10172_v54 = vld [vmem:[%s11571_s17 + $0x74] ss:$28 sps:$4 sm:$0xff]  }
  0x38   : > { %8505 = vmatmul.mubr.msk.bf16.gmra.mrb[16].mxu0 %vm855_vm1, %v11529_v56  ;;  %8514 = vmatmul.mubr.msk.bf16.gmra.mrb[16].mxu1 %vm855_vm1, %v11529_v56 }
  0x39   : > { %2421 = vmatpush1.bf16.msra.mxu0 %v10094_v55  ;;  %2873 = vmatpush1.bf16.msra.mxu1 %v10097_v57  ;;  %v10166_v55 = vld [vmem:[%s14719_s3 + $0x260] ss:$16 sps:$4 sm:$0xff]   ;;  %v10169_v57 = vld [vmem:[%s14719_s3 + $0x268] ss:$16 sps:$4 sm:$0xff]  }
  0x3a   : > { %2422 = vmatprep.subr.bf16.mxu0 %v10102_v58  ;;  %2874 = vmatprep.subr.bf16.mxu1 %v10105_v59  ;;  %v10176_v58 = vld [vmem:[%s14719_s3 + $0x284] ss:$16 sps:$4 sm:$0xff]   ;;  %v10180_v59 = vld [vmem:[%s14719_s3 + $0x28c] ss:$16 sps:$4 sm:$0xff]  }
  0x3b   : > { %975 = vmatprep.mubr.bf16.mxu0 %v14733_v3  ;;  %1088 = vmatprep.mubr.bf16.mxu1 %v14733_v3 }
  0x3d   : > { %2423 = vmatpush1.bf16.msra.mxu0 %v10100_v60  ;;  %2875 = vmatpush1.bf16.msra.mxu1 %v10103_v61  ;;  %v10174_v60 = vld [vmem:[%s14719_s3 + $0x280] ss:$16 sps:$4 sm:$0xff]  }
  0x3e   : > { %2424 = vmatprep.subr.bf16.mxu0 %v10108_v0  ;;  %2876 = vmatprep.subr.bf16.mxu1 %v10111_v1  ;;  %v10177_v61 = vld [vmem:[%s11571_s17 + $0x70] ss:$28 sps:$4 sm:$0xff]  }
  0x3f   : > { %v10186_v0 = vld [vmem:[%s14719_s3 + $0x2ac] ss:$16 sps:$4 sm:$0xff]  }
  0x40   : > { %8506 = vmatmul.mubr.msk.bf16.gmra.mrb[20].mxu0 %vm855_vm1, %v11564_v4  ;;  %8515 = vmatmul.mubr.msk.bf16.gmra.mrb[20].mxu1 %vm855_vm1, %v11564_v4  ;;  %v10187_v1 = vld [vmem:[%s11571_s17 + $0xac] ss:$28 sps:$4 sm:$0xff]  }
  0x41   : > { %2425 = vmatpush1.bf16.msra.mxu0 %v10106_v2  ;;  %2877 = vmatpush1.bf16.msra.mxu1 %v10109_v5  ;;  %v10181_v2 = vld [vmem:[%s14719_s3 + $0x2a0] ss:$16 sps:$4 sm:$0xff]   ;;  %v10184_v5 = vld [vmem:[%s14719_s3 + $0x2a8] ss:$16 sps:$4 sm:$0xff]  }
  0x42   : > { %2426 = vmatprep.subr.bf16.mxu0 %v10114_v6  ;;  %2878 = vmatprep.subr.bf16.mxu1 %v10117_v7  ;;  %v10191_v6 = vld [vmem:[%s14719_s3 + $0x2c4] ss:$16 sps:$4 sm:$0xff]   ;;  %v10195_v7 = vld [vmem:[%s14719_s3 + $0x2cc] ss:$16 sps:$4 sm:$0xff]  }
  0x43   : > { %985 = vmatprep.mubr.bf16.mxu0 %v14733_v3  ;;  %1098 = vmatprep.mubr.bf16.mxu1 %v14733_v3 }
  0x45   : > { %2427 = vmatpush1.bf16.msra.mxu0 %v10112_v8  ;;  %2879 = vmatpush1.bf16.msra.mxu1 %v10115_v9  ;;  %v10189_v8 = vld [vmem:[%s14719_s3 + $0x2c0] ss:$16 sps:$4 sm:$0xff]   ;;  %v10192_v9 = vld [vmem:[%s11571_s17 + $0xa8] ss:$28 sps:$4 sm:$0xff]  }
  0x46   : > { %2428 = vmatprep.subr.bf16.mxu0 %v10120_v12  ;;  %2880 = vmatprep.subr.bf16.mxu1 %v10123_v14  ;;  %v10201_v12 = vld [vmem:[%s14719_s3 + $0x2ec] ss:$16 sps:$4 sm:$0xff]   ;;  %v10202_v14 = vld [vmem:[%s11571_s17 + $0xe4] ss:$28 sps:$4 sm:$0xff]  }
  0x48   : > { %8507 = vmatmul.mubr.msk.bf16.gmra.mrb[24].mxu0 %vm855_vm1, %v11605_v16  ;;  %8516 = vmatmul.mubr.msk.bf16.gmra.mrb[24].mxu1 %vm855_vm1, %v11605_v16 }
  0x49   : > { %2429 = vmatpush1.bf16.msra.mxu0 %v10118_v15  ;;  %2881 = vmatpush1.bf16.msra.mxu1 %v10121_v17  ;;  %v10196_v15 = vld [vmem:[%s14719_s3 + $0x2e0] ss:$16 sps:$4 sm:$0xff]   ;;  %v10199_v17 = vld [vmem:[%s14719_s3 + $0x2e8] ss:$16 sps:$4 sm:$0xff]  }
  0x4a   : > { %2430 = vmatprep.subr.bf16.mxu0 %v10126_v18  ;;  %2882 = vmatprep.subr.bf16.mxu1 %v10129_v19  ;;  %v10206_v18 = vld [vmem:[%s14719_s3 + $0x304] ss:$16 sps:$4 sm:$0xff]   ;;  %v10210_v19 = vld [vmem:[%s14719_s3 + $0x30c] ss:$16 sps:$4 sm:$0xff]  }
  0x4b   : > { %995 = vmatprep.mubr.bf16.mxu0 %v14733_v3  ;;  %1108 = vmatprep.mubr.bf16.mxu1 %v14733_v3 }
  0x4d   : > { %2431 = vmatpush1.bf16.msra.mxu0 %v10124_v20  ;;  %2883 = vmatpush1.bf16.msra.mxu1 %v10127_v21  ;;  %v10204_v20 = vld [vmem:[%s14719_s3 + $0x300] ss:$16 sps:$4 sm:$0xff]  }
  0x4e   : > { %2432 = vmatprep.subr.bf16.mxu0 %v10132_v25  ;;  %2884 = vmatprep.subr.bf16.mxu1 %v10135_v26  ;;  %v10207_v21 = vld [vmem:[%s11571_s17 + $0xe0] ss:$28 sps:$4 sm:$0xff]  }
  0x4f   : > { %v10216_v25 = vld [vmem:[%s14719_s3 + $0x32c] ss:$16 sps:$4 sm:$0xff]  }
  0x50   : > { %8508 = vmatmul.mubr.msk.bf16.gmra.mrb[28].mxu0 %vm855_vm1, %v11639_v28  ;;  %8517 = vmatmul.mubr.msk.bf16.gmra.mrb[28].mxu1 %vm855_vm1, %v11639_v28  ;;  %v10217_v26 = vld [vmem:[%s11571_s17 + $0x11c] ss:$28 sps:$4 sm:$0xff]  }
  0x51   : > { %2433 = vmatpush1.bf16.msra.mxu0 %v10130_v27  ;;  %2885 = vmatpush1.bf16.msra.mxu1 %v10133_v29  ;;  %v10211_v27 = vld [vmem:[%s14719_s3 + $0x320] ss:$16 sps:$4 sm:$0xff]   ;;  %v10214_v29 = vld [vmem:[%s14719_s3 + $0x328] ss:$16 sps:$4 sm:$0xff]  }
  0x52   : > { %2434 = vmatprep.subr.bf16.mxu0 %v10138_v30  ;;  %2886 = vmatprep.subr.bf16.mxu1 %v10141_v31  ;;  %v10221_v30 = vld [vmem:[%s14719_s3 + $0x344] ss:$16 sps:$4 sm:$0xff]   ;;  %v10225_v31 = vld [vmem:[%s14719_s3 + $0x34c] ss:$16 sps:$4 sm:$0xff]  }
  0x53   : > { %2436 = vmatprep.mubr.bf16.mxu0 %v10144_v32  ;;  %2888 = vmatprep.mubr.bf16.mxu1 %v10144_v32  ;;  %v10219_v32 = vld [vmem:[%s14719_s3 + $0x340] ss:$16 sps:$4 sm:$0xff]  }
  0x55   : > { %2435 = vmatpush1.bf16.msra.mxu0 %v10136_v33  ;;  %2887 = vmatpush1.bf16.msra.mxu1 %v10139_v35  ;;  %v10222_v33 = vld [vmem:[%s11571_s17 + $0x118] ss:$28 sps:$4 sm:$0xff]  }
  0x56   : > { %2517 = vmatprep.subr.bf16.mxu0 %v10147_v36  ;;  %2969 = vmatprep.subr.bf16.mxu1 %v10150_v37  ;;  %v10223_v35 = vld [vmem:[%s14719_s3 + $0x348] ss:$16 sps:$4 sm:$0xff]   ;;  %v10228_v36 = vld [vmem:[%s14719_s3 + $0x364] ss:$16 sps:$4 sm:$0xff]   ;;  %v10231_v37 = vld [vmem:[%s14719_s3 + $0x36c] ss:$16 sps:$4 sm:$0xff]  }
  0x58   : > { %2437 = vmatmul.mubr.bf16.vlgmr.msra.gmra.mrb[0].mxu0 %v10142_v38  ;;  %2889 = vmatmul.mubr.bf16.vlgmr.msra.gmra.mrb[0].mxu1 %v10142_v38  ;;  %v10226_v38 = vld [vmem:[%s14719_s3 + $0x360] ss:$16 sps:$4 sm:$0xff]  }
  0x59   : > { %2518 = vmatpush1.bf16.msra.mxu0 %v10145_v39  ;;  %2970 = vmatpush1.bf16.msra.mxu1 %v10148_v40  ;;  %v10232_v39 = vld [vmem:[%s11571_s17 + $0x154] ss:$28 sps:$4 sm:$0xff]   ;;  %v10229_v40 = vld [vmem:[%s14719_s3 + $0x368] ss:$16 sps:$4 sm:$0xff]  }
  0x5a   : > { %2519 = vmatprep.subr.bf16.mxu0 %v10153_v41  ;;  %2971 = vmatprep.subr.bf16.mxu1 %v10156_v42  ;;  %v10236_v41 = vld [vmem:[%s14719_s3 + $0x384] ss:$16 sps:$4 sm:$0xff]   ;;  %v10240_v42 = vld [vmem:[%s14719_s3 + $0x38c] ss:$16 sps:$4 sm:$0xff]  }
  0x5b   : > { %2446 = vmatprep.mubr.bf16.mxu0 %v10157_v45  ;;  %2898 = vmatprep.mubr.bf16.mxu1 %v10157_v45  ;;  %v10237_v45 = vld [vmem:[%s11571_s17 + $0x150] ss:$28 sps:$4 sm:$0xff]  }
  0x5d   : > { %2520 = vmatpush1.bf16.msra.mxu0 %v10151_v43  ;;  %2972 = vmatpush1.bf16.msra.mxu1 %v10154_v46  ;;  %v10234_v43 = vld [vmem:[%s14719_s3 + $0x380] ss:$16 sps:$4 sm:$0xff]   ;;  %v10238_v46 = vld [vmem:[%s14719_s3 + $0x388] ss:$16 sps:$4 sm:$0xff]  }
  0x5e   : > { %2521 = vmatprep.subr.bf16.mxu0 %v10161_v47  ;;  %2973 = vmatprep.subr.bf16.mxu1 %v10165_v48  ;;  %v10243_v47 = vld [vmem:[%s14719_s3 + $0x3a4] ss:$16 sps:$4 sm:$0xff]   ;;  %v10246_v48 = vld [vmem:[%s14719_s3 + $0x3ac] ss:$16 sps:$4 sm:$0xff]  }
  0x60   : > { %2447 = vmatmul.mubr.bf16.gmra.mrb[4].mxu0 %v10162_v50  ;;  %2899 = vmatmul.mubr.bf16.gmra.mrb[4].mxu1 %v10162_v50  ;;  %v10241_v50 = vld [vmem:[%s14719_s3 + $0x3a0] ss:$16 sps:$4 sm:$0xff]  }
  0x61   : > { %2522 = vmatpush1.bf16.msra.mxu0 %v10159_v49  ;;  %2974 = vmatpush1.bf16.msra.mxu1 %v10163_v51  ;;  %v10247_v49 = vld [vmem:[%s11571_s17 + $0x18c] ss:$28 sps:$4 sm:$0xff]  }
  0x62   : > { %2523 = vmatprep.subr.bf16.mxu0 %v10168_v52  ;;  %2975 = vmatprep.subr.bf16.mxu1 %v10171_v53  ;;  %v10244_v51 = vld [vmem:[%s14719_s3 + $0x3a8] ss:$16 sps:$4 sm:$0xff]   ;;  %v10251_v52 = vld [vmem:[%s14719_s3 + $0x3c4] ss:$16 sps:$4 sm:$0xff]   ;;  %v10255_v53 = vld [vmem:[%s14719_s3 + $0x3cc] ss:$16 sps:$4 sm:$0xff]  }
  0x63   : > { %2456 = vmatprep.mubr.bf16.mxu0 %v10172_v54  ;;  %2908 = vmatprep.mubr.bf16.mxu1 %v10172_v54  ;;  %v10249_v54 = vld [vmem:[%s14719_s3 + $0x3c0] ss:$16 sps:$4 sm:$0xff]  }
  0x65   : > { %2524 = vmatpush1.bf16.msra.mxu0 %v10166_v55  ;;  %2976 = vmatpush1.bf16.msra.mxu1 %v10169_v57  ;;  %v10252_v55 = vld [vmem:[%s11571_s17 + $0x188] ss:$28 sps:$4 sm:$0xff]  }
  0x66   : > { %2525 = vmatprep.subr.bf16.mxu0 %v10176_v58  ;;  %2977 = vmatprep.subr.bf16.mxu1 %v10180_v59  ;;  %v10253_v57 = vld [vmem:[%s14719_s3 + $0x3c8] ss:$16 sps:$4 sm:$0xff]   ;;  %v10258_v58 = vld [vmem:[%s14719_s3 + $0x3e4] ss:$16 sps:$4 sm:$0xff]   ;;  %v10261_v59 = vld [vmem:[%s14719_s3 + $0x3ec] ss:$16 sps:$4 sm:$0xff]  }
  0x68   : > { %2457 = vmatmul.mubr.bf16.gmra.mrb[8].mxu0 %v10177_v61  ;;  %2909 = vmatmul.mubr.bf16.gmra.mrb[8].mxu1 %v10177_v61  ;;  %v10256_v61 = vld [vmem:[%s14719_s3 + $0x3e0] ss:$16 sps:$4 sm:$0xff]  }
  0x69   : > { %2526 = vmatpush1.bf16.msra.mxu0 %v10174_v60  ;;  %2978 = vmatpush1.bf16.msra.mxu1 %v10178_v62  ;;  %v10264_v60 = vld [vmem:[%s11571_s17 + $0xc] ss:$28 sps:$4 sm:$0xff]  }
  0x6a   : > { %2527 = vmatprep.subr.bf16.mxu0 %v10183_v63  ;;  %2979 = vmatprep.subr.bf16.mxu1 %v10186_v0  ;;  %v10259_v62 = vld [vmem:[%s14719_s3 + $0x3e8] ss:$16 sps:$4 sm:$0xff]   ;;  %v10267_v63 = vld [vmem:[%s14719_s3 + $0x404] ss:$16 sps:$4 sm:$0xff]   ;;  %v10270_v0 = vld [vmem:[%s14719_s3 + $0x40c] ss:$16 sps:$4 sm:$0xff]  }
  0x6b   : > { %2466 = vmatprep.mubr.bf16.mxu0 %v10187_v1  ;;  %2918 = vmatprep.mubr.bf16.mxu1 %v10187_v1  ;;  %v10262_v1 = vld [vmem:[%s11571_s17 + $0x8] ss:$28 sps:$4 sm:$0xff]  }
  0x6d   : > { %2528 = vmatpush1.bf16.msra.mxu0 %v10181_v2  ;;  %2980 = vmatpush1.bf16.msra.mxu1 %v10184_v5  ;;  %v10265_v2 = vld [vmem:[%s14719_s3 + $0x400] ss:$16 sps:$4 sm:$0xff]   ;;  %v10268_v5 = vld [vmem:[%s14719_s3 + $0x408] ss:$16 sps:$4 sm:$0xff]  }
  0x6e   : > { %2529 = vmatprep.subr.bf16.mxu0 %v10191_v6  ;;  %2981 = vmatprep.subr.bf16.mxu1 %v10195_v7  ;;  %v10273_v6 = vld [vmem:[%s14719_s3 + $0x424] ss:$16 sps:$4 sm:$0xff]   ;;  %v10276_v7 = vld [vmem:[%s14719_s3 + $0x42c] ss:$16 sps:$4 sm:$0xff]  }
  0x70   : > { %2467 = vmatmul.mubr.bf16.gmra.mrb[12].mxu0 %v10192_v9  ;;  %2919 = vmatmul.mubr.bf16.gmra.mrb[12].mxu1 %v10192_v9  ;;  %v10271_v9 = vld [vmem:[%s14719_s3 + $0x420] ss:$16 sps:$4 sm:$0xff]  }
  0x71   : > { %2530 = vmatpush1.bf16.msra.mxu0 %v10189_v8  ;;  %2982 = vmatpush1.bf16.msra.mxu1 %v10193_v10  ;;  %v10277_v8 = vld [vmem:[%s11571_s17 + $0x44] ss:$28 sps:$4 sm:$0xff]   ;;  %v10274_v10 = vld [vmem:[%s14719_s3 + $0x428] ss:$16 sps:$4 sm:$0xff]  }
  0x72   : > { %2531 = vmatprep.subr.bf16.mxu0 %v10198_v11  ;;  %2983 = vmatprep.subr.bf16.mxu1 %v10201_v12  ;;  %v10281_v11 = vld [vmem:[%s14719_s3 + $0x444] ss:$16 sps:$4 sm:$0xff]   ;;  %v10285_v12 = vld [vmem:[%s14719_s3 + $0x44c] ss:$16 sps:$4 sm:$0xff]  }
  0x73   : > { %2476 = vmatprep.mubr.bf16.mxu0 %v10202_v14  ;;  %2928 = vmatprep.mubr.bf16.mxu1 %v10202_v14  ;;  %v10279_v14 = vld [vmem:[%s14719_s3 + $0x440] ss:$16 sps:$4 sm:$0xff]  }
  0x75   : > { %2532 = vmatpush1.bf16.msra.mxu0 %v10196_v15  ;;  %2984 = vmatpush1.bf16.msra.mxu1 %v10199_v17  ;;  %v10282_v15 = vld [vmem:[%s11571_s17 + $0x40] ss:$28 sps:$4 sm:$0xff]   ;;  %v10283_v17 = vld [vmem:[%s14719_s3 + $0x448] ss:$16 sps:$4 sm:$0xff]  }
  0x76   : > { %2533 = vmatprep.subr.bf16.mxu0 %v10206_v18  ;;  %2985 = vmatprep.subr.bf16.mxu1 %v10210_v19  ;;  %v10288_v18 = vld [vmem:[%s14719_s3 + $0x464] ss:$16 sps:$4 sm:$0xff]   ;;  %v10291_v19 = vld [vmem:[%s14719_s3 + $0x46c] ss:$16 sps:$4 sm:$0xff]  }
  0x78   : > { %2477 = vmatmul.mubr.bf16.gmra.mrb[16].mxu0 %v10207_v21  ;;  %2929 = vmatmul.mubr.bf16.gmra.mrb[16].mxu1 %v10207_v21  ;;  %v10286_v21 = vld [vmem:[%s14719_s3 + $0x460] ss:$16 sps:$4 sm:$0xff]  }
  0x79   : > { %2534 = vmatpush1.bf16.msra.mxu0 %v10204_v20  ;;  %2986 = vmatpush1.bf16.msra.mxu1 %v10208_v22  ;;  %v10292_v20 = vld [vmem:[%s11571_s17 + $0x7c] ss:$28 sps:$4 sm:$0xff]  }
  0x7a   : > { %2535 = vmatprep.subr.bf16.mxu0 %v10213_v24  ;;  %2987 = vmatprep.subr.bf16.mxu1 %v10216_v25  ;;  %v10289_v22 = vld [vmem:[%s14719_s3 + $0x468] ss:$16 sps:$4 sm:$0xff]   ;;  %v10296_v24 = vld [vmem:[%s14719_s3 + $0x484] ss:$16 sps:$4 sm:$0xff]   ;;  %v10300_v25 = vld [vmem:[%s14719_s3 + $0x48c] ss:$16 sps:$4 sm:$0xff]  }
  0x7b   : > { %2486 = vmatprep.mubr.bf16.mxu0 %v10217_v26  ;;  %2938 = vmatprep.mubr.bf16.mxu1 %v10217_v26  ;;  %v10294_v26 = vld [vmem:[%s14719_s3 + $0x480] ss:$16 sps:$4 sm:$0xff]  }
  0x7d   : > { %2536 = vmatpush1.bf16.msra.mxu0 %v10211_v27  ;;  %2988 = vmatpush1.bf16.msra.mxu1 %v10214_v29  ;;  %v10297_v27 = vld [vmem:[%s11571_s17 + $0x78] ss:$28 sps:$4 sm:$0xff]  }
  0x7e   : > { %2537 = vmatprep.subr.bf16.mxu0 %v10221_v30  ;;  %2989 = vmatprep.subr.bf16.mxu1 %v10225_v31  ;;  %v10298_v29 = vld [vmem:[%s14719_s3 + $0x488] ss:$16 sps:$4 sm:$0xff]   ;;  %v10303_v30 = vld [vmem:[%s14719_s3 + $0x4a4] ss:$16 sps:$4 sm:$0xff]   ;;  %v10306_v31 = vld [vmem:[%s14719_s3 + $0x4ac] ss:$16 sps:$4 sm:$0xff]  }
  0x80   : > { %2487 = vmatmul.mubr.bf16.gmra.mrb[20].mxu0 %v10222_v33  ;;  %2939 = vmatmul.mubr.bf16.gmra.mrb[20].mxu1 %v10222_v33  ;;  %v10301_v33 = vld [vmem:[%s14719_s3 + $0x4a0] ss:$16 sps:$4 sm:$0xff]  }
  0x81   : > { %2538 = vmatpush1.bf16.msra.mxu0 %v10219_v32  ;;  %2990 = vmatpush1.bf16.msra.mxu1 %v10223_v35  ;;  %v10307_v32 = vld [vmem:[%s11571_s17 + $0xb4] ss:$28 sps:$4 sm:$0xff]   ;;  %v10304_v35 = vld [vmem:[%s14719_s3 + $0x4a8] ss:$16 sps:$4 sm:$0xff]  }
  0x82   : > { %2539 = vmatprep.subr.bf16.mxu0 %v10228_v36  ;;  %2991 = vmatprep.subr.bf16.mxu1 %v10231_v37  ;;  %v10311_v36 = vld [vmem:[%s14719_s3 + $0x4c4] ss:$16 sps:$4 sm:$0xff]   ;;  %v10315_v37 = vld [vmem:[%s14719_s3 + $0x4cc] ss:$16 sps:$4 sm:$0xff]  }
  0x83   : > { %2496 = vmatprep.mubr.bf16.mxu0 %v10232_v39  ;;  %2948 = vmatprep.mubr.bf16.mxu1 %v10232_v39  ;;  %v10312_v39 = vld [vmem:[%s11571_s17 + $0xb0] ss:$28 sps:$4 sm:$0xff]  }
  0x85   : > { %2540 = vmatpush1.bf16.msra.mxu0 %v10226_v38  ;;  %2992 = vmatpush1.bf16.msra.mxu1 %v10229_v40  ;;  %v10309_v38 = vld [vmem:[%s14719_s3 + $0x4c0] ss:$16 sps:$4 sm:$0xff]   ;;  %v10313_v40 = vld [vmem:[%s14719_s3 + $0x4c8] ss:$16 sps:$4 sm:$0xff]  }
  0x86   : > { %2541 = vmatprep.subr.bf16.mxu0 %v10236_v41  ;;  %2993 = vmatprep.subr.bf16.mxu1 %v10240_v42  ;;  %v10318_v41 = vld [vmem:[%s14719_s3 + $0x4e4] ss:$16 sps:$4 sm:$0xff]   ;;  %v10321_v42 = vld [vmem:[%s14719_s3 + $0x4ec] ss:$16 sps:$4 sm:$0xff]  }
  0x88   : > { %2497 = vmatmul.mubr.bf16.gmra.mrb[24].mxu0 %v10237_v45  ;;  %2949 = vmatmul.mubr.bf16.gmra.mrb[24].mxu1 %v10237_v45  ;;  %v10316_v45 = vld [vmem:[%s14719_s3 + $0x4e0] ss:$16 sps:$4 sm:$0xff]  }
  0x89   : > { %2542 = vmatpush1.bf16.msra.mxu0 %v10234_v43  ;;  %2994 = vmatpush1.bf16.msra.mxu1 %v10238_v46  ;;  %v10322_v43 = vld [vmem:[%s11571_s17 + $0xec] ss:$28 sps:$4 sm:$0xff]  }
  0x8a   : > { %2543 = vmatprep.subr.bf16.mxu0 %v10243_v47  ;;  %2995 = vmatprep.subr.bf16.mxu1 %v10246_v48  ;;  %v10319_v46 = vld [vmem:[%s14719_s3 + $0x4e8] ss:$16 sps:$4 sm:$0xff]   ;;  %v10326_v47 = vld [vmem:[%s14719_s3 + $0x504] ss:$16 sps:$4 sm:$0xff]   ;;  %v10330_v48 = vld [vmem:[%s14719_s3 + $0x50c] ss:$16 sps:$4 sm:$0xff]  }
  0x8b   : > { %2506 = vmatprep.mubr.bf16.mxu0 %v10247_v49  ;;  %2958 = vmatprep.mubr.bf16.mxu1 %v10247_v49  ;;  %v10324_v49 = vld [vmem:[%s14719_s3 + $0x500] ss:$16 sps:$4 sm:$0xff]  }
  0x8d   : > { %2544 = vmatpush1.bf16.msra.mxu0 %v10241_v50  ;;  %2996 = vmatpush1.bf16.msra.mxu1 %v10244_v51  ;;  %v10327_v50 = vld [vmem:[%s11571_s17 + $0xe8] ss:$28 sps:$4 sm:$0xff]  }
  0x8e   : > { %2545 = vmatprep.subr.bf16.mxu0 %v10251_v52  ;;  %2997 = vmatprep.subr.bf16.mxu1 %v10255_v53  ;;  %v10328_v51 = vld [vmem:[%s14719_s3 + $0x508] ss:$16 sps:$4 sm:$0xff]   ;;  %v10333_v52 = vld [vmem:[%s14719_s3 + $0x524] ss:$16 sps:$4 sm:$0xff]   ;;  %v10336_v53 = vld [vmem:[%s14719_s3 + $0x52c] ss:$16 sps:$4 sm:$0xff]  }
  0x90   : > { %2507 = vmatmul.mubr.bf16.gmra.mrb[28].mxu0 %v10252_v55  ;;  %2959 = vmatmul.mubr.bf16.gmra.mrb[28].mxu1 %v10252_v55  ;;  %v10337_v55 = vld [vmem:[%s11571_s17 + $0x124] ss:$28 sps:$4 sm:$0xff]  }
  0x91   : > { %2546 = vmatpush1.bf16.msra.mxu0 %v10249_v54  ;;  %2998 = vmatpush1.bf16.msra.mxu1 %v10253_v57  ;;  %v10331_v54 = vld [vmem:[%s14719_s3 + $0x520] ss:$16 sps:$4 sm:$0xff]   ;;  %v10334_v57 = vld [vmem:[%s14719_s3 + $0x528] ss:$16 sps:$4 sm:$0xff]  }
  0x92   : > { %2547 = vmatprep.subr.bf16.mxu0 %v10258_v58  ;;  %2999 = vmatprep.subr.bf16.mxu1 %v10261_v59  ;;  %v10341_v58 = vld [vmem:[%s14719_s3 + $0x544] ss:$16 sps:$4 sm:$0xff]   ;;  %v10342_v59 = vld [vmem:[%s11571_s17 + $0x120] ss:$28 sps:$4 sm:$0xff]  }
  0x93   : > { %2549 = vmatprep.mubr.bf16.mxu0 %v10264_v60  ;;  %3001 = vmatprep.mubr.bf16.mxu1 %v10264_v60  ;;  %v10345_v60 = vld [vmem:[%s14719_s3 + $0x54c] ss:$16 sps:$4 sm:$0xff]  }
  0x95   : > { %2548 = vmatpush1.bf16.msra.mxu0 %v10256_v61  ;;  %3000 = vmatpush1.bf16.msra.mxu1 %v10259_v62  ;;  %v10339_v61 = vld [vmem:[%s14719_s3 + $0x540] ss:$16 sps:$4 sm:$0xff]   ;;  %v10343_v62 = vld [vmem:[%s14719_s3 + $0x548] ss:$16 sps:$4 sm:$0xff]  }
  0x96   : > { %2630 = vmatprep.subr.bf16.mxu0 %v10267_v63  ;;  %3082 = vmatprep.subr.bf16.mxu1 %v10270_v0  ;;  %v10348_v63 = vld [vmem:[%s14719_s3 + $0x564] ss:$16 sps:$4 sm:$0xff]   ;;  %v10351_v0 = vld [vmem:[%s14719_s3 + $0x56c] ss:$16 sps:$4 sm:$0xff]  }
  0x98   : > { %2550 = vmatmul.mubr.bf16.vlgmr.msra.gmra.mrb[0].mxu0 %v10262_v1  ;;  %3002 = vmatmul.mubr.bf16.vlgmr.msra.gmra.mrb[0].mxu1 %v10262_v1  ;;  %v10352_v1 = vld [vmem:[%s11571_s17 + $0x15c] ss:$28 sps:$4 sm:$0xff]  }
  0x99   : > { %2631 = vmatpush1.bf16.msra.mxu0 %v10265_v2  ;;  %3083 = vmatpush1.bf16.msra.mxu1 %v10268_v5  ;;  %v10346_v2 = vld [vmem:[%s14719_s3 + $0x560] ss:$16 sps:$4 sm:$0xff]   ;;  %v10349_v5 = vld [vmem:[%s14719_s3 + $0x568] ss:$16 sps:$4 sm:$0xff]  }
  0x9a   : > { %2632 = vmatprep.subr.bf16.mxu0 %v10273_v6  ;;  %3084 = vmatprep.subr.bf16.mxu1 %v10276_v7  ;;  %v10356_v6 = vld [vmem:[%s14719_s3 + $0x584] ss:$16 sps:$4 sm:$0xff]   ;;  %v10360_v7 = vld [vmem:[%s14719_s3 + $0x58c] ss:$16 sps:$4 sm:$0xff]  }
  0x9b   : > { %2559 = vmatprep.mubr.bf16.mxu0 %v10277_v8  ;;  %3011 = vmatprep.mubr.bf16.mxu1 %v10277_v8  ;;  %v10357_v8 = vld [vmem:[%s11571_s17 + $0x158] ss:$28 sps:$4 sm:$0xff]  }
  0x9d   : > { %2633 = vmatpush1.bf16.msra.mxu0 %v10271_v9  ;;  %3085 = vmatpush1.bf16.msra.mxu1 %v10274_v10  ;;  %v10354_v9 = vld [vmem:[%s14719_s3 + $0x580] ss:$16 sps:$4 sm:$0xff]   ;;  %v10358_v10 = vld [vmem:[%s14719_s3 + $0x588] ss:$16 sps:$4 sm:$0xff]  }
  0x9e   : > { %2634 = vmatprep.subr.bf16.mxu0 %v10281_v11  ;;  %3086 = vmatprep.subr.bf16.mxu1 %v10285_v12  ;;  %v10363_v11 = vld [vmem:[%s14719_s3 + $0x5a4] ss:$16 sps:$4 sm:$0xff]   ;;  %v10366_v12 = vld [vmem:[%s14719_s3 + $0x5ac] ss:$16 sps:$4 sm:$0xff]  }
  0xa0   : > { %2560 = vmatmul.mubr.bf16.gmra.mrb[4].mxu0 %v10282_v15  ;;  %3012 = vmatmul.mubr.bf16.gmra.mrb[4].mxu1 %v10282_v15  ;;  %v10361_v15 = vld [vmem:[%s14719_s3 + $0x5a0] ss:$16 sps:$4 sm:$0xff]  }
  0xa1   : > { %2635 = vmatpush1.bf16.msra.mxu0 %v10279_v14  ;;  %3087 = vmatpush1.bf16.msra.mxu1 %v10283_v17  ;;  %v10367_v14 = vld [vmem:[%s11571_s17 + $0x194] ss:$28 sps:$4 sm:$0xff]   ;;  %v10364_v17 = vld [vmem:[%s14719_s3 + $0x5a8] ss:$16 sps:$4 sm:$0xff]  }
  0xa2   : > { %2636 = vmatprep.subr.bf16.mxu0 %v10288_v18  ;;  %3088 = vmatprep.subr.bf16.mxu1 %v10291_v19  ;;  %v10371_v18 = vld [vmem:[%s14719_s3 + $0x5c4] ss:$16 sps:$4 sm:$0xff]   ;;  %v10375_v19 = vld [vmem:[%s14719_s3 + $0x5cc] ss:$16 sps:$4 sm:$0xff]  }
  0xa3   : > { %2569 = vmatprep.mubr.bf16.mxu0 %v10292_v20  ;;  %3021 = vmatprep.mubr.bf16.mxu1 %v10292_v20  ;;  %v10372_v20 = vld [vmem:[%s11571_s17 + $0x190] ss:$28 sps:$4 sm:$0xff]  }
  0xa5   : > { %2637 = vmatpush1.bf16.msra.mxu0 %v10286_v21  ;;  %3089 = vmatpush1.bf16.msra.mxu1 %v10289_v22  ;;  %v10369_v21 = vld [vmem:[%s14719_s3 + $0x5c0] ss:$16 sps:$4 sm:$0xff]   ;;  %v10373_v22 = vld [vmem:[%s14719_s3 + $0x5c8] ss:$16 sps:$4 sm:$0xff]  }
  0xa6   : > { %2638 = vmatprep.subr.bf16.mxu0 %v10296_v24  ;;  %3090 = vmatprep.subr.bf16.mxu1 %v10300_v25  ;;  %v10378_v24 = vld [vmem:[%s14719_s3 + $0x5e4] ss:$16 sps:$4 sm:$0xff]   ;;  %v10381_v25 = vld [vmem:[%s14719_s3 + $0x5ec] ss:$16 sps:$4 sm:$0xff]  }
  0xa8   : > { %2570 = vmatmul.mubr.bf16.gmra.mrb[8].mxu0 %v10297_v27  ;;  %3022 = vmatmul.mubr.bf16.gmra.mrb[8].mxu1 %v10297_v27  ;;  %v10376_v27 = vld [vmem:[%s14719_s3 + $0x5e0] ss:$16 sps:$4 sm:$0xff]  }
  0xa9   : > { %2639 = vmatpush1.bf16.msra.mxu0 %v10294_v26  ;;  %3091 = vmatpush1.bf16.msra.mxu1 %v10298_v29  ;;  %v10384_v26 = vld [vmem:[%s11571_s17 + $0x14] ss:$28 sps:$4 sm:$0xff]   ;;  %v10379_v29 = vld [vmem:[%s14719_s3 + $0x5e8] ss:$16 sps:$4 sm:$0xff]  }
  0xaa   : > { %2640 = vmatprep.subr.bf16.mxu0 %v10303_v30  ;;  %3092 = vmatprep.subr.bf16.mxu1 %v10306_v31  ;;  %v10387_v30 = vld [vmem:[%s14719_s3 + $0x604] ss:$16 sps:$4 sm:$0xff]   ;;  %v10390_v31 = vld [vmem:[%s14719_s3 + $0x60c] ss:$16 sps:$4 sm:$0xff]  }
  0xab   : > { %2579 = vmatprep.mubr.bf16.mxu0 %v10307_v32  ;;  %3031 = vmatprep.mubr.bf16.mxu1 %v10307_v32  ;;  %v10382_v32 = vld [vmem:[%s11571_s17 + $0x10] ss:$28 sps:$4 sm:$0xff]  }
  0xad   : > { %2641 = vmatpush1.bf16.msra.mxu0 %v10301_v33  ;;  %3093 = vmatpush1.bf16.msra.mxu1 %v10304_v35  ;;  %v10385_v33 = vld [vmem:[%s14719_s3 + $0x600] ss:$16 sps:$4 sm:$0xff]   ;;  %v10388_v35 = vld [vmem:[%s14719_s3 + $0x608] ss:$16 sps:$4 sm:$0xff]  }
  0xae   : > { %2642 = vmatprep.subr.bf16.mxu0 %v10311_v36  ;;  %3094 = vmatprep.subr.bf16.mxu1 %v10315_v37  ;;  %v10391_v36 = vld [vmem:[%s11571_s17 + $0x4c] ss:$28 sps:$4 sm:$0xff]   ;;  %v10420_v37 = vld [vmem:[%s14722_s6 + $0x40] sm:$0xff]  }
  0xb0   : > { %2580 = vmatmul.mubr.bf16.gmra.mrb[12].mxu0 %v10312_v39  ;;  %3032 = vmatmul.mubr.bf16.gmra.mrb[12].mxu1 %v10312_v39  ;;  %v10393_v39 = vld [vmem:[%s11571_s17 + $0x48] ss:$28 sps:$4 sm:$0xff]  }
  0xb1   : > { %2643 = vmatpush1.bf16.msra.mxu0 %v10309_v38  ;;  %3095 = vmatpush1.bf16.msra.mxu1 %v10313_v40  ;;  %v10422_v38 = vld [vmem:[%s14722_s6 + $0xc0] sm:$0xff]  }
  0xb2   : > { %2644 = vmatprep.subr.bf16.mxu0 %v10318_v41  ;;  %3096 = vmatprep.subr.bf16.mxu1 %v10321_v42  ;;  %v10394_v40 = vld [vmem:[%s11571_s17 + $0x84] ss:$28 sps:$4 sm:$0xff]   ;;  %v10397_v42 = vld [vmem:[%s11571_s17 + $0xbc] ss:$28 sps:$4 sm:$0xff]  }
  0xb3   : > { %2589 = vmatprep.mubr.bf16.mxu0 %v10322_v43  ;;  %3041 = vmatprep.mubr.bf16.mxu1 %v10322_v43  ;;  %v10396_v41 = vld [vmem:[%s11571_s17 + $0x80] ss:$28 sps:$4 sm:$0xff]   ;;  %v10399_v43 = vld [vmem:[%s11571_s17 + $0xb8] ss:$28 sps:$4 sm:$0xff]  }
  0xb5   : > { %2645 = vmatpush1.bf16.msra.mxu0 %v10316_v45  ;;  %3097 = vmatpush1.bf16.msra.mxu1 %v10319_v46  ;;  %v10400_v45 = vld [vmem:[%s11571_s17 + $0xf4] ss:$28 sps:$4 sm:$0xff]  }
  0xb6   : > { %2646 = vmatprep.subr.bf16.mxu0 %v10326_v47  ;;  %3098 = vmatprep.subr.bf16.mxu1 %v10330_v48  ;;  %v10402_v46 = vld [vmem:[%s11571_s17 + $0xf0] ss:$28 sps:$4 sm:$0xff]   ;;  %v10405_v48 = vld [vmem:[%s11571_s17 + $0x128] ss:$28 sps:$4 sm:$0xff]  }
  0xb7   : > { %v10403_v47 = vld [vmem:[%s11571_s17 + $0x12c] ss:$28 sps:$4 sm:$0xff]  }
  0xb8   : > { %2590 = vmatmul.mubr.bf16.gmra.mrb[16].mxu0 %v10327_v50  ;;  %3042 = vmatmul.mubr.bf16.gmra.mrb[16].mxu1 %v10327_v50  ;;  %v10408_v50 = vld [vmem:[%s11571_s17 + $0x160] ss:$28 sps:$4 sm:$0xff]  }
  0xb9   : > { %2647 = vmatpush1.bf16.msra.mxu0 %v10324_v49  ;;  %3099 = vmatpush1.bf16.msra.mxu1 %v10328_v51  ;;  %v10406_v49 = vld [vmem:[%s11571_s17 + $0x164] ss:$28 sps:$4 sm:$0xff]   ;;  %v10409_v51 = vld [vmem:[%s11571_s17 + $0x19c] ss:$28 sps:$4 sm:$0xff]  }
  0xba   : > { %2648 = vmatprep.subr.bf16.mxu0 %v10333_v52  ;;  %3100 = vmatprep.subr.bf16.mxu1 %v10336_v53  ;;  %v10411_v52 = vld [vmem:[%s11571_s17 + $0x198] ss:$28 sps:$4 sm:$0xff]  }
  0xbb   : > { %2599 = vmatprep.mubr.bf16.mxu0 %v10337_v55  ;;  %3051 = vmatprep.mubr.bf16.mxu1 %v10337_v55  ;;  %v10412_v53 = vld [vmem:[%s11571_s17 + $0x18] ss:$28 sps:$4 sm:$0xff]   ;;  %v10423_v55 = vld [vmem:[%s14722_s6 + $0x80] sm:$0xff]  }
  0xbd   : > { %2649 = vmatpush1.bf16.msra.mxu0 %v10331_v54  ;;  %3101 = vmatpush1.bf16.msra.mxu1 %v10334_v57  ;;  %v10421_v54 = vld [vmem:[%s14722_s6] sm:$0xff]   ;;  %v10424_v57 = vld [vmem:[%s14722_s6 + $0x48] sm:$0xff]  }
  0xbe   : > { %2650 = vmatprep.subr.bf16.mxu0 %v10341_v58  ;;  %3102 = vmatprep.subr.bf16.mxu1 %v10345_v60  ;;  %v10426_v58 = vld [vmem:[%s14722_s6 + $0xc8] sm:$0xff]  }
  0xbf   : > { %v10427_v60 = vld [vmem:[%s14722_s6 + $0x88] sm:$0xff]  }
  0xc0   : > { %2600 = vmatmul.mubr.bf16.gmra.mrb[20].mxu0 %v10342_v59  ;;  %3052 = vmatmul.mubr.bf16.gmra.mrb[20].mxu1 %v10342_v59  ;;  %v10425_v59 = vld [vmem:[%s14722_s6 + $0x8] sm:$0xff]  }
  0xc1   : > { %2651 = vmatpush1.bf16.msra.mxu0 %v10339_v61  ;;  %3103 = vmatpush1.bf16.msra.mxu1 %v10343_v62  ;;  %v10428_v61 = vld [vmem:[%s14722_s6 + $0x50] sm:$0xff]  }
  0xc2   : > { %2652 = vmatprep.subr.bf16.mxu0 %v10348_v63  ;;  %3104 = vmatprep.subr.bf16.mxu1 %v10351_v0  ;;  %v10430_v62 = vld [vmem:[%s14722_s6 + $0xd0] sm:$0xff]  }
  0xc3   : > { %2609 = vmatprep.mubr.bf16.mxu0 %v10352_v1  ;;  %3061 = vmatprep.mubr.bf16.mxu1 %v10352_v1  ;;  %v10413_v63 = vld [vmem:[%s11571_s17 + $0x50] ss:$28 sps:$4 sm:$0xff]  }
  0xc4   : > { %v10429_v0 = vld [vmem:[%s14722_s6 + $0x10] sm:$0xff]  }
  0xc5   : > { %2653 = vmatpush1.bf16.msra.mxu0 %v10346_v2  ;;  %3105 = vmatpush1.bf16.msra.mxu1 %v10349_v5  ;;  %v10431_v1 = vld [vmem:[%s14722_s6 + $0x90] sm:$0xff]   ;;  %v10432_v2 = vld [vmem:[%s14722_s6 + $0x58] sm:$0xff]  }
  0xc6   : > { %2654 = vmatprep.subr.bf16.mxu0 %v10356_v6  ;;  %3106 = vmatprep.subr.bf16.mxu1 %v10360_v7  ;;  %v10434_v5 = vld [vmem:[%s14722_s6 + $0xd8] sm:$0xff]  }
  0xc7   : > { %v10433_v6 = vld [vmem:[%s14722_s6 + $0x18] sm:$0xff]  }
  0xc8   : > { %2610 = vmatmul.mubr.bf16.gmra.mrb[24].mxu0 %v10357_v8  ;;  %3062 = vmatmul.mubr.bf16.gmra.mrb[24].mxu1 %v10357_v8  ;;  %v10435_v7 = vld [vmem:[%s14722_s6 + $0x98] sm:$0xff]   ;;  %v10436_v8 = vld [vmem:[%s14722_s6 + $0x60] sm:$0xff]  }
  0xc9   : > { %2655 = vmatpush1.bf16.msra.mxu0 %v10354_v9  ;;  %3107 = vmatpush1.bf16.msra.mxu1 %v10358_v10  ;;  %v10438_v9 = vld [vmem:[%s14722_s6 + $0xe0] sm:$0xff]  }
  0xca   : > { %2656 = vmatprep.subr.bf16.mxu0 %v10363_v11  ;;  %3108 = vmatprep.subr.bf16.mxu1 %v10366_v12  ;;  %v10414_v10 = vld [vmem:[%s11571_s17 + $0x88] ss:$28 sps:$4 sm:$0xff]  }
  0xcb   : > { %2619 = vmatprep.mubr.bf16.mxu0 %v10367_v14  ;;  %3071 = vmatprep.mubr.bf16.mxu1 %v10367_v14  ;;  %v10437_v11 = vld [vmem:[%s14722_s6 + $0x20] sm:$0xff]   ;;  %v10440_v14 = vld [vmem:[%s14722_s6 + $0x68] sm:$0xff]  }
  0xcc   : > { %v10439_v12 = vld [vmem:[%s14722_s6 + $0xa0] sm:$0xff]  }
  0xcd   : > { %2657 = vmatpush1.bf16.msra.mxu0 %v10361_v15  ;;  %3109 = vmatpush1.bf16.msra.mxu1 %v10364_v17  ;;  %v10442_v15 = vld [vmem:[%s14722_s6 + $0xe8] sm:$0xff]  }
  0xce   : > { %2658 = vmatprep.subr.bf16.mxu0 %v10371_v18  ;;  %3110 = vmatprep.subr.bf16.mxu1 %v10375_v19  ;;  %v10441_v17 = vld [vmem:[%s14722_s6 + $0x28] sm:$0xff]   ;;  %v10444_v19 = vld [vmem:[%s14722_s6 + $0x70] sm:$0xff]  }
  0xcf   : > { %v10443_v18 = vld [vmem:[%s14722_s6 + $0xa8] sm:$0xff]  }
  0xd0   : > { %2620 = vmatmul.mubr.bf16.gmra.mrb[28].mxu0 %v10372_v20  ;;  %3072 = vmatmul.mubr.bf16.gmra.mrb[28].mxu1 %v10372_v20  ;;  %v10446_v20 = vld [vmem:[%s14722_s6 + $0xf0] sm:$0xff]  }
  0xd1   : > { %2659 = vmatpush1.bf16.msra.mxu0 %v10369_v21  ;;  %3111 = vmatpush1.bf16.msra.mxu1 %v10373_v22  ;;  %v10415_v21 = vld [vmem:[%s11571_s17 + $0xc0] ss:$28 sps:$4 sm:$0xff]   ;;  %v10445_v22 = vld [vmem:[%s14722_s6 + $0x30] sm:$0xff]  }
  0xd2   : > { %2660 = vmatprep.subr.bf16.mxu0 %v10378_v24  ;;  %3112 = vmatprep.subr.bf16.mxu1 %v10381_v25  ;;  %v10447_v24 = vld [vmem:[%s14722_s6 + $0xb0] sm:$0xff]  }
  0xd3   : > { %2662 = vmatprep.mubr.bf16.mxu0 %v10384_v26  ;;  %3114 = vmatprep.mubr.bf16.mxu1 %v10384_v26  ;;  %v10416_v25 = vld [vmem:[%s11571_s17 + $0xf8] ss:$28 sps:$4 sm:$0xff]   ;;  %v10417_v26 = vld [vmem:[%s11571_s17 + $0x130] ss:$28 sps:$4 sm:$0xff]  }
  0xd5   : > { %2661 = vmatpush1.bf16.msra.mxu0 %v10376_v27  ;;  %3113 = vmatpush1.bf16.msra.mxu1 %v10379_v29  ;;  %v10418_v27 = vld [vmem:[%s11571_s17 + $0x168] ss:$28 sps:$4 sm:$0xff]   ;;  %v10419_v29 = vld [vmem:[%s11571_s17 + $0x1a0] ss:$28 sps:$4 sm:$0xff]  }
  0xd6   : > { %2743 = vmatprep.subr.bf16.mxu0 %v10387_v30  ;;  %3195 = vmatprep.subr.bf16.mxu1 %v10390_v31  ;;  %v10448_v30 = vld [vmem:[%s14722_s6 + $0x78] sm:$0xff]  }
  0xd7   : > { %v10450_v31 = vld [vmem:[%s14722_s6 + $0xf8] sm:$0xff]  }
  0xd8   : > { %2663 = vmatmul.mubr.bf16.vlgmr.msra.gmra.mrb[0].mxu0 %v10382_v32  ;;  %3115 = vmatmul.mubr.bf16.vlgmr.msra.gmra.mrb[0].mxu1 %v10382_v32  ;;  %v10449_v32 = vld [vmem:[%s14722_s6 + $0x38] sm:$0xff]  }
  0xd9   : > { %2744 = vmatpush1.bf16.msra.mxu0 %v10385_v33  ;;  %3196 = vmatpush1.bf16.msra.mxu1 %v10388_v35  ;;  %v10451_v33 = vld [vmem:[%s14722_s6 + $0xb8] sm:$0xff]   ;;  %v3310_v35 = vlaneseq }
  0xda   : > { %2672 = vmatprep.mubr.bf16.mxu0 %v10391_v36  ;;  %3124 = vmatprep.mubr.bf16.mxu1 %v10391_v36 }
  0xdb   : > { %9307 = vmatprep.subr.bf16.mxu0 %v10420_v37  ;;  %9371 = vmatprep.subr.bf16.mxu1 %v10422_v38  ;;  %v12240_v36 = vshrl.u32 %v3310_v35, 7 }
  0xdd   : > { %14762 = vst [vmem:[#allocation2_spill] sm:$0xff] %v12240_v36  ;;  %v12243_v37 = vsub.s32 0, %v12240_v36  ;;  %v12246_v38 = vsub.s32 2, %v12240_v36 }
  0xdf   : > { %14763 = vst [vmem:[#allocation3_spill] sm:$0xff] %v12243_v37  ;;  %14764 = vst [vmem:[#allocation4_spill] sm:$0xff] %v12246_v38 }
  0xe0   : > { %2673 = vmatmul.mubr.bf16.gmra.mrb[4].mxu0 %v10393_v39  ;;  %3125 = vmatmul.mubr.bf16.gmra.mrb[4].mxu1 %v10393_v39  ;;  %v3308_v39 = vld [vmem:[%s14721_s5] sm:$0xf] }
  0xe1   : > { %2682 = vmatprep.mubr.bf16.mxu0 %v10394_v40  ;;  %3134 = vmatprep.mubr.bf16.mxu1 %v10394_v40  ;;  %v12252_v40 = vsub.s32 1, %v12240_v36 }
  0xe3   : > { %14765 = vst [vmem:[#allocation5_spill] sm:$0xff] %v12252_v40 }
  0xe8   : > { %2683 = vmatmul.mubr.bf16.gmra.mrb[8].mxu0 %v10396_v41  ;;  %3135 = vmatmul.mubr.bf16.gmra.mrb[8].mxu1 %v10396_v41  ;;  %v12255_v41 = vsub.s32 3, %v12240_v36 }
  0xe9   : > { %2692 = vmatprep.mubr.bf16.mxu0 %v10397_v42  ;;  %3144 = vmatprep.mubr.bf16.mxu1 %v10397_v42  ;;  %v12258_v42 = vrot.slane %v3308_v39, %v12243_v37 }
  0xea   : > { %14766 = vst [vmem:[#allocation6_spill] sm:$0xff] %v12255_v41 }
  0xf0   : > { %2693 = vmatmul.mubr.bf16.gmra.mrb[12].mxu0 %v10399_v43  ;;  %3145 = vmatmul.mubr.bf16.gmra.mrb[12].mxu1 %v10399_v43  ;;  %v12261_v43 = vrot.slane %v3308_v39, %v12246_v38 }
  0xf1   : > { %2702 = vmatprep.mubr.bf16.mxu0 %v10400_v45  ;;  %3154 = vmatprep.mubr.bf16.mxu1 %v10400_v45  ;;  %v12264_v45 = vrot.slane %v3308_v39, %v12252_v40 }
  0xf8   : > { %2703 = vmatmul.mubr.bf16.gmra.mrb[16].mxu0 %v10402_v46  ;;  %3155 = vmatmul.mubr.bf16.gmra.mrb[16].mxu1 %v10402_v46  ;;  %v12267_v46 = vrot.slane %v3308_v39, %v12255_v41 }
  0xf9   : > { %2712 = vmatprep.mubr.bf16.mxu0 %v10403_v47  ;;  %3164 = vmatprep.mubr.bf16.mxu1 %v10403_v47 }
 0x100   : > { %2713 = vmatmul.mubr.bf16.gmra.mrb[20].mxu0 %v10405_v48  ;;  %3165 = vmatmul.mubr.bf16.gmra.mrb[20].mxu1 %v10405_v48 }
 0x101   : > { %2722 = vmatprep.mubr.bf16.mxu0 %v10406_v49  ;;  %3174 = vmatprep.mubr.bf16.mxu1 %v10406_v49 }
 0x108   : > { %2723 = vmatmul.mubr.bf16.gmra.mrb[24].mxu0 %v10408_v50  ;;  %3175 = vmatmul.mubr.bf16.gmra.mrb[24].mxu1 %v10408_v50 }
 0x109   : > { %2732 = vmatprep.mubr.bf16.mxu0 %v10409_v51  ;;  %3184 = vmatprep.mubr.bf16.mxu1 %v10409_v51 }
 0x110   : > { %2733 = vmatmul.mubr.bf16.gmra.mrb[28].mxu0 %v10411_v52  ;;  %3185 = vmatmul.mubr.bf16.gmra.mrb[28].mxu1 %v10411_v52 }
 0x111   : > { %2775 = vmatprep.mubr.bf16.mxu0 %v14733_v3  ;;  %3227 = vmatprep.mubr.bf16.mxu1 %v14733_v3 }
 0x118   : > { %8770 = vmatmul.mubr.msk.bf16.vlgmr.msra.gmra.mrb[0].mxu0 %vm2379_vm2, %v10412_v53  ;;  %8778 = vmatmul.mubr.msk.bf16.vlgmr.msra.gmra.mrb[0].mxu1 %vm2379_vm2, %v10412_v53 }
 0x119   : > { %2785 = vmatprep.mubr.bf16.mxu0 %v14733_v3  ;;  %3237 = vmatprep.mubr.bf16.mxu1 %v14733_v3 }
 0x11a   : > { %9308 = vmatpush3.bf16.msra.mxu0 %v10421_v54  ;;  %9372 = vmatpush3.bf16.msra.mxu1 %v10423_v55 }
 0x11b   : > { %9309 = vmatprep.subr.bf16.mxu0 %v10424_v57  ;;  %9373 = vmatprep.subr.bf16.mxu1 %v10426_v58 }
 0x11e   : > { %9310 = vmatpush3.bf16.msra.mxu0 %v10425_v59  ;;  %9374 = vmatpush3.bf16.msra.mxu1 %v10427_v60 }
 0x11f   : > { %9311 = vmatprep.subr.bf16.mxu0 %v10428_v61  ;;  %9375 = vmatprep.subr.bf16.mxu1 %v10430_v62 }
 0x120   : > { %8771 = vmatmul.mubr.msk.bf16.gmra.mrb[4].mxu0 %vm2379_vm2, %v10413_v63  ;;  %8779 = vmatmul.mubr.msk.bf16.gmra.mrb[4].mxu1 %vm2379_vm2, %v10413_v63 }
 0x121   : > { %2795 = vmatprep.mubr.bf16.mxu0 %v14733_v3  ;;  %3247 = vmatprep.mubr.bf16.mxu1 %v14733_v3 }
 0x122   : > { %9312 = vmatpush3.bf16.msra.mxu0 %v10429_v0  ;;  %9376 = vmatpush3.bf16.msra.mxu1 %v10431_v1 }
 0x123   : > { %9313 = vmatprep.subr.bf16.mxu0 %v10432_v2  ;;  %9377 = vmatprep.subr.bf16.mxu1 %v10434_v5 }
 0x126   : > { %9314 = vmatpush3.bf16.msra.mxu0 %v10433_v6  ;;  %9378 = vmatpush3.bf16.msra.mxu1 %v10435_v7 }
 0x127   : > { %9315 = vmatprep.subr.bf16.mxu0 %v10436_v8  ;;  %9379 = vmatprep.subr.bf16.mxu1 %v10438_v9 }
 0x128   : > { %8772 = vmatmul.mubr.msk.bf16.gmra.mrb[8].mxu0 %vm2379_vm2, %v10414_v10  ;;  %8780 = vmatmul.mubr.msk.bf16.gmra.mrb[8].mxu1 %vm2379_vm2, %v10414_v10 }
 0x129   : > { %2805 = vmatprep.mubr.bf16.mxu0 %v14733_v3  ;;  %3257 = vmatprep.mubr.bf16.mxu1 %v14733_v3 }
 0x12a   : > { %9316 = vmatpush3.bf16.msra.mxu0 %v10437_v11  ;;  %9380 = vmatpush3.bf16.msra.mxu1 %v10439_v12 }
 0x12b   : > { %9317 = vmatprep.subr.bf16.mxu0 %v10440_v14  ;;  %9381 = vmatprep.subr.bf16.mxu1 %v10442_v15 }
 0x12e   : > { %9318 = vmatpush3.bf16.msra.mxu0 %v10441_v17  ;;  %9382 = vmatpush3.bf16.msra.mxu1 %v10443_v18 }
 0x12f   : > { %9319 = vmatprep.subr.bf16.mxu0 %v10444_v19  ;;  %9383 = vmatprep.subr.bf16.mxu1 %v10446_v20 }
 0x130   : > { %8773 = vmatmul.mubr.msk.bf16.gmra.mrb[12].mxu0 %vm2379_vm2, %v10415_v21  ;;  %8781 = vmatmul.mubr.msk.bf16.gmra.mrb[12].mxu1 %vm2379_vm2, %v10415_v21 }
 0x131   : > { %2815 = vmatprep.mubr.bf16.mxu0 %v14733_v3  ;;  %3267 = vmatprep.mubr.bf16.mxu1 %v14733_v3 }
 0x132   : > { %9320 = vmatpush3.bf16.msra.mxu0 %v10445_v22  ;;  %9384 = vmatpush3.bf16.msra.mxu1 %v10447_v24 }
 0x133   : > { %9321 = vmatprep.subr.bf16.mxu0 %v10448_v30  ;;  %9385 = vmatprep.subr.bf16.mxu1 %v10450_v31 }
 0x136   : > { %9322 = vmatpush3.bf16.msra.mxu0 %v10449_v32  ;;  %9386 = vmatpush3.bf16.msra.mxu1 %v10451_v33 }
 0x138   : > { %8774 = vmatmul.mubr.msk.bf16.gmra.mrb[16].mxu0 %vm2379_vm2, %v10416_v25  ;;  %8782 = vmatmul.mubr.msk.bf16.gmra.mrb[16].mxu1 %vm2379_vm2, %v10416_v25 }
 0x139   : > { %2825 = vmatprep.mubr.bf16.mxu0 %v14733_v3  ;;  %3277 = vmatprep.mubr.bf16.mxu1 %v14733_v3 }
 0x140   : > { %8775 = vmatmul.mubr.msk.bf16.gmra.mrb[20].mxu0 %vm2379_vm2, %v10417_v26  ;;  %8783 = vmatmul.mubr.msk.bf16.gmra.mrb[20].mxu1 %vm2379_vm2, %v10417_v26 }
 0x141   : > { %2835 = vmatprep.mubr.bf16.mxu0 %v14733_v3  ;;  %3287 = vmatprep.mubr.bf16.mxu1 %v14733_v3 }
 0x148   : > { %8776 = vmatmul.mubr.msk.bf16.gmra.mrb[24].mxu0 %vm2379_vm2, %v10418_v27  ;;  %8784 = vmatmul.mubr.msk.bf16.gmra.mrb[24].mxu1 %vm2379_vm2, %v10418_v27 }
 0x149   : > { %2845 = vmatprep.mubr.bf16.mxu0 %v14733_v3  ;;  %3297 = vmatprep.mubr.bf16.mxu1 %v14733_v3 }
 0x150   : > { %8777 = vmatmul.mubr.msk.bf16.gmra.mrb[28].mxu0 %vm2379_vm2, %v10419_v29  ;;  %8785 = vmatmul.mubr.msk.bf16.gmra.mrb[28].mxu1 %vm2379_vm2, %v10419_v29 }
 0x1eb   : > { %v2777_v47 = vpop.f32.mrb[0].mxu0  ;;  %v3229_v48 = vpop.f32.mrb[0].mxu1 }
 0x1ec   : > { %v3330_v49 = vadd.f32 %v12258_v42, %v2777_v47  ;;  %v3332_v50 = vadd.f32 %v12261_v43, %v3229_v48  ;;  %v2779_v51 = vpop.f32.mrb[1].mxu0  ;;  %v3231_v52 = vpop.f32.mrb[1].mxu1 }
 0x1ed   : > { %v3331_v53 = vadd.f32 %v12264_v45, %v2779_v51  ;;  %v3333_v54 = vadd.f32 %v12267_v46, %v3231_v52  ;;  %v2781_v55 = vpop.f32.mrb[2].mxu0  ;;  %v3233_v57 = vpop.f32.mrb[2].mxu1 }
 0x1ee   : > { %v3334_v58 = vadd.f32 %v12258_v42, %v2781_v55  ;;  %v3336_v59 = vadd.f32 %v12261_v43, %v3233_v57  ;;  %v2783_v60 = vpop.f32.mrb[3].mxu0  ;;  %v3235_v61 = vpop.f32.mrb[3].mxu1  ;;  %v3394_v0 = vmax.f32 %v3330_v49, 0.0  ;;  %v3396_v1 = vmax.f32 %v3332_v50, 0.0 }
 0x1ef   : > { %v3335_v62 = vadd.f32 %v12264_v45, %v2783_v60  ;;  %v3337_v63 = vadd.f32 %v12267_v46, %v3235_v61  ;;  %v3395_v6 = vmax.f32 %v3331_v53, 0.0  ;;  %v3397_v7 = vmax.f32 %v3333_v54, 0.0 }
 0x1f0   : > { %v3398_v2 = vmax.f32 %v3334_v58, 0.0  ;;  %v3400_v5 = vmax.f32 %v3336_v59, 0.0 }
 0x1f1   : > { %v3399_v8 = vmax.f32 %v3335_v62, 0.0  ;;  %v3401_v9 = vmax.f32 %v3337_v63, 0.0 }
 0x1f2   : > { %v3458_v10 = vpack.c.bf16 %v3398_v2, %v3394_v0  ;;  %v3460_v11 = vpack.c.bf16 %v3400_v5, %v3396_v1 }
 0x1f3   : > { %v3459_v12 = vpack.c.bf16 %v3399_v8, %v3395_v6  ;;  %v3461_v14 = vpack.c.bf16 %v3401_v9, %v3397_v7  ;;  %v2787_v15 = vpop.f32.mrb[4].mxu0  ;;  %v3239_v17 = vpop.f32.mrb[4].mxu1 }
 0x1f4   : > { %v3338_v18 = vadd.f32 %v12258_v42, %v2787_v15  ;;  %v3340_v19 = vadd.f32 %v12261_v43, %v3239_v17  ;;  %v2789_v20 = vpop.f32.mrb[5].mxu0  ;;  %v3241_v21 = vpop.f32.mrb[5].mxu1 }
 0x1f5   : > { %v3339_v22 = vadd.f32 %v12264_v45, %v2789_v20  ;;  %v3341_v24 = vadd.f32 %v12267_v46, %v3241_v21  ;;  %v2791_v25 = vpop.f32.mrb[6].mxu0  ;;  %v3243_v26 = vpop.f32.mrb[6].mxu1  ;;  %3785 = vmatprep.mubr.bf16.mxu0 %v3459_v12  ;;  %3882 = vmatprep.mubr.bf16.mxu1 %v3461_v14 }
 0x1f6   : > { %v3342_v27 = vadd.f32 %v12258_v42, %v2791_v25  ;;  %v3344_v29 = vadd.f32 %v12261_v43, %v3243_v26  ;;  %v2793_v30 = vpop.f32.mrb[7].mxu0  ;;  %v3245_v31 = vpop.f32.mrb[7].mxu1  ;;  %3786 = vmatmul.mubr.bf16.vlgmr.msra.gmra.mrb[32].mxu0 %v3458_v10  ;;  %3883 = vmatmul.mubr.bf16.vlgmr.msra.gmra.mrb[32].mxu1 %v3460_v11  ;;  %v3402_v35 = vmax.f32 %v3338_v18, 0.0  ;;  %v3404_v39 = vmax.f32 %v3340_v19, 0.0 }
 0x1f7   : > { %v3343_v32 = vadd.f32 %v12264_v45, %v2793_v30  ;;  %v3345_v33 = vadd.f32 %v12267_v46, %v3245_v31  ;;  %v3403_v49 = vmax.f32 %v3339_v22, 0.0  ;;  %v3405_v50 = vmax.f32 %v3341_v24, 0.0 }
 0x1f8   : > { %v3406_v47 = vmax.f32 %v3342_v27, 0.0  ;;  %v3408_v48 = vmax.f32 %v3344_v29, 0.0 }
 0x1f9   : > { %v3407_v51 = vmax.f32 %v3343_v32, 0.0  ;;  %v3409_v52 = vmax.f32 %v3345_v33, 0.0 }
 0x1fa   : > { %v3462_v53 = vpack.c.bf16 %v3406_v47, %v3402_v35  ;;  %v3464_v54 = vpack.c.bf16 %v3408_v48, %v3404_v39 }
 0x1fb   : > { %v3463_v55 = vpack.c.bf16 %v3407_v51, %v3403_v49  ;;  %v3465_v57 = vpack.c.bf16 %v3409_v52, %v3405_v50  ;;  %v2797_v58 = vpop.f32.mrb[8].mxu0  ;;  %v3249_v59 = vpop.f32.mrb[8].mxu1 }
 0x1fc   : > { %v3346_v60 = vadd.f32 %v12258_v42, %v2797_v58  ;;  %v3348_v61 = vadd.f32 %v12261_v43, %v3249_v59  ;;  %v2799_v62 = vpop.f32.mrb[9].mxu0  ;;  %v3251_v63 = vpop.f32.mrb[9].mxu1 }
 0x1fd   : > { %v3347_v0 = vadd.f32 %v12264_v45, %v2799_v62  ;;  %v3349_v1 = vadd.f32 %v12267_v46, %v3251_v63  ;;  %v2801_v2 = vpop.f32.mrb[10].mxu0  ;;  %v3253_v5 = vpop.f32.mrb[10].mxu1  ;;  %3793 = vmatprep.mubr.bf16.mxu0 %v3463_v55  ;;  %3890 = vmatprep.mubr.bf16.mxu1 %v3465_v57 }
 0x1fe   : > { %v3350_v6 = vadd.f32 %v12258_v42, %v2801_v2  ;;  %v3352_v7 = vadd.f32 %v12261_v43, %v3253_v5  ;;  %v2803_v8 = vpop.f32.mrb[11].mxu0  ;;  %v3255_v9 = vpop.f32.mrb[11].mxu1  ;;  %3794 = vmatmul.mubr.bf16.gmra.mrb[36].mxu0 %v3462_v53  ;;  %3891 = vmatmul.mubr.bf16.gmra.mrb[36].mxu1 %v3464_v54  ;;  %v3410_v12 = vmax.f32 %v3346_v60, 0.0  ;;  %v3412_v14 = vmax.f32 %v3348_v61, 0.0 }
 0x1ff   : > { %v3351_v10 = vadd.f32 %v12264_v45, %v2803_v8  ;;  %v3353_v11 = vadd.f32 %v12267_v46, %v3255_v9  ;;  %v3411_v18 = vmax.f32 %v3347_v0, 0.0  ;;  %v3413_v19 = vmax.f32 %v3349_v1, 0.0 }
 0x200   : > { %v3414_v15 = vmax.f32 %v3350_v6, 0.0  ;;  %v3416_v17 = vmax.f32 %v3352_v7, 0.0 }
 0x201   : > { %v3415_v20 = vmax.f32 %v3351_v10, 0.0  ;;  %v3417_v21 = vmax.f32 %v3353_v11, 0.0 }
 0x202   : > { %v3466_v22 = vpack.c.bf16 %v3414_v15, %v3410_v12  ;;  %v3468_v24 = vpack.c.bf16 %v3416_v17, %v3412_v14 }
 0x203   : > { %v3467_v25 = vpack.c.bf16 %v3415_v20, %v3411_v18  ;;  %v3469_v26 = vpack.c.bf16 %v3417_v21, %v3413_v19  ;;  %v2807_v27 = vpop.f32.mrb[12].mxu0  ;;  %v3259_v29 = vpop.f32.mrb[12].mxu1 }
 0x204   : > { %v3354_v30 = vadd.f32 %v12258_v42, %v2807_v27  ;;  %v3356_v31 = vadd.f32 %v12261_v43, %v3259_v29  ;;  %v2809_v32 = vpop.f32.mrb[13].mxu0  ;;  %v3261_v33 = vpop.f32.mrb[13].mxu1 }
 0x205   : > { %v3355_v35 = vadd.f32 %v12264_v45, %v2809_v32  ;;  %v3357_v39 = vadd.f32 %v12267_v46, %v3261_v33  ;;  %v2811_v47 = vpop.f32.mrb[14].mxu0  ;;  %v3263_v48 = vpop.f32.mrb[14].mxu1  ;;  %3801 = vmatprep.mubr.bf16.mxu0 %v3467_v25  ;;  %3898 = vmatprep.mubr.bf16.mxu1 %v3469_v26 }
 0x206   : > { %v3358_v49 = vadd.f32 %v12258_v42, %v2811_v47  ;;  %v3360_v50 = vadd.f32 %v12261_v43, %v3263_v48  ;;  %v2813_v51 = vpop.f32.mrb[15].mxu0  ;;  %v3265_v52 = vpop.f32.mrb[15].mxu1  ;;  %3802 = vmatmul.mubr.bf16.gmra.mrb[40].mxu0 %v3466_v22  ;;  %3899 = vmatmul.mubr.bf16.gmra.mrb[40].mxu1 %v3468_v24  ;;  %v3418_v55 = vmax.f32 %v3354_v30, 0.0  ;;  %v3420_v57 = vmax.f32 %v3356_v31, 0.0 }
 0x207   : > { %v3359_v53 = vadd.f32 %v12264_v45, %v2813_v51  ;;  %v3361_v54 = vadd.f32 %v12267_v46, %v3265_v52  ;;  %v3419_v60 = vmax.f32 %v3355_v35, 0.0  ;;  %v3421_v61 = vmax.f32 %v3357_v39, 0.0 }
 0x208   : > { %v3422_v58 = vmax.f32 %v3358_v49, 0.0  ;;  %v3424_v59 = vmax.f32 %v3360_v50, 0.0 }
 0x209   : > { %v3423_v62 = vmax.f32 %v3359_v53, 0.0  ;;  %v3425_v63 = vmax.f32 %v3361_v54, 0.0 }
 0x20a   : > { %v3470_v0 = vpack.c.bf16 %v3422_v58, %v3418_v55  ;;  %v3472_v1 = vpack.c.bf16 %v3424_v59, %v3420_v57 }
 0x20b   : > { %v3471_v2 = vpack.c.bf16 %v3423_v62, %v3419_v60  ;;  %v3473_v5 = vpack.c.bf16 %v3425_v63, %v3421_v61  ;;  %v2817_v6 = vpop.f32.mrb[16].mxu0  ;;  %v3269_v7 = vpop.f32.mrb[16].mxu1 }
 0x20c   : > { %v3362_v8 = vadd.f32 %v12258_v42, %v2817_v6  ;;  %v3364_v9 = vadd.f32 %v12261_v43, %v3269_v7  ;;  %v2819_v10 = vpop.f32.mrb[17].mxu0  ;;  %v3271_v11 = vpop.f32.mrb[17].mxu1 }
 0x20d   : > { %v3363_v12 = vadd.f32 %v12264_v45, %v2819_v10  ;;  %v3365_v14 = vadd.f32 %v12267_v46, %v3271_v11  ;;  %v2821_v15 = vpop.f32.mrb[18].mxu0  ;;  %v3273_v17 = vpop.f32.mrb[18].mxu1  ;;  %3809 = vmatprep.mubr.bf16.mxu0 %v3471_v2  ;;  %3906 = vmatprep.mubr.bf16.mxu1 %v3473_v5 }
 0x20e   : > { %v3366_v18 = vadd.f32 %v12258_v42, %v2821_v15  ;;  %v3368_v19 = vadd.f32 %v12261_v43, %v3273_v17  ;;  %v2823_v20 = vpop.f32.mrb[19].mxu0  ;;  %v3275_v21 = vpop.f32.mrb[19].mxu1  ;;  %3810 = vmatmul.mubr.bf16.gmra.mrb[44].mxu0 %v3470_v0  ;;  %3907 = vmatmul.mubr.bf16.gmra.mrb[44].mxu1 %v3472_v1  ;;  %v3426_v25 = vmax.f32 %v3362_v8, 0.0  ;;  %v3428_v26 = vmax.f32 %v3364_v9, 0.0 }
 0x20f   : > { %v3367_v22 = vadd.f32 %v12264_v45, %v2823_v20  ;;  %v3369_v24 = vadd.f32 %v12267_v46, %v3275_v21  ;;  %v3427_v30 = vmax.f32 %v3363_v12, 0.0  ;;  %v3429_v31 = vmax.f32 %v3365_v14, 0.0 }
 0x210   : > { %v3430_v27 = vmax.f32 %v3366_v18, 0.0  ;;  %v3432_v29 = vmax.f32 %v3368_v19, 0.0 }
 0x211   : > { %v3431_v32 = vmax.f32 %v3367_v22, 0.0  ;;  %v3433_v33 = vmax.f32 %v3369_v24, 0.0 }
 0x212   : > { %v3474_v35 = vpack.c.bf16 %v3430_v27, %v3426_v25  ;;  %v3476_v39 = vpack.c.bf16 %v3432_v29, %v3428_v26 }
 0x213   : > { %v3475_v47 = vpack.c.bf16 %v3431_v32, %v3427_v30  ;;  %v3477_v48 = vpack.c.bf16 %v3433_v33, %v3429_v31  ;;  %v2827_v49 = vpop.f32.mrb[20].mxu0  ;;  %v3279_v50 = vpop.f32.mrb[20].mxu1 }
 0x214   : > { %v3370_v51 = vadd.f32 %v12258_v42, %v2827_v49  ;;  %v3372_v52 = vadd.f32 %v12261_v43, %v3279_v50  ;;  %v2829_v53 = vpop.f32.mrb[21].mxu0  ;;  %v3281_v54 = vpop.f32.mrb[21].mxu1 }
 0x215   : > { %v3371_v55 = vadd.f32 %v12264_v45, %v2829_v53  ;;  %v3373_v57 = vadd.f32 %v12267_v46, %v3281_v54  ;;  %v2831_v58 = vpop.f32.mrb[22].mxu0  ;;  %v3283_v59 = vpop.f32.mrb[22].mxu1  ;;  %3817 = vmatprep.mubr.bf16.mxu0 %v3475_v47  ;;  %3914 = vmatprep.mubr.bf16.mxu1 %v3477_v48 }
 0x216   : > { %v3374_v60 = vadd.f32 %v12258_v42, %v2831_v58  ;;  %v3376_v61 = vadd.f32 %v12261_v43, %v3283_v59  ;;  %v2833_v62 = vpop.f32.mrb[23].mxu0  ;;  %v3285_v63 = vpop.f32.mrb[23].mxu1  ;;  %3818 = vmatmul.mubr.bf16.gmra.mrb[48].mxu0 %v3474_v35  ;;  %3915 = vmatmul.mubr.bf16.gmra.mrb[48].mxu1 %v3476_v39  ;;  %v3434_v2 = vmax.f32 %v3370_v51, 0.0  ;;  %v3436_v5 = vmax.f32 %v3372_v52, 0.0 }
 0x217   : > { %v3375_v0 = vadd.f32 %v12264_v45, %v2833_v62  ;;  %v3377_v1 = vadd.f32 %v12267_v46, %v3285_v63  ;;  %v3435_v8 = vmax.f32 %v3371_v55, 0.0  ;;  %v3437_v9 = vmax.f32 %v3373_v57, 0.0 }
 0x218   : > { %v3438_v6 = vmax.f32 %v3374_v60, 0.0  ;;  %v3440_v7 = vmax.f32 %v3376_v61, 0.0 }
 0x219   : > { %v3439_v10 = vmax.f32 %v3375_v0, 0.0  ;;  %v3441_v11 = vmax.f32 %v3377_v1, 0.0 }
 0x21a   : > { %v3478_v12 = vpack.c.bf16 %v3438_v6, %v3434_v2  ;;  %v3480_v14 = vpack.c.bf16 %v3440_v7, %v3436_v5 }
 0x21b   : > { %v3479_v15 = vpack.c.bf16 %v3439_v10, %v3435_v8  ;;  %v3481_v17 = vpack.c.bf16 %v3441_v11, %v3437_v9  ;;  %v2837_v18 = vpop.f32.mrb[24].mxu0  ;;  %v3289_v19 = vpop.f32.mrb[24].mxu1 }
 0x21c   : > { %v3378_v20 = vadd.f32 %v12258_v42, %v2837_v18  ;;  %v3380_v21 = vadd.f32 %v12261_v43, %v3289_v19  ;;  %v2839_v22 = vpop.f32.mrb[25].mxu0  ;;  %v3291_v24 = vpop.f32.mrb[25].mxu1 }
 0x21d   : > { %v3379_v25 = vadd.f32 %v12264_v45, %v2839_v22  ;;  %v3381_v26 = vadd.f32 %v12267_v46, %v3291_v24  ;;  %v2841_v27 = vpop.f32.mrb[26].mxu0  ;;  %v3293_v29 = vpop.f32.mrb[26].mxu1  ;;  %3825 = vmatprep.mubr.bf16.mxu0 %v3479_v15  ;;  %3922 = vmatprep.mubr.bf16.mxu1 %v3481_v17 }
 0x21e   : > { %v3382_v30 = vadd.f32 %v12258_v42, %v2841_v27  ;;  %v3384_v31 = vadd.f32 %v12261_v43, %v3293_v29  ;;  %v2843_v32 = vpop.f32.mrb[27].mxu0  ;;  %v3295_v33 = vpop.f32.mrb[27].mxu1  ;;  %3826 = vmatmul.mubr.bf16.gmra.mrb[52].mxu0 %v3478_v12  ;;  %3923 = vmatmul.mubr.bf16.gmra.mrb[52].mxu1 %v3480_v14  ;;  %v3442_v47 = vmax.f32 %v3378_v20, 0.0  ;;  %v3444_v48 = vmax.f32 %v3380_v21, 0.0  ;;  %v4093_v27 = vld [vmem:[%s14725_s9 + $0x10] sm:$0x11] }
 0x21f   : > { %v3383_v35 = vadd.f32 %v12264_v45, %v2843_v32  ;;  %v3385_v39 = vadd.f32 %v12267_v46, %v3295_v33  ;;  %v3443_v51 = vmax.f32 %v3379_v25, 0.0  ;;  %v3445_v52 = vmax.f32 %v3381_v26, 0.0  ;;  %v10456_v32 = vld [vmem:[%s14725_s9 + $0x8] ss:$16 sps:$4 sm:$0x1f]  }
 0x220   : > { %v3446_v49 = vmax.f32 %v3382_v30, 0.0  ;;  %v3448_v50 = vmax.f32 %v3384_v31, 0.0  ;;  %v10454_v31 = vld [vmem:[%s14725_s9 + $0xc] ss:$16 sps:$4 sm:$0x1f]   ;;  %v4140_v33 = vsel %vm880_vm0, %v10456_v32, 0 }
 0x221   : > { %v3447_v53 = vmax.f32 %v3383_v35, 0.0  ;;  %v3449_v54 = vmax.f32 %v3385_v39, 0.0  ;;  %8832 = vmatprep.subr.msk.bf16.mxu1 %vm880_vm0, %v10454_v31 }
 0x222   : > { %v3482_v55 = vpack.c.bf16 %v3446_v49, %v3442_v47  ;;  %v3484_v57 = vpack.c.bf16 %v3448_v50, %v3444_v48  ;;  %4259 = vmatpush1.bf16.msra.mxu1 %v4140_v33 }
 0x223   : > { %v3483_v58 = vpack.c.bf16 %v3447_v53, %v3443_v51  ;;  %v3485_v59 = vpack.c.bf16 %v3449_v54, %v3445_v52  ;;  %v2847_v60 = vpop.f32.mrb[28].mxu0  ;;  %v3299_v61 = vpop.f32.mrb[28].mxu1 }
 0x224   : > { %v3386_v62 = vadd.f32 %v12258_v42, %v2847_v60  ;;  %v3388_v63 = vadd.f32 %v12261_v43, %v3299_v61  ;;  %v2849_v0 = vpop.f32.mrb[29].mxu0  ;;  %v3301_v1 = vpop.f32.mrb[29].mxu1 }
 0x225   : > { %v3387_v2 = vadd.f32 %v12264_v45, %v2849_v0  ;;  %v3389_v5 = vadd.f32 %v12267_v46, %v3301_v1  ;;  %v2851_v6 = vpop.f32.mrb[30].mxu0  ;;  %v3303_v7 = vpop.f32.mrb[30].mxu1  ;;  %3833 = vmatprep.mubr.bf16.mxu0 %v3483_v58  ;;  %3930 = vmatprep.mubr.bf16.mxu1 %v3485_v59 }
 0x226   : > { %v3390_v8 = vadd.f32 %v12258_v42, %v2851_v6  ;;  %v3392_v9 = vadd.f32 %v12261_v43, %v3303_v7  ;;  %v2853_v10 = vpop.f32.mrb[31].mxu0  ;;  %v3305_v11 = vpop.f32.mrb[31].mxu1  ;;  %3834 = vmatmul.mubr.bf16.gmra.mrb[56].mxu0 %v3482_v55  ;;  %3931 = vmatmul.mubr.bf16.gmra.mrb[56].mxu1 %v3484_v57  ;;  %v3450_v15 = vmax.f32 %v3386_v62, 0.0  ;;  %v3452_v17 = vmax.f32 %v3388_v63, 0.0 }
 0x227   : > { %v3391_v12 = vadd.f32 %v12264_v45, %v2853_v10  ;;  %v3393_v14 = vadd.f32 %v12267_v46, %v3305_v11  ;;  %v3451_v20 = vmax.f32 %v3387_v2, 0.0  ;;  %v3453_v21 = vmax.f32 %v3389_v5, 0.0  ;;  %v10452_v45 = vld [vmem:[%s14725_s9 + $0x4] ss:$16 sps:$4 sm:$0x1f]  }
 0x228   : > { %v3454_v18 = vmax.f32 %v3390_v8, 0.0  ;;  %v3456_v19 = vmax.f32 %v3392_v9, 0.0  ;;  %8823 = vmatprep.subr.msk.bf16.mxu0 %vm880_vm0, %v10452_v45  ;;  %v4091_v46 = vld [vmem:[%s14725_s9] sm:$0xff] }
 0x229   : > { %v3455_v22 = vmax.f32 %v3391_v12, 0.0  ;;  %v3457_v24 = vmax.f32 %v3393_v14, 0.0  ;;  %v8819_v29 = vcombine.low %v4091_v46, %v4093_v27  ;;  %v14731_v12 = vmov 1  }
 0x22a   : > { %v3486_v25 = vpack.c.bf16 %v3454_v18, %v3450_v15  ;;  %v3488_v42 = vpack.c.bf16 %v3456_v19, %v3452_v17  ;;  %10024 = vset.pattern.permute.xlu1 %v14731_v12 }
 0x22b   : > { %v3487_v26 = vpack.c.bf16 %v3455_v22, %v3451_v20  ;;  %v3489_v43 = vpack.c.bf16 %v3457_v24, %v3453_v21  ;;  %v4134_v30 = vsel %vm880_vm0, %v8819_v29, 0 }
 0x22c   : > { %4146 = vmatpush1.bf16.msra.mxu0 %v4134_v30 }
 0x22d   : > { %3841 = vmatprep.mubr.bf16.mxu0 %v3487_v26  ;;  %3938 = vmatprep.mubr.bf16.mxu1 %v3489_v43 }
 0x22e   : > { %3842 = vmatmul.mubr.bf16.gmra.mrb[60].mxu0 %v3486_v25  ;;  %3939 = vmatmul.mubr.bf16.gmra.mrb[60].mxu1 %v3488_v42 }
 0x22f   : > { %4177 = vmatprep.mubr.bf16.mxu0 %v14733_v3  ;;  %4290 = vmatprep.mubr.bf16.mxu1 %v14733_v3 }
 0x236   : > { %8824 = vmatmul.mubr.msk.bf16.vlgmr.msra.gmra.mrb[64].mxu0 %vm855_vm1, %v11396_v13  ;;  %8833 = vmatmul.mubr.msk.bf16.vlgmr.msra.gmra.mrb[64].mxu1 %vm855_vm1, %v11396_v13 }
 0x237   : > { %4187 = vmatprep.mubr.bf16.mxu0 %v14733_v3  ;;  %4300 = vmatprep.mubr.bf16.mxu1 %v14733_v3 }
 0x23e   : > { %8825 = vmatmul.mubr.msk.bf16.gmra.mrb[68].mxu0 %vm855_vm1, %v11427_v23  ;;  %8834 = vmatmul.mubr.msk.bf16.gmra.mrb[68].mxu1 %vm855_vm1, %v11427_v23 }
 0x23f   : > { %4197 = vmatprep.mubr.bf16.mxu0 %v14733_v3  ;;  %4310 = vmatprep.mubr.bf16.mxu1 %v14733_v3 }
 0x246   : > { %8826 = vmatmul.mubr.msk.bf16.gmra.mrb[72].mxu0 %vm855_vm1, %v11461_v34  ;;  %8835 = vmatmul.mubr.msk.bf16.gmra.mrb[72].mxu1 %vm855_vm1, %v11461_v34  ;;  %v12403_v34 = vld [vmem:[%s14723_s7] ss:$0 sm:$0xff] }
 0x247   : > { %4207 = vmatprep.mubr.bf16.mxu0 %v14733_v3  ;;  %4320 = vmatprep.mubr.bf16.mxu1 %v14733_v3 }
 0x24e   : > { %8827 = vmatmul.mubr.msk.bf16.gmra.mrb[76].mxu0 %vm855_vm1, %v11492_v44  ;;  %8836 = vmatmul.mubr.msk.bf16.gmra.mrb[76].mxu1 %vm855_vm1, %v11492_v44 }
 0x24f   : > { %4217 = vmatprep.mubr.bf16.mxu0 %v14733_v3  ;;  %4330 = vmatprep.mubr.bf16.mxu1 %v14733_v3 }
 0x256   : > { %8828 = vmatmul.mubr.msk.bf16.gmra.mrb[80].mxu0 %vm855_vm1, %v11529_v56  ;;  %8837 = vmatmul.mubr.msk.bf16.gmra.mrb[80].mxu1 %vm855_vm1, %v11529_v56 }
 0x257   : > { %4227 = vmatprep.mubr.bf16.mxu0 %v14733_v3  ;;  %4340 = vmatprep.mubr.bf16.mxu1 %v14733_v3 }
 0x25e   : > { %8829 = vmatmul.mubr.msk.bf16.gmra.mrb[84].mxu0 %vm855_vm1, %v11564_v4  ;;  %8838 = vmatmul.mubr.msk.bf16.gmra.mrb[84].mxu1 %vm855_vm1, %v11564_v4 }
 0x25f   : > { %4237 = vmatprep.mubr.bf16.mxu0 %v14733_v3  ;;  %4350 = vmatprep.mubr.bf16.mxu1 %v14733_v3 }
 0x266   : > { %8830 = vmatmul.mubr.msk.bf16.gmra.mrb[88].mxu0 %vm855_vm1, %v11605_v16  ;;  %8839 = vmatmul.mubr.msk.bf16.gmra.mrb[88].mxu1 %vm855_vm1, %v11605_v16 }
 0x267   : > { %4247 = vmatprep.mubr.bf16.mxu0 %v14733_v3  ;;  %4360 = vmatprep.mubr.bf16.mxu1 %v14733_v3 }
 0x26e   : > { %8831 = vmatmul.mubr.msk.bf16.gmra.mrb[92].mxu0 %vm855_vm1, %v11639_v28  ;;  %8840 = vmatmul.mubr.msk.bf16.gmra.mrb[92].mxu1 %vm855_vm1, %v11639_v28 }
 0x2c9   : > { %v9323_v13 = vpop.f32.mrb[32].mxu0  ;;  %v9387_v23 = vpop.f32.mrb[32].mxu1 }
 0x2ca   : > { %v9324_v44 = vpop.f32.mrb[33].mxu0  ;;  %v9388_v56 = vpop.f32.mrb[33].mxu1 }
 0x2cb   : > { %v9325_v4 = vadd.f32 %v9324_v44, %v9323_v13  ;;  %v9389_v35 = vadd.f32 %v9388_v56, %v9387_v23  ;;  %v9326_v39 = vpop.f32.mrb[34].mxu0  ;;  %v9390_v47 = vpop.f32.mrb[34].mxu1 }
 0x2cc   : > { %v9327_v16 = vpop.f32.mrb[35].mxu0  ;;  %v9391_v48 = vpop.f32.mrb[35].mxu1 }
 0x2cd   : > { %v3788_v49 = vadd.f32 %v9325_v4, %v12403_v34  ;;  %v9328_v50 = vadd.f32 %v9327_v16, %v9326_v39  ;;  %v9392_v51 = vadd.f32 %v9391_v48, %v9390_v47 }
 0x2cf   : > { %v12412_v28 = vadd.f32 %v9389_v35, %v3788_v49  ;;  %v3791_v52 = vadd.f32 %v9328_v50, %v12403_v34 }
 0x2d1   : > { %v3947_v53 = vmul.f32 0.5, %v12412_v28  ;;  %8349 = vst.msk [vmem:[%s12410_s18] sm:$0xff] %vm8348_vm3, %v12412_v28  ;;  %v12419_v54 = vadd.f32 %v9392_v51, %v3791_v52  ;;  %v9329_v55 = vpop.f32.mrb[36].mxu0  ;;  %v9393_v57 = vpop.f32.mrb[36].mxu1 }
 0x2d2   : > { %v9330_v58 = vpop.f32.mrb[37].mxu0  ;;  %v9394_v59 = vpop.f32.mrb[37].mxu1 }
 0x2d3   : > { %v3963_v60 = vmul.f32 1.442695, %v3947_v53  ;;  %v3948_v61 = vmul.f32 0.5, %v12419_v54  ;;  %8350 = vst.msk [vmem:[%s12410_s18 + $0x8] sm:$0xff] %vm8348_vm3, %v12419_v54  ;;  %v9331_v62 = vadd.f32 %v9330_v58, %v9329_v55  ;;  %v9395_v63 = vadd.f32 %v9394_v59, %v9393_v57  ;;  %v9332_v0 = vpop.f32.mrb[38].mxu0  ;;  %v9396_v1 = vpop.f32.mrb[38].mxu1 }
 0x2d4   : > { %v9333_v2 = vpop.f32.mrb[39].mxu0  ;;  %v9397_v5 = vpop.f32.mrb[39].mxu1 }
 0x2d5   : > { %10777 = vpow2.f32 %v3963_v60  ;;  %v3965_v6 = vmul.f32 1.442695, %v3948_v61  ;;  %v3796_v7 = vadd.f32 %v9331_v62, %v12403_v34  ;;  %v9334_v8 = vadd.f32 %v9333_v2, %v9332_v0 }
 0x2d6   : > { %v9398_v9 = vadd.f32 %v9397_v5, %v9396_v1 }
 0x2d7   : > { %v12426_v10 = vadd.f32 %v9395_v63, %v3796_v7  ;;  %v3799_v11 = vadd.f32 %v9334_v8, %v12403_v34  ;;  %10779 = vpow2.f32 %v3965_v6 }
 0x2d9   : > { %v3949_v14 = vmul.f32 0.5, %v12426_v10  ;;  %8351 = vst.msk [vmem:[%s12410_s18 + $0x10] sm:$0xff] %vm8348_vm3, %v12426_v10  ;;  %v12434_v15 = vadd.f32 %v9398_v9, %v3799_v11  ;;  %v9335_v17 = vpop.f32.mrb[40].mxu0  ;;  %v9399_v18 = vpop.f32.mrb[40].mxu1 }
 0x2da   : > { %v9336_v19 = vpop.f32.mrb[41].mxu0  ;;  %v9400_v20 = vpop.f32.mrb[41].mxu1 }
 0x2db   : > { %v3967_v21 = vmul.f32 1.442695, %v3949_v14  ;;  %v3950_v22 = vmul.f32 0.5, %v12434_v15  ;;  %8352 = vst.msk [vmem:[%s12410_s18 + $0x18] sm:$0xff] %vm8348_vm3, %v12434_v15  ;;  %v9337_v24 = vadd.f32 %v9336_v19, %v9335_v17  ;;  %v9401_v25 = vadd.f32 %v9400_v20, %v9399_v18  ;;  %v9338_v42 = vpop.f32.mrb[42].mxu0  ;;  %v9402_v26 = vpop.f32.mrb[42].mxu1 }
 0x2dc   : > { %v9339_v43 = vpop.f32.mrb[43].mxu0  ;;  %v9403_v45 = vpop.f32.mrb[43].mxu1 }
 0x2dd   : > { %10781 = vpow2.f32 %v3967_v21  ;;  %v3969_v46 = vmul.f32 1.442695, %v3950_v22  ;;  %v3804_v27 = vadd.f32 %v9337_v24, %v12403_v34  ;;  %v9340_v29 = vadd.f32 %v9339_v43, %v9338_v42 }
 0x2de   : > { %v9404_v30 = vadd.f32 %v9403_v45, %v9402_v26 }
 0x2df   : > { %v10778_v31 = vpop.eup %10777  ;;  %v12441_v32 = vadd.f32 %v9401_v25, %v3804_v27  ;;  %v3807_v33 = vadd.f32 %v9340_v29, %v12403_v34  ;;  %10783 = vpow2.f32 %v3969_v46 }
 0x2e0   : > { %4011 = vrot.lane.b32.xlu0 %v10778_v31, %s11268_s22 }
 0x2e1   : > { %v3951_v13 = vmul.f32 0.5, %v12441_v32  ;;  %8353 = vst.msk [vmem:[%s12410_s18 + $0x20] sm:$0xff] %vm8348_vm3, %v12441_v32  ;;  %v12449_v23 = vadd.f32 %v9404_v30, %v3807_v33  ;;  %v9341_v44 = vpop.f32.mrb[44].mxu0  ;;  %v9405_v56 = vpop.f32.mrb[44].mxu1 }
 0x2e2   : > { %v9342_v4 = vpop.f32.mrb[45].mxu0  ;;  %v9406_v35 = vpop.f32.mrb[45].mxu1 }
 0x2e3   : > { %v10780_v39 = vpop.eup %10779  ;;  %v3971_v47 = vmul.f32 1.442695, %v3951_v13  ;;  %v3952_v16 = vmul.f32 0.5, %v12449_v23  ;;  %8354 = vst.msk [vmem:[%s12410_s18 + $0x28] sm:$0xff] %vm8348_vm3, %v12449_v23  ;;  %v9343_v48 = vadd.f32 %v9342_v4, %v9341_v44  ;;  %v9407_v49 = vadd.f32 %v9406_v35, %v9405_v56  ;;  %v9344_v50 = vpop.f32.mrb[46].mxu0 }
 0x2e4   : > { %v9408_v51 = vpop.f32.mrb[46].mxu1  ;;  %v9345_v52 = vpop.f32.mrb[47].mxu0  ;;  %4013 = vrot.lane.b32.xlu0 %v10780_v39, %s11268_s22 }
 0x2e5   : > { %v9409_v53 = vpop.f32.mrb[47].mxu1  ;;  %10785 = vpow2.f32 %v3971_v47  ;;  %v3973_v55 = vmul.f32 1.442695, %v3952_v16  ;;  %v3812_v57 = vadd.f32 %v9343_v48, %v12403_v34  ;;  %v9346_v58 = vadd.f32 %v9345_v52, %v9344_v50 }
 0x2e6   : > { %v9410_v59 = vadd.f32 %v9409_v53, %v9408_v51 }
 0x2e7   : > { %v10782_v60 = vpop.eup %10781  ;;  %10787 = vpow2.f32 %v3973_v55  ;;  %v12457_v61 = vadd.f32 %v9407_v49, %v3812_v57  ;;  %v3815_v62 = vadd.f32 %v9346_v58, %v12403_v34 }
 0x2e8   : > { %4015 = vrot.lane.b32.xlu1 %v10782_v60, %s11268_s22 }
 0x2e9   : > { %v3953_v63 = vmul.f32 0.5, %v12457_v61  ;;  %8355 = vst.msk [vmem:[%s12410_s18 + $0x30] sm:$0xff] %vm8348_vm3, %v12457_v61  ;;  %v12465_v0 = vadd.f32 %v9410_v59, %v3815_v62  ;;  %v9347_v1 = vpop.f32.mrb[48].mxu0  ;;  %v9411_v2 = vpop.f32.mrb[48].mxu1 }
 0x2ea   : > { %v9348_v5 = vpop.f32.mrb[49].mxu0  ;;  %v9412_v6 = vpop.f32.mrb[49].mxu1 }
 0x2eb   : > { %v10784_v7 = vpop.eup %10783  ;;  %v3975_v8 = vmul.f32 1.442695, %v3953_v63  ;;  %v3954_v9 = vmul.f32 0.5, %v12465_v0  ;;  %8356 = vst.msk [vmem:[%s12410_s18 + $0x38] sm:$0xff] %vm8348_vm3, %v12465_v0  ;;  %v9349_v11 = vadd.f32 %v9348_v5, %v9347_v1  ;;  %v9413_v14 = vadd.f32 %v9412_v6, %v9411_v2  ;;  %v9350_v17 = vpop.f32.mrb[50].mxu0 }
 0x2ec   : > { %v9414_v18 = vpop.f32.mrb[50].mxu1  ;;  %v9351_v19 = vpop.f32.mrb[51].mxu0  ;;  %4017 = vrot.lane.b32.xlu1 %v10784_v7, %s11268_s22 }
 0x2ed   : > { %v9415_v20 = vpop.f32.mrb[51].mxu1  ;;  %10789 = vpow2.f32 %v3975_v8  ;;  %v3977_v21 = vmul.f32 1.442695, %v3954_v9  ;;  %v3820_v22 = vadd.f32 %v9349_v11, %v12403_v34  ;;  %v9352_v24 = vadd.f32 %v9351_v19, %v9350_v17 }
 0x2ee   : > { %v9416_v25 = vadd.f32 %v9415_v20, %v9414_v18 }
 0x2ef   : > { %v10786_v42 = vpop.eup %10785  ;;  %10791 = vpow2.f32 %v3977_v21  ;;  %v12473_v26 = vadd.f32 %v9413_v14, %v3820_v22  ;;  %v3823_v43 = vadd.f32 %v9352_v24, %v12403_v34 }
 0x2f0   : > { %4019 = vrot.lane.b32.xlu0 %v10786_v42, %s11268_s22 }
 0x2f1   : > { %v10788_v45 = vpop.eup %10787  ;;  %v3955_v46 = vmul.f32 0.5, %v12473_v26  ;;  %8357 = vst.msk [vmem:[%s12410_s18 + $0x40] sm:$0xff] %vm8348_vm3, %v12473_v26  ;;  %v12481_v27 = vadd.f32 %v9416_v25, %v3823_v43  ;;  %v9353_v29 = vpop.f32.mrb[52].mxu0 }
 0x2f2   : > { %v9417_v30 = vpop.f32.mrb[52].mxu1  ;;  %v9354_v31 = vpop.f32.mrb[53].mxu0  ;;  %4021 = vrot.lane.b32.xlu1 %v10788_v45, %s11268_s22 }
 0x2f3   : > { %v9418_v33 = vpop.f32.mrb[53].mxu1  ;;  %v3979_v13 = vmul.f32 1.442695, %v3955_v46  ;;  %v3956_v44 = vmul.f32 0.5, %v12481_v27  ;;  %8358 = vst.msk [vmem:[%s12410_s18 + $0x48] sm:$0xff] %vm8348_vm3, %v12481_v27  ;;  %v9355_v56 = vadd.f32 %v9354_v31, %v9353_v29  ;;  %v9356_v35 = vpop.f32.mrb[54].mxu0 }
 0x2f4   : > { %v9419_v4 = vadd.f32 %v9418_v33, %v9417_v30  ;;  %v9420_v39 = vpop.f32.mrb[54].mxu1  ;;  %v9357_v47 = vpop.f32.mrb[55].mxu0 }
 0x2f5   : > { %v9421_v16 = vpop.f32.mrb[55].mxu1  ;;  %10793 = vpow2.f32 %v3979_v13  ;;  %v3981_v48 = vmul.f32 1.442695, %v3956_v44  ;;  %v3828_v49 = vadd.f32 %v9355_v56, %v12403_v34  ;;  %v9358_v50 = vadd.f32 %v9357_v47, %v9356_v35 }
 0x2f6   : > { %v9422_v51 = vadd.f32 %v9421_v16, %v9420_v39 }
 0x2f7   : > { %v10790_v52 = vpop.eup %10789  ;;  %10795 = vpow2.f32 %v3981_v48  ;;  %v12489_v53 = vadd.f32 %v9419_v4, %v3828_v49  ;;  %v3831_v55 = vadd.f32 %v9358_v50, %v12403_v34 }
 0x2f8   : > { %4023 = vrot.lane.b32.xlu0 %v10790_v52, %s11268_s22 }
 0x2f9   : > { %v10792_v57 = vpop.eup %10791  ;;  %v3957_v58 = vmul.f32 0.5, %v12489_v53  ;;  %8359 = vst.msk [vmem:[%s12410_s18 + $0x50] sm:$0xff] %vm8348_vm3, %v12489_v53  ;;  %v12497_v59 = vadd.f32 %v9422_v51, %v3831_v55  ;;  %v9359_v60 = vpop.f32.mrb[56].mxu0 }
 0x2fa   : > { %v9423_v62 = vpop.f32.mrb[56].mxu1  ;;  %v9360_v63 = vpop.f32.mrb[57].mxu0  ;;  %4025 = vrot.lane.b32.xlu1 %v10792_v57, %s11268_s22 }
 0x2fb   : > { %v9424_v1 = vpop.f32.mrb[57].mxu1  ;;  %v3983_v2 = vmul.f32 1.442695, %v3957_v58  ;;  %v3958_v5 = vmul.f32 0.5, %v12497_v59  ;;  %8360 = vst.msk [vmem:[%s12410_s18 + $0x58] sm:$0xff] %vm8348_vm3, %v12497_v59  ;;  %v9361_v6 = vadd.f32 %v9360_v63, %v9359_v60  ;;  %v9362_v8 = vpop.f32.mrb[58].mxu0 }
 0x2fc   : > { %v9425_v7 = vadd.f32 %v9424_v1, %v9423_v62  ;;  %v9426_v9 = vpop.f32.mrb[58].mxu1  ;;  %v9363_v11 = vpop.f32.mrb[59].mxu0 }
 0x2fd   : > { %v9427_v14 = vpop.f32.mrb[59].mxu1  ;;  %10797 = vpow2.f32 %v3983_v2  ;;  %v3985_v17 = vmul.f32 1.442695, %v3958_v5  ;;  %v3836_v18 = vadd.f32 %v9361_v6, %v12403_v34  ;;  %v9364_v19 = vadd.f32 %v9363_v11, %v9362_v8  ;;  %v10457_v6 = vld [vmem:[%s14727_s11] ss:$28 sps:$4 sm:$0xff]  }
 0x2fe   : > { %v9428_v20 = vadd.f32 %v9427_v14, %v9426_v9  ;;  %v10460_v8 = vld [vmem:[%s14727_s11 + $0x8] ss:$28 sps:$4 sm:$0xff]   ;;  %v10463_v11 = vld [vmem:[%s14727_s11 + $0x38] ss:$28 sps:$4 sm:$0xff]  }
 0x2ff   : > { %v10794_v21 = vpop.eup %10793  ;;  %10799 = vpow2.f32 %v3985_v17  ;;  %v12505_v22 = vadd.f32 %v9425_v7, %v3836_v18  ;;  %v3839_v24 = vadd.f32 %v9364_v19, %v12403_v34  ;;  %v10459_v7 = vld [vmem:[%s14727_s11 + $0x4] ss:$28 sps:$4 sm:$0xff]   ;;  %v10462_v9 = vld [vmem:[%s14727_s11 + $0xc] ss:$28 sps:$4 sm:$0xff]   ;;  %v10465_v14 = vld [vmem:[%s14727_s11 + $0x3c] ss:$28 sps:$4 sm:$0xff]  }
 0x300   : > { %4027 = vrot.lane.b32.xlu0 %v10794_v21, %s11268_s22  ;;  %6387 = vmatprep.subr.bf16.mxu0 %v10459_v7  ;;  %v10466_v17 = vld [vmem:[%s14727_s11 + $0x40] ss:$28 sps:$4 sm:$0xff]   ;;  %v10471_v19 = vld [vmem:[%s14727_s11 + $0x74] ss:$28 sps:$4 sm:$0xff]  }
 0x301   : > { %v10796_v25 = vpop.eup %10795  ;;  %v3959_v42 = vmul.f32 0.5, %v12505_v22  ;;  %8361 = vst.msk [vmem:[%s12410_s18 + $0x60] sm:$0xff] %vm8348_vm3, %v12505_v22  ;;  %v12513_v43 = vadd.f32 %v9428_v20, %v3839_v24  ;;  %v9365_v45 = vpop.f32.mrb[60].mxu0  ;;  %6613 = vmatprep.subr.bf16.mxu1 %v10462_v9  ;;  %6388 = vmatpush1.bf16.msra.mxu0 %v10457_v6  ;;  %v10468_v18 = vld [vmem:[%s14727_s11 + $0x44] ss:$28 sps:$4 sm:$0xff]  }
 0x302   : > { %v9429_v46 = vpop.f32.mrb[60].mxu1  ;;  %4029 = vrot.lane.b32.xlu1 %v10796_v25, %s11268_s22  ;;  %v9366_v30 = vpop.f32.mrb[61].mxu0  ;;  %6614 = vmatpush1.bf16.msra.mxu1 %v10460_v8  ;;  %v10474_v20 = vld [vmem:[%s14727_s11 + $0x7c] ss:$28 sps:$4 sm:$0xff]   ;;  %v10469_v21 = vld [vmem:[%s14727_s11 + $0x70] ss:$28 sps:$4 sm:$0xff]  }
 0x303   : > { %v9430_v29 = vpop.f32.mrb[61].mxu1  ;;  %v3987_v31 = vmul.f32 1.442695, %v3959_v42  ;;  %v3960_v33 = vmul.f32 0.5, %v12513_v43  ;;  %8362 = vst.msk [vmem:[%s12410_s18 + $0x68] sm:$0xff] %vm8348_vm3, %v12513_v43  ;;  %v9367_v44 = vadd.f32 %v9366_v30, %v9365_v45  ;;  %v9368_v56 = vpop.f32.mrb[62].mxu0  ;;  %6389 = vmatprep.subr.bf16.mxu0 %v10465_v14  ;;  %6615 = vmatprep.subr.bf16.mxu1 %v10468_v18 }
 0x304   : > { %v9431_v13 = vadd.f32 %v9430_v29, %v9429_v46  ;;  %v9432_v4 = vpop.f32.mrb[62].mxu1  ;;  %v9369_v35 = vpop.f32.mrb[63].mxu0  ;;  %v10472_v24 = vld [vmem:[%s14727_s11 + $0x78] ss:$28 sps:$4 sm:$0xff]   ;;  %v10477_v25 = vld [vmem:[%s14727_s11 + $0xac] ss:$28 sps:$4 sm:$0xff]  }
 0x305   : > { %v9433_v39 = vpop.f32.mrb[63].mxu1  ;;  %10801 = vpow2.f32 %v3987_v31  ;;  %v3989_v47 = vmul.f32 1.442695, %v3960_v33  ;;  %v3844_v16 = vadd.f32 %v9367_v44, %v12403_v34  ;;  %v9370_v48 = vadd.f32 %v9369_v35, %v9368_v56  ;;  %6390 = vmatpush1.bf16.msra.mxu0 %v10463_v11  ;;  %v10480_v42 = vld [vmem:[%s14727_s11 + $0xb4] ss:$28 sps:$4 sm:$0xff]   ;;  %v623_v18 = vld [vmem:[%s12674_s26] sm:$0xff] }
 0x306   : > { %v9434_v49 = vadd.f32 %v9433_v39, %v9432_v4  ;;  %6616 = vmatpush1.bf16.msra.mxu1 %v10466_v17  ;;  %6391 = vmatprep.subr.bf16.mxu0 %v10471_v19  ;;  %v10475_v45 = vld [vmem:[%s14727_s11 + $0xa8] ss:$28 sps:$4 sm:$0xff]   ;;  %v10478_v46 = vld [vmem:[%s14727_s11 + $0xb0] ss:$28 sps:$4 sm:$0xff]   ;;  %v10481_v31 = vld [vmem:[%s14727_s11 + $0xe0] ss:$28 sps:$4 sm:$0xff]  }
 0x307   : > { %v10798_v50 = vpop.eup %10797  ;;  %10803 = vpow2.f32 %v3989_v47  ;;  %v12521_v51 = vadd.f32 %v9431_v13, %v3844_v16  ;;  %v3847_v52 = vadd.f32 %v9370_v48, %v12403_v34  ;;  %6617 = vmatprep.subr.bf16.mxu1 %v10474_v20  ;;  %v10483_v29 = vld [vmem:[%s14727_s11 + $0xe4] ss:$28 sps:$4 sm:$0xff]   ;;  %v10486_v30 = vld [vmem:[%s14727_s11 + $0xec] ss:$28 sps:$4 sm:$0xff]   ;;  %v10489_v13 = vld [vmem:[%s14727_s11 + $0x11c] ss:$28 sps:$4 sm:$0xff]  }
 0x308   : > { %4031 = vrot.lane.b32.xlu0 %v10798_v50, %s11268_s22  ;;  %v10484_v33 = vld [vmem:[%s14727_s11 + $0xe8] ss:$28 sps:$4 sm:$0xff]   ;;  %v10487_v56 = vld [vmem:[%s14727_s11 + $0x118] ss:$28 sps:$4 sm:$0xff]   ;;  %v10490_v4 = vld [vmem:[%s14727_s11 + $0x120] ss:$28 sps:$4 sm:$0xff]  }
 0x309   : > { %v10800_v55 = vpop.eup %10799  ;;  %v3961_v57 = vmul.f32 0.5, %v12521_v51  ;;  %8363 = vst.msk [vmem:[%s12410_s18 + $0x70] sm:$0xff] %vm8348_vm3, %v12521_v51  ;;  %v12529_v58 = vadd.f32 %v9434_v49, %v3847_v52  ;;  %6392 = vmatpush1.bf16.msra.mxu0 %v10469_v21  ;;  %v10492_v44 = vld [vmem:[%s14727_s11 + $0x124] ss:$28 sps:$4 sm:$0xff]   ;;  %v10495_v35 = vld [vmem:[%s14727_s11 + $0x154] ss:$28 sps:$4 sm:$0xff]  }
 0x30a   : > { %4033 = vrot.lane.b32.xlu1 %v10800_v55, %s11268_s22  ;;  %6618 = vmatpush1.bf16.msra.mxu1 %v10472_v24  ;;  %v10498_v39 = vld [vmem:[%s14727_s11 + $0x15c] ss:$28 sps:$4 sm:$0xff]   ;;  %v10493_v47 = vld [vmem:[%s14727_s11 + $0x150] ss:$28 sps:$4 sm:$0xff]   ;;  %v12627_v49 = vpop.f32.mrb[64].mxu0 }
 0x30b   : > { %v3991_v60 = vmul.f32 1.442695, %v3961_v57  ;;  %v3962_v62 = vmul.f32 0.5, %v12529_v58  ;;  %8364 = vst.msk [vmem:[%s12410_s18 + $0x78] sm:$0xff] %vm8348_vm3, %v12529_v58  ;;  %6393 = vmatprep.subr.bf16.mxu0 %v10477_v25  ;;  %6619 = vmatprep.subr.bf16.mxu1 %v10480_v42  ;;  %v10496_v16 = vld [vmem:[%s14727_s11 + $0x158] ss:$28 sps:$4 sm:$0xff]  }
 0x30c   : > { %v10501_v48 = vld [vmem:[%s14727_s11 + $0x18c] ss:$28 sps:$4 sm:$0xff]   ;;  %v10504_v50 = vld [vmem:[%s14727_s11 + $0x194] ss:$28 sps:$4 sm:$0xff]   ;;  %v12632_v52 = vpop.f32.mrb[65].mxu0 }
 0x30d   : > { %10805 = vpow2.f32 %v3991_v60  ;;  %v3993_v34 = vmul.f32 1.442695, %v3962_v62  ;;  %6394 = vmatpush1.bf16.msra.mxu0 %v10475_v45  ;;  %v10499_v55 = vld [vmem:[%s14727_s11 + $0x188] ss:$28 sps:$4 sm:$0xff]   ;;  %v10502_v57 = vld [vmem:[%s14727_s11 + $0x190] ss:$28 sps:$4 sm:$0xff]  }
 0x30e   : > { %6620 = vmatpush1.bf16.msra.mxu1 %v10478_v46  ;;  %6395 = vmatprep.subr.bf16.mxu0 %v10483_v29  ;;  %v10507_v60 = vld [vmem:[%s14727_s11 + $0x1c4] ss:$28 sps:$4 sm:$0xff]   ;;  %v10510_v62 = vld [vmem:[%s14727_s11 + $0x1cc] ss:$28 sps:$4 sm:$0xff]   ;;  %v10519_v7 = vld [vmem:[%s14727_s11 + $0x234] ss:$28 sps:$4 sm:$0xff]  }
 0x30f   : > { %v10802_v63 = vpop.eup %10801  ;;  %10807 = vpow2.f32 %v3993_v34  ;;  %6621 = vmatprep.subr.bf16.mxu1 %v10486_v30  ;;  %v10505_v34 = vld [vmem:[%s14727_s11 + $0x1c0] ss:$28 sps:$4 sm:$0xff]   ;;  %v10517_v9 = vld [vmem:[%s14727_s11 + $0x230] ss:$28 sps:$4 sm:$0xff]   ;;  %v10520_v11 = vld [vmem:[%s14727_s11 + $0x238] ss:$28 sps:$4 sm:$0xff]  }
 0x310   : > { %4035 = vrot.lane.b32.xlu0 %v10802_v63, %s11268_s22  ;;  %v10508_v63 = vld [vmem:[%s14727_s11 + $0x1c8] ss:$28 sps:$4 sm:$0xff]   ;;  %v10514_v6 = vld [vmem:[%s14727_s11 + $0x200] ss:$28 sps:$4 sm:$0xff]   ;;  %v10528_v17 = vld [vmem:[%s14727_s11 + $0x274] ss:$28 sps:$4 sm:$0xff]  }
 0x311   : > { %v10804_v1 = vpop.eup %10803  ;;  %6396 = vmatpush1.bf16.msra.mxu0 %v10481_v31  ;;  %v10522_v8 = vld [vmem:[%s14727_s11 + $0x23c] ss:$28 sps:$4 sm:$0xff]   ;;  %v10525_v14 = vld [vmem:[%s14727_s11 + $0x26c] ss:$28 sps:$4 sm:$0xff]   ;;  %v12692_v19 = vld [vmem:[%s14726_s10] sm:$0xf] }
 0x312   : > { %4037 = vrot.lane.b32.xlu1 %v10804_v1, %s11268_s22  ;;  %6622 = vmatpush1.bf16.msra.mxu1 %v10484_v33  ;;  %v10513_v1 = vld [vmem:[%s14727_s11 + $0x1fc] ss:$28 sps:$4 sm:$0xff]   ;;  %v10523_v20 = vld [vmem:[%s14727_s11 + $0x268] ss:$28 sps:$4 sm:$0xff]   ;;  %v10526_v24 = vld [vmem:[%s14727_s11 + $0x270] ss:$28 sps:$4 sm:$0xff]   ;;  %v12702_v42 = vrot.slane %v12692_v19, %v12246_v38  ;;  %v12707_v46 = vrot.slane %v12692_v19, %v12255_v41 }
 0x313   : > { %6397 = vmatprep.subr.bf16.mxu0 %v10489_v13  ;;  %6623 = vmatprep.subr.bf16.mxu1 %v10492_v44  ;;  %v624_v45 = vld [vmem:[%s12674_s26 + $0x8] sm:$0xff]  ;;  %v4292_v31 = vpop.f32.mrb[64].mxu1  ;;  %v10531_v33 = vld [vmem:[%s14727_s11 + $0x2a4] ss:$28 sps:$4 sm:$0xff]  }
 0x314   : > { %v10534_v13 = vld [vmem:[%s14727_s11 + $0x2ac] ss:$28 sps:$4 sm:$0xff]  }
 0x315   : > { %6398 = vmatpush1.bf16.msra.mxu0 %v10487_v56  ;;  %v12717_v56 = vadd.f32 %v4292_v31, %v12702_v42 }
 0x316   : > { %6624 = vmatpush1.bf16.msra.mxu1 %v10490_v4  ;;  %6399 = vmatprep.subr.bf16.mxu0 %v10495_v35  ;;  %v4294_v4 = vpop.f32.mrb[65].mxu1  ;;  %v10532_v35 = vld [vmem:[%s14727_s11 + $0x2a8] ss:$28 sps:$4 sm:$0xff]  }
 0x317   : > { %v10806_v2 = vpop.eup %10805  ;;  %6625 = vmatprep.subr.bf16.mxu1 %v10498_v39  ;;  %v625_v39 = vld [vmem:[%s12674_s26 + $0x10] sm:$0xff] }
 0x318   : > { %4039 = vrot.lane.b32.xlu0 %v10806_v2, %s11268_s22  ;;  %v10516_v2 = vld [vmem:[%s14727_s11 + $0x204] ss:$28 sps:$4 sm:$0xff]  }
 0x319   : > { %v10808_v5 = vpop.eup %10807  ;;  %6400 = vmatpush1.bf16.msra.mxu0 %v10493_v47  ;;  %v12727_v47 = vadd.f32 %v4294_v4, %v12707_v46 }
 0x31a   : > { %4041 = vrot.lane.b32.xlu1 %v10808_v5, %s11268_s22  ;;  %6626 = vmatpush1.bf16.msra.mxu1 %v10496_v16  ;;  %v10511_v5 = vld [vmem:[%s14727_s11 + $0x1f8] ss:$28 sps:$4 sm:$0xff]  }
 0x31b   : > { %6401 = vmatprep.subr.bf16.mxu0 %v10501_v48  ;;  %6627 = vmatprep.subr.bf16.mxu1 %v10504_v50  ;;  %v10537_v50 = vld [vmem:[%s14727_s11 + $0x2dc] ss:$28 sps:$4 sm:$0xff]  }
 0x31d   : > { %6402 = vmatpush1.bf16.msra.mxu0 %v10499_v55  ;;  %v10540_v55 = vld [vmem:[%s14727_s11 + $0x2e4] ss:$28 sps:$4 sm:$0xff]  }
 0x31e   : > { %6628 = vmatpush1.bf16.msra.mxu1 %v10502_v57  ;;  %6403 = vmatprep.subr.bf16.mxu0 %v10507_v60  ;;  %v12738_v60 = vpop.f32.mrb[66].mxu0 }
 0x31f   : > { %6629 = vmatprep.subr.bf16.mxu1 %v10510_v62  ;;  %v4296_v62 = vpop.f32.mrb[66].mxu1 }
 0x321   : > { %6404 = vmatpush1.bf16.msra.mxu0 %v10505_v34  ;;  %v10538_v34 = vld [vmem:[%s14727_s11 + $0x2e0] ss:$28 sps:$4 sm:$0xff]  }
 0x322   : > { %6630 = vmatpush1.bf16.msra.mxu1 %v10508_v63  ;;  %6405 = vmatprep.subr.bf16.mxu0 %v10513_v1  ;;  %v626_v63 = vld [vmem:[%s12674_s26 + $0x18] sm:$0xff]  ;;  %v12747_v1 = vpop.f32.mrb[67].mxu0 }
 0x323   : > { %6631 = vmatprep.subr.bf16.mxu1 %v10516_v2  ;;  %v4298_v2 = vpop.f32.mrb[67].mxu1 }
 0x325   : > { %6406 = vmatpush1.bf16.msra.mxu0 %v10511_v5 }
 0x326   : > { %6632 = vmatpush1.bf16.msra.mxu1 %v10514_v6  ;;  %6407 = vmatprep.subr.bf16.mxu0 %v10519_v7  ;;  %v12751_v6 = vadd.f32 %v4296_v62, %v12702_v42 }
 0x327   : > { %6633 = vmatprep.subr.bf16.mxu1 %v10522_v8  ;;  %v12754_v8 = vadd.f32 %v4298_v2, %v12707_v46 }
 0x329   : > { %6408 = vmatpush1.bf16.msra.mxu0 %v10517_v9 }
 0x32a   : > { %6634 = vmatpush1.bf16.msra.mxu1 %v10520_v11  ;;  %6409 = vmatprep.subr.bf16.mxu0 %v10525_v14  ;;  %v627_v11 = vld [vmem:[%s12674_s26 + $0x20] sm:$0xff] }
 0x32b   : > { %6635 = vmatprep.subr.bf16.mxu1 %v10528_v17  ;;  %v10546_v17 = vld [vmem:[%s14727_s11 + $0x31c] ss:$28 sps:$4 sm:$0xff]  }
 0x32d   : > { %6410 = vmatpush1.bf16.msra.mxu0 %v10523_v20  ;;  %v12764_v20 = vpop.f32.mrb[68].mxu0 }
 0x32e   : > { %6636 = vmatpush1.bf16.msra.mxu1 %v10526_v24  ;;  %6411 = vmatprep.subr.bf16.mxu0 %v10531_v33  ;;  %v10544_v24 = vld [vmem:[%s14727_s11 + $0x318] ss:$28 sps:$4 sm:$0xff]  }
 0x32f   : > { %6637 = vmatprep.subr.bf16.mxu1 %v10534_v13 }
 0x332   : > { %6638 = vmatpush1.bf16.msra.mxu1 %v10532_v35  ;;  %v10552_v35 = vld [vmem:[%s14727_s11 + $0x354] ss:$28 sps:$4 sm:$0xff]  }
 0x333   : > { %6639 = vmatprep.subr.bf16.mxu1 %v10540_v55 }
 0x336   : > { %6640 = vmatpush1.bf16.msra.mxu1 %v10538_v34 }
 0x337   : > { %6641 = vmatprep.subr.bf16.mxu1 %v10546_v17 }
 0x33a   : > { %6642 = vmatpush1.bf16.msra.mxu1 %v10544_v24 }
 0x33b   : > { %6643 = vmatprep.subr.bf16.mxu1 %v10552_v35 }
 0x352   : > { %v4012_v21 = vpop.permute.xlu0 %4011 }
 0x353   : > { %v4059_v25 = vmul.f32 %v4012_v21, %v623_v18  ;;  %v10541_v21 = vld [vmem:[%s14727_s11 + $0x310] ss:$28 sps:$4 sm:$0xff]  }
 0x355   : > { %v4075_v29 = vadd.f32 %v4059_v25, %v12412_v28  ;;  %v10529_v28 = vld [vmem:[%s14727_s11 + $0x2a0] ss:$28 sps:$4 sm:$0xff]   ;;  %v628_v25 = vld [vmem:[%s12674_s26 + $0x28] sm:$0xff] }
 0x356   : > { %v4014_v30 = vpop.permute.xlu0 %4013  ;;  %6412 = vmatpush1.bf16.msra.mxu0 %v10529_v28  ;;  %v10549_v28 = vld [vmem:[%s14727_s11 + $0x34c] ss:$28 sps:$4 sm:$0xff]  }
 0x357   : > { %v4060_v44 = vmul.f32 %v4014_v30, %v624_v45  ;;  %4619 = vperm.xlu1 %10024, %v4075_v29   ;;  %4375 = vperm.xlu0 %10023, %v4075_v29   ;;  %v4302_v45 = vpop.f32.mrb[68].mxu1  ;;  %v12773_v29 = vpop.f32.mrb[69].mxu0 }
 0x358   : > { %6413 = vmatprep.subr.bf16.mxu0 %v10537_v50  ;;  %v12777_v31 = vadd.f32 %v4302_v45, %v12702_v42  ;;  %v4304_v33 = vpop.f32.mrb[69].mxu1  ;;  %v629_v50 = vld [vmem:[%s12674_s26 + $0x30] sm:$0xff] }
 0x359   : > { %v4076_v16 = vadd.f32 %v4060_v44, %v12419_v54  ;;  %v10535_v54 = vld [vmem:[%s14727_s11 + $0x2d8] ss:$28 sps:$4 sm:$0xff]   ;;  %v12781_v44 = vadd.f32 %v4304_v33, %v12707_v46 }
 0x35a   : > { %v4016_v48 = vpop.permute.xlu1 %4015  ;;  %6414 = vmatpush1.bf16.msra.mxu0 %v10535_v54 }
 0x35b   : > { %v4061_v57 = vmul.f32 %v4016_v48, %v625_v39  ;;  %10025 = vset.pattern.permute.xlu1 %v14733_v3  ;;  %10026 = vset.pattern.permute.xlu0 %v14731_v12  ;;  %v12789_v39 = vpop.f32.mrb[70].mxu0  ;;  %v10550_v48 = vld [vmem:[%s14727_s11 + $0x350] ss:$28 sps:$4 sm:$0xff]  }
 0x35c   : > { %4380 = vperm.xlu1 %10025, %v4076_v16   ;;  %4623 = vperm.xlu0 %10026, %v4076_v16   ;;  %v4306_v16 = vpop.f32.mrb[70].mxu1  ;;  %v12799_v55 = vpop.f32.mrb[71].mxu0 }
 0x35d   : > { %v4077_v5 = vadd.f32 %v4061_v57, %v12426_v10  ;;  %v10543_v10 = vld [vmem:[%s14727_s11 + $0x314] ss:$28 sps:$4 sm:$0xff]   ;;  %v4308_v57 = vpop.f32.mrb[71].mxu1  ;;  %v12802_v62 = vadd.f32 %v4306_v16, %v12702_v42  ;;  %v12807_v34 = vpop.f32.mrb[72].mxu0  ;;  %6644 = vmatpush1.bf16.msra.mxu1 %v10550_v48 }
 0x35e   : > { %v4018_v7 = vpop.permute.xlu1 %4017  ;;  %6415 = vmatprep.subr.bf16.mxu0 %v10543_v10  ;;  %v12805_v54 = vadd.f32 %v4308_v57, %v12707_v46  ;;  %v633_v57 = vld [vmem:[%s12674_s26 + $0x50] sm:$0xff] }
 0x35f   : > { %v4062_v9 = vmul.f32 %v4018_v7, %v626_v63  ;;  %6416 = vmatpush1.bf16.msra.mxu0 %v10541_v21  ;;  %v4312_v63 = vpop.f32.mrb[72].mxu1  ;;  %v630_v21 = vld [vmem:[%s12674_s26 + $0x38] sm:$0xff] }
 0x360   : > { %4385 = vperm.xlu1 %10025, %v4077_v5   ;;  %4627 = vperm.xlu0 %10026, %v4077_v5   ;;  %v12811_v7 = vadd.f32 %v4312_v63, %v12702_v42 }
 0x361   : > { %v4078_v14 = vadd.f32 %v4062_v9, %v12434_v15  ;;  %6417 = vmatprep.subr.bf16.mxu0 %v10549_v28  ;;  %v12813_v9 = vpop.f32.mrb[73].mxu0 }
 0x362   : > { %v4020_v18 = vpop.permute.xlu0 %4019 }
 0x363   : > { %v4063_v15 = vmul.f32 %v4020_v18, %v627_v11  ;;  %v631_v18 = vld [vmem:[%s12674_s26 + $0x40] sm:$0xff] }
 0x364   : > { %v4022_v30 = vpop.permute.xlu1 %4021  ;;  %4390 = vperm.xlu1 %10025, %v4078_v14   ;;  %10028 = vset.pattern.permute.xlu0 %v14733_v3 }
 0x365   : > { %v4079_v13 = vadd.f32 %v4063_v15, %v12441_v32  ;;  %v4064_v4 = vmul.f32 %v4022_v30, %v628_v25  ;;  %v10547_v32 = vld [vmem:[%s14727_s11 + $0x348] ss:$28 sps:$4 sm:$0xff]  }
 0x366   : > { %6418 = vmatpush1.bf16.msra.mxu0 %v10547_v32  ;;  %v632_v25 = vld [vmem:[%s12674_s26 + $0x48] sm:$0xff] }
 0x367   : > { %4395 = vperm.xlu0 %10028, %v4079_v13   ;;  %v4080_v2 = vadd.f32 %v4064_v4, %v12449_v23  ;;  %v12826_v4 = vpop.f32.mrb[74].mxu0 }
 0x368   : > { %10027 = vset.pattern.permute.xlu1 %v14731_v12  ;;  %v12831_v35 = vpop.f32.mrb[75].mxu0 }
 0x369   : > { %4631 = vperm.xlu1 %10027, %v4078_v14   ;;  %v4314_v14 = vpop.f32.mrb[73].mxu1  ;;  %v12836_v48 = vpop.f32.mrb[76].mxu0 }
 0x36a   : > { %v4024_v5 = vpop.permute.xlu0 %4023  ;;  %v12817_v10 = vadd.f32 %v4314_v14, %v12707_v46 }
 0x36b   : > { %v4065_v11 = vmul.f32 %v4024_v5, %v629_v50  ;;  %10030 = vset.pattern.permute.xlu0 %v14731_v12 }
 0x36c   : > { %4639 = vperm.xlu0 %10030, %v4080_v2   ;;  %v4026_v17 = vpop.permute.xlu1 %4025 }
 0x36d   : > { %v4081_v23 = vadd.f32 %v4065_v11, %v12457_v61  ;;  %4635 = vperm.xlu1 %10027, %v4079_v13   ;;  %v4066_v45 = vmul.f32 %v4026_v17, %v630_v21  ;;  %v4316_v61 = vpop.f32.mrb[74].mxu1 }
 0x36e   : > { %v12829_v28 = vadd.f32 %v4316_v61, %v12702_v42  ;;  %v4318_v16 = vpop.f32.mrb[75].mxu1 }
 0x36f   : > { %v12834_v32 = vadd.f32 %v4318_v16, %v12707_v46  ;;  %v4322_v50 = vpop.f32.mrb[76].mxu1 }
 0x370   : > { %4643 = vperm.xlu0 %10030, %v4081_v23   ;;  %14767 = vst [vmem:[#allocation7_spill] sm:$0xff] %v12829_v28  ;;  %v12841_v63 = vadd.f32 %v4322_v50, %v12702_v42  ;;  %v4324_v5 = vpop.f32.mrb[77].mxu1 }
 0x371   : > { %10029 = vset.pattern.permute.xlu1 %v14733_v3  ;;  %14768 = vst [vmem:[#allocation8_spill] sm:$0xff] %v12834_v32 }
 0x372   : > { %v4028_v24 = vpop.permute.xlu0 %4027  ;;  %4400 = vperm.xlu1 %10029, %v4080_v2   ;;  %14769 = vst [vmem:[#allocation9_spill] sm:$0xff] %v12841_v63  ;;  %v12843_v2 = vpop.f32.mrb[77].mxu0 }
 0x373   : > { %v4067_v15 = vmul.f32 %v4028_v24, %v631_v18  ;;  %v12849_v17 = vpop.f32.mrb[78].mxu0 }
 0x374   : > { %v4030_v30 = vpop.permute.xlu1 %4029  ;;  %10032 = vset.pattern.permute.xlu0 %v14733_v3  ;;  %v12852_v21 = vpop.f32.mrb[79].mxu0 }
 0x375   : > { %v4083_v33 = vadd.f32 %v4067_v15, %v12473_v26  ;;  %v4068_v13 = vmul.f32 %v4030_v30, %v632_v25  ;;  %v4082_v26 = vadd.f32 %v4066_v45, %v12465_v0  ;;  %v4326_v0 = vpop.f32.mrb[78].mxu1  ;;  %v12861_v45 = vpop.f32.mrb[80].mxu0 }
 0x376   : > { %4405 = vperm.xlu1 %10029, %v4081_v23   ;;  %v12847_v23 = vadd.f32 %v4324_v5, %v12707_v46  ;;  %v12855_v24 = vadd.f32 %v4326_v0, %v12702_v42  ;;  %v4328_v15 = vpop.f32.mrb[79].mxu1  ;;  %v10555_v5 = vld [vmem:[%s14727_s11 + $0x38c] ss:$28 sps:$4 sm:$0xff]  }
 0x377   : > { %4415 = vperm.xlu0 %10032, %v4083_v33   ;;  %v4084_v11 = vadd.f32 %v4068_v13, %v12481_v27  ;;  %v12859_v25 = vadd.f32 %v4328_v15, %v12707_v46  ;;  %v4332_v30 = vpop.f32.mrb[80].mxu1  ;;  %v12867_v13 = vpop.f32.mrb[81].mxu0  ;;  %6726 = vmatprep.subr.bf16.mxu1 %v10555_v5  ;;  %v636_v0 = vld [vmem:[%s12674_s26 + $0x68] sm:$0xff] }
 0x378   : > { %14770 = vst [vmem:[#allocation10_spill] sm:$0xff] %v12847_v23  ;;  %14771 = vst [vmem:[#allocation11_spill] sm:$0xff] %v12855_v24  ;;  %v12865_v61 = vadd.f32 %v4332_v30, %v12702_v42  ;;  %v4334_v16 = vpop.f32.mrb[81].mxu1  ;;  %v634_v24 = vld [vmem:[%s12674_s26 + $0x58] sm:$0xff] }
 0x379   : > { %14772 = vst [vmem:[#allocation12_spill] sm:$0xff] %v12859_v25  ;;  %v12870_v50 = vadd.f32 %v4334_v16, %v12707_v46  ;;  %v4336_v25 = vpop.f32.mrb[82].mxu1 }
 0x37a   : > { %v4032_v14 = vpop.permute.xlu0 %4031  ;;  %4410 = vperm.xlu1 %10029, %v4082_v26   ;;  %14773 = vst [vmem:[#allocation13_spill] sm:$0xff] %v12865_v61  ;;  %v4338_v5 = vpop.f32.mrb[83].mxu1 }
 0x37b   : > { %v4069_v18 = vmul.f32 %v4032_v14, %v633_v57  ;;  %10034 = vset.pattern.permute.xlu0 %v14731_v12  ;;  %14774 = vst [vmem:[#allocation14_spill] sm:$0xff] %v12870_v50  ;;  %v635_v57 = vld [vmem:[%s12674_s26 + $0x60] sm:$0xff]  ;;  %v12893_v50 = vadd.f32 %v4338_v5, %v12707_v46 }
 0x37c   : > { %4655 = vperm.xlu0 %10034, %v4084_v11  }
 0x37d   : > { %v4085_v27 = vadd.f32 %v4069_v18, %v12489_v53  ;;  %v4034_v53 = vpop.permute.xlu1 %4033  ;;  %14776 = vst [vmem:[#allocation16_spill] sm:$0xff] %v12893_v50  ;;  %v14779_v50 = vmov 1  }
 0x37e   : > { %10031 = vset.pattern.permute.xlu1 %v14731_v12  ;;  %v12882_v12 = vpop.f32.mrb[82].mxu0 }
 0x37f   : > { %4647 = vperm.xlu1 %10031, %v4082_v26   ;;  %v10558_v26 = vld [vmem:[%s14727_s11 + $0x384] ss:$28 sps:$4 sm:$0xff]  }
 0x380   : > { %4659 = vperm.xlu0 %10034, %v4085_v27   ;;  %6500 = vmatprep.subr.bf16.mxu0 %v10558_v26 }
 0x382   : > { %v4036_v14 = vpop.permute.xlu0 %4035 }
 0x383   : > { %v4071_v18 = vmul.f32 %v4036_v14, %v635_v57  ;;  %4651 = vperm.xlu1 %10031, %v4083_v33   ;;  %v12887_v33 = vadd.f32 %v4336_v25, %v12702_v42  ;;  %v12889_v57 = vpop.f32.mrb[83].mxu0  ;;  %v637_v14 = vld [vmem:[%s12674_s26 + $0x70] sm:$0xff] }
 0x384   : > { %v4038_v15 = vpop.permute.xlu1 %4037  ;;  %10036 = vset.pattern.permute.xlu0 %v14733_v3 }
 0x385   : > { %v4087_v30 = vadd.f32 %v4071_v18, %v12505_v22  ;;  %v4072_v16 = vmul.f32 %v4038_v15, %v636_v0  ;;  %14775 = vst [vmem:[#allocation15_spill] sm:$0xff] %v12887_v33  ;;  %v12895_v22 = vpop.f32.mrb[84].mxu0  ;;  %v4342_v18 = vpop.f32.mrb[84].mxu1 }
 0x386   : > { %v12898_v0 = vadd.f32 %v4342_v18, %v12702_v42  ;;  %v12900_v15 = vpop.f32.mrb[85].mxu0  ;;  %v4344_v26 = vpop.f32.mrb[85].mxu1 }
 0x387   : > { %10033 = vset.pattern.permute.xlu1 %v14733_v3  ;;  %4435 = vperm.xlu0 %10036, %v4087_v30   ;;  %v4070_v3 = vmul.f32 %v4034_v53, %v634_v24  ;;  %v4088_v25 = vadd.f32 %v4072_v16, %v12513_v43  ;;  %v12904_v61 = vadd.f32 %v4344_v26, %v12707_v46  ;;  %v4346_v23 = vpop.f32.mrb[86].mxu1 }
 0x388   : > { %4420 = vperm.xlu1 %10033, %v4084_v11   ;;  %14777 = vst [vmem:[#allocation17_spill] sm:$0xff] %v12898_v0  ;;  %v12906_v11 = vpop.f32.mrb[86].mxu0  ;;  %v12912_v18 = vadd.f32 %v4346_v23, %v12702_v42  ;;  %v4348_v24 = vpop.f32.mrb[87].mxu1 }
 0x389   : > { %14778 = vst [vmem:[#allocation18_spill] sm:$0xff] %v12904_v61  ;;  %v12909_v63 = vpop.f32.mrb[87].mxu0  ;;  %v12916_v53 = vadd.f32 %v4348_v24, %v12707_v46  ;;  %v14784_v24 = vmov 0  }
 0x38a   : > { %v4040_v33 = vpop.permute.xlu0 %4039  ;;  %14780 = vst [vmem:[#allocation19_spill] sm:$0xff] %v12912_v18  ;;  %v12918_v16 = vpop.f32.mrb[88].mxu0 }
 0x38b   : > { %v4073_v5 = vmul.f32 %v4040_v33, %v637_v14  ;;  %10038 = vset.pattern.permute.xlu0 %v14779_v50  ;;  %14781 = vst [vmem:[#allocation20_spill] sm:$0xff] %v12916_v53  ;;  %v4352_v33 = vpop.f32.mrb[88].mxu1  ;;  %v4086_v14 = vadd.f32 %v4070_v3, %v12497_v59 }
 0x38c   : > { %4425 = vperm.xlu1 %10033, %v4085_v27   ;;  %4671 = vperm.xlu0 %10038, %v4088_v25   ;;  %v12922_v26 = vadd.f32 %v4352_v33, %v12702_v42  ;;  %v12924_v27 = vpop.f32.mrb[89].mxu0  ;;  %v4354_v61 = vpop.f32.mrb[89].mxu1 }
 0x38d   : > { %v4089_v43 = vadd.f32 %v4073_v5, %v12521_v51  ;;  %v12927_v23 = vadd.f32 %v4354_v61, %v12707_v46  ;;  %v638_v51 = vld [vmem:[%s12674_s26 + $0x78] sm:$0xff]  ;;  %v4042_v5 = vpop.permute.xlu1 %4041  ;;  %v12932_v3 = vpop.f32.mrb[90].mxu0 }
 0x38e   : > { %14782 = vst [vmem:[#allocation21_spill] sm:$0xff] %v12922_v26  ;;  %v4356_v59 = vpop.f32.mrb[90].mxu1  ;;  %v4074_v33 = vmul.f32 %v4042_v5, %v638_v51  ;;  %v12937_v61 = vpop.f32.mrb[91].mxu0 }
 0x38f   : > { %14783 = vst [vmem:[#allocation22_spill] sm:$0xff] %v12927_v23  ;;  %v12935_v53 = vadd.f32 %v4356_v59, %v12702_v42  ;;  %v4358_v18 = vpop.f32.mrb[91].mxu1 }
 0x390   : > { %4430 = vperm.xlu1 %10033, %v4086_v14   ;;  %4675 = vperm.xlu0 %10038, %v4089_v43   ;;  %v12940_v0 = vadd.f32 %v4358_v18, %v12707_v46 }
 0x391   : > { %14785 = vst [vmem:[#allocation23_spill] sm:$0xff] %v12935_v53 }
 0x392   : > { %14786 = vst [vmem:[#allocation24_spill] sm:$0xff] %v12940_v0 }
 0x394   : > { %10035 = vset.pattern.permute.xlu1 %v14779_v50 }
 0x395   : > { %4663 = vperm.xlu1 %10035, %v4086_v14   ;;  %v4362_v14 = vpop.f32.mrb[92].mxu1 }
 0x396   : > { %v4364_v51 = vpop.f32.mrb[93].mxu1 }
 0x397   : > { %v12951_v5 = vadd.f32 %v4364_v51, %v12707_v46  ;;  %v4366_v18 = vpop.f32.mrb[94].mxu1  ;;  %v14735_v51 = vsub.s32 5, %v12240_v36 }
 0x398   : > { %v4368_v53 = vpop.f32.mrb[95].mxu1 }
 0x399   : > { %4667 = vperm.xlu1 %10035, %v4087_v30   ;;  %v12942_v30 = vpop.f32.mrb[92].mxu0  ;;  %14788 = vst [vmem:[#allocation26_spill] sm:$0xff] %v12951_v5  ;;  %v4696_v5 = vsub.s32 7, %v12240_v36 }
 0x39a   : > { %v12948_v23 = vpop.f32.mrb[93].mxu0 }
 0x39b   : > { %v12953_v59 = vpop.f32.mrb[94].mxu0 }
 0x39c   : > { %v12958_v0 = vpop.f32.mrb[95].mxu0 }
 0x39d   : > { %10037 = vset.pattern.permute.xlu1 %v14784_v24  ;;  %v4090_v24 = vadd.f32 %v4074_v33, %v12529_v58  ;;  %v12962_v58 = vadd.f32 %v4368_v53, %v12707_v46  ;;  %v4371_v33 = vld [vmem:[%s14724_s8] sm:$0xf]  ;;  %v4100_v46 = vrot.slane %v12692_v19, %v12243_v37  ;;  %v12977_v53 = vrot.slane %v12692_v19, %v12252_v40 }
 0x39e   : > { %4440 = vperm.xlu1 %10037, %v4088_v25   ;;  %v12946_v25 = vadd.f32 %v4362_v14, %v12702_v42  ;;  %v4372_v14 = vunpack.c.l.bf16 %v4371_v33 }
 0x39f   : > { %14790 = vst [vmem:[#allocation28_spill] sm:$0xff] %v12962_v58  ;;  %v4180_v28 = vadd.f32 %v12627_v49, %v4100_v46 }
 0x3a0   : > { %14787 = vst [vmem:[#allocation25_spill] sm:$0xff] %v12946_v25  ;;  %v4697_v33 = vrot.slane %v4372_v14, %v4696_v5  ;;  %v4457_v58 = vrot.slane %v4372_v14, %v12243_v37  ;;  %v4182_v5 = vadd.f32 %v12632_v52, %v12977_v53  ;;  %v4184_v52 = vadd.f32 %v12738_v60, %v4100_v46 }
 0x3a1   : > { %v13036_v60 = vadd.f32 %v12813_v9, %v12977_v53  ;;  %v13060_v9 = vadd.f32 %v12861_v45, %v4100_v46 }
 0x3a2   : > { %4445 = vperm.xlu1 %10037, %v4089_v43   ;;  %v12956_v43 = vadd.f32 %v4366_v18, %v12702_v42  ;;  %v4461_v42 = vrot.slane %v4372_v14, %v12246_v38  ;;  %v14791_v18 = vsub.s32 4, %v12240_v36  ;;  %v13000_v38 = vrot.slane %v4697_v33, %v12252_v40 }
 0x3a3   : > { %v13083_v33 = vadd.f32 %v12906_v11, %v4100_v46  ;;  %v13099_v11 = vadd.f32 %v12924_v27, %v12977_v53  ;;  %v13115_v27 = vadd.f32 %v12948_v23, %v12977_v53 }
 0x3a4   : > { %14789 = vst [vmem:[#allocation27_spill] sm:$0xff] %v12956_v43  ;;  %v4685_v43 = vrot.slane %v4372_v14, %v12252_v40  ;;  %v4465_v25 = vrot.slane %v4372_v14, %v14791_v18  ;;  %v13003_v18 = vrot.slane %v4457_v58, %v12243_v37  ;;  %v13022_v58 = vadd.f32 %v12773_v29, %v12977_v53 }
 0x3a5   : > { %v13046_v29 = vadd.f32 %v12836_v48, %v4100_v46  ;;  %14797 = vst [vmem:[#allocation33_spill] sm:$0xff] %v13083_v33 }
 0x3a6   : > { %4450 = vperm.xlu1 %10037, %v4090_v24   ;;  %v12988_v32 = vrot.slane %v4685_v43, %v12252_v40  ;;  %v13009_v43 = vrot.slane %v4465_v25, %v12243_v37  ;;  %v13029_v25 = vadd.f32 %v12799_v55, %v12977_v53  ;;  %v13053_v55 = vadd.f32 %v12849_v17, %v4100_v46 }
 0x3a7   : > { %v13074_v17 = vadd.f32 %v12895_v22, %v4100_v46 }
 0x3a9   : > { %14795 = vst [vmem:[#allocation31_spill] sm:$0xff] %v13074_v17 }
 0x3aa   : > { %10039 = vset.pattern.permute.xlu1 %v14779_v50  ;;  %v4689_v50 = vrot.slane %v4372_v14, %v12255_v41  ;;  %v14792_v41 = vsub.s32 6, %v12240_v36 }
 0x3ab   : > { %4679 = vperm.xlu1 %10039, %v4090_v24   ;;  %v4693_v24 = vrot.slane %v4372_v14, %v14735_v51 }
 0x3ac   : > { %v4469_v26 = vrot.slane %v4372_v14, %v14792_v41  ;;  %v12991_v19 = vrot.slane %v4689_v50, %v12252_v40  ;;  %v13006_v41 = vrot.slane %v4461_v42, %v12243_v37  ;;  %v4186_v14 = vadd.f32 %v12747_v1, %v12977_v53 }
 0x3ad   : > { %v12997_v51 = vrot.slane %v4693_v24, %v12252_v40  ;;  %v13018_v50 = vadd.f32 %v12764_v20, %v4100_v46  ;;  %v13025_v42 = vadd.f32 %v12789_v39, %v4100_v46  ;;  %v13039_v1 = vadd.f32 %v12826_v4, %v4100_v46 }
 0x3ae   : > { %v13012_v49 = vrot.slane %v4469_v26, %v12243_v37  ;;  %v13032_v26 = vadd.f32 %v12807_v34, %v4100_v46  ;;  %v13043_v20 = vadd.f32 %v12831_v35, %v12977_v53  ;;  %v13050_v39 = vadd.f32 %v12843_v2, %v12977_v53 }
 0x3af   : > { %v13057_v34 = vadd.f32 %v12852_v21, %v12977_v53  ;;  %v13064_v4 = vadd.f32 %v12867_v13, %v12977_v53  ;;  %v13067_v24 = vadd.f32 %v12882_v12, %v4100_v46  ;;  %v13071_v2 = vadd.f32 %v12889_v57, %v12977_v53 }
 0x3b0   : > { %v13078_v21 = vadd.f32 %v12900_v15, %v12977_v53  ;;  %v13087_v12 = vadd.f32 %v12909_v63, %v12977_v53  ;;  %v13095_v37 = vadd.f32 %v12918_v16, %v4100_v46  ;;  %v13102_v63 = vadd.f32 %v12932_v3, %v4100_v46 }
 0x3b1   : > { %14793 = vst [vmem:[#allocation29_spill] sm:$0xff] %v13067_v24  ;;  %14794 = vst [vmem:[#allocation30_spill] sm:$0xff] %v13071_v2  ;;  %v13108_v24 = vadd.f32 %v12937_v61, %v12977_v53  ;;  %v13111_v16 = vadd.f32 %v12942_v30, %v4100_v46 }
 0x3b2   : > { %14796 = vst [vmem:[#allocation32_spill] sm:$0xff] %v13078_v21  ;;  %14798 = vst [vmem:[#allocation34_spill] sm:$0xff] %v13087_v12 }
 0x3d6   : > { %v4620_v35 = vpop.permute.xlu1 %4619  ;;  %v4376_v48 = vpop.permute.xlu0 %4375 }
 0x3d7   : > { %v4720_v45 = vmul.f32 %v12997_v51, %v4620_v35  ;;  %v4721_v13 = vmul.f32 %v13000_v38, %v4620_v35  ;;  %v4490_v57 = vmul.f32 %v13003_v18, %v4376_v48  ;;  %v4491_v22 = vmul.f32 %v13006_v41, %v4376_v48 }
 0x3d8   : > { %v4492_v36 = vmul.f32 %v13009_v43, %v4376_v48  ;;  %v4493_v15 = vmul.f32 %v13012_v49, %v4376_v48  ;;  %v4718_v40 = vmul.f32 %v12988_v32, %v4620_v35 }
 0x3d9   : > { %v4554_v12 = vadd.f32 %v4490_v57, %v4180_v28  ;;  %v4555_v33 = vadd.f32 %v4491_v22, %v4182_v5  ;;  %v13118_v28 = vadd.f32 %v12953_v59, %v4100_v46  ;;  %v13132_v46 = vadd.f32 %v12958_v0, %v12977_v53 }
 0x3da   : > { %v4556_v21 = vadd.f32 %v4492_v36, %v12717_v56  ;;  %v4557_v17 = vadd.f32 %v4493_v15, %v12727_v47  ;;  %v4719_v36 = vmul.f32 %v12991_v19, %v4620_v35 }
 0x3db   : > { %v4381_v2 = vpop.permute.xlu1 %4380  ;;  %v4624_v48 = vpop.permute.xlu0 %4623  ;;  %14799 = vst [vmem:[#allocation35_spill] sm:$0xff] %v13118_v28  ;;  %v4782_v56 = vadd.f32 %v4718_v40, %v4554_v12  ;;  %14800 = vst [vmem:[#allocation36_spill] sm:$0xff] %v13132_v46  ;;  %v14828_v28 = vld [vmem:[#allocation15_spill] sm:$0xff] }
 0x3dc   : > { %v4784_v47 = vadd.f32 %v4720_v45, %v4556_v21  ;;  %v13121_v3 = vadd.f32 %v4721_v13, %v4557_v17  ;;  %v4494_v5 = vmul.f32 %v13003_v18, %v4381_v2  ;;  %v4495_v61 = vmul.f32 %v13006_v41, %v4381_v2 }
 0x3dd   : > { %v4496_v30 = vmul.f32 %v13009_v43, %v4381_v2  ;;  %v4497_v57 = vmul.f32 %v13012_v49, %v4381_v2  ;;  %v13127_v22 = vadd.f32 %v4719_v36, %v4555_v33  ;;  %v4846_v23 = vmax.f32 %v4782_v56, 0.0 }
 0x3de   : > { %v4722_v59 = vmul.f32 %v12988_v32, %v4624_v48  ;;  %v4558_v40 = vadd.f32 %v4494_v5, %v4184_v52  ;;  %v4559_v35 = vadd.f32 %v4495_v61, %v4186_v14  ;;  %v4724_v13 = vmul.f32 %v12997_v51, %v4624_v48 }
 0x3df   : > { %v4560_v17 = vadd.f32 %v4496_v30, %v12751_v6  ;;  %v4561_v21 = vadd.f32 %v4497_v57, %v12754_v8  ;;  %v4386_v45 = vpop.permute.xlu1 %4385  ;;  %v4725_v2 = vmul.f32 %v13000_v38, %v4624_v48  ;;  %v4723_v15 = vmul.f32 %v12991_v19, %v4624_v48  ;;  %v4628_v52 = vpop.permute.xlu0 %4627 }
 0x3e0   : > { %v4498_v33 = vmul.f32 %v13003_v18, %v4386_v45  ;;  %v4499_v12 = vmul.f32 %v13006_v41, %v4386_v45  ;;  %v4786_v36 = vadd.f32 %v4722_v59, %v4558_v40  ;;  %v4500_v0 = vmul.f32 %v13009_v43, %v4386_v45 }
 0x3e1   : > { %v4501_v53 = vmul.f32 %v13012_v49, %v4386_v45  ;;  %v4788_v6 = vadd.f32 %v4724_v13, %v4560_v17  ;;  %v13143_v14 = vadd.f32 %v4725_v2, %v4561_v21  ;;  %v4848_v5 = vmax.f32 %v4784_v47, 0.0 }
 0x3e2   : > { %v4562_v8 = vadd.f32 %v4498_v33, %v13018_v50  ;;  %v4563_v56 = vadd.f32 %v4499_v12, %v13022_v58  ;;  %v4850_v61 = vmax.f32 %v4786_v36, 0.0  ;;  %v4564_v30 = vadd.f32 %v4500_v0, %v12777_v31 }
 0x3e3   : > { %v4565_v57 = vadd.f32 %v4501_v53, %v12781_v44  ;;  %v4391_v48 = vpop.permute.xlu1 %4390  ;;  %v4787_v59 = vadd.f32 %v4723_v15, %v4559_v35  ;;  %v4852_v40 = vmax.f32 %v4788_v6, 0.0  ;;  %v4726_v46 = vmul.f32 %v12988_v32, %v4628_v52 }
 0x3e4   : > { %v4727_v45 = vmul.f32 %v12991_v19, %v4628_v52  ;;  %v13151_v17 = vpack.c.bf16 %v4850_v61, %v4846_v23  ;;  %v4728_v21 = vmul.f32 %v12997_v51, %v4628_v52  ;;  %v4729_v50 = vmul.f32 %v13000_v38, %v4628_v52 }
 0x3e5   : > { %v4502_v58 = vmul.f32 %v13003_v18, %v4391_v48  ;;  %v13156_v47 = vpack.c.bf16 %v4852_v40, %v4848_v5  ;;  %v13158_v31 = vadd.f32 %v4726_v46, %v4562_v8  ;;  %v4503_v35 = vmul.f32 %v13006_v41, %v4391_v48 }
 0x3e6   : > { %14801 = vst [vmem:[#allocation37_spill] sm:$0xff] %v13151_v17  ;;  %v13160_v44 = vadd.f32 %v4727_v45, %v4563_v56  ;;  %v4396_v13 = vpop.permute.xlu0 %4395  ;;  %v13163_v2 = vadd.f32 %v4728_v21, %v4564_v30  ;;  %v13165_v33 = vadd.f32 %v4729_v50, %v4565_v57  ;;  %v4504_v23 = vmul.f32 %v13009_v43, %v4391_v48  ;;  %v10553_v50 = vld [vmem:[%s14727_s11 + $0x388] ss:$28 sps:$4 sm:$0xff]  }
 0x3e7   : > { %14802 = vst [vmem:[#allocation38_spill] sm:$0xff] %v13156_v47  ;;  %v4505_v12 = vmul.f32 %v13012_v49, %v4391_v48  ;;  %v4851_v15 = vmax.f32 %v4787_v59, 0.0  ;;  %v4566_v52 = vadd.f32 %v4502_v58, %v13025_v42  ;;  %v4567_v6 = vadd.f32 %v4503_v35, %v13029_v25  ;;  %v10556_v58 = vld [vmem:[%s14727_s11 + $0x380] ss:$28 sps:$4 sm:$0xff]  }
 0x3e8   : > { %v4632_v53 = vpop.permute.xlu1 %4631  ;;  %v4568_v8 = vadd.f32 %v4504_v23, %v12802_v62  ;;  %v4847_v5 = vmax.f32 %v13127_v22, 0.0  ;;  %v4506_v61 = vmul.f32 %v13003_v18, %v4396_v13  ;;  %v4507_v30 = vmul.f32 %v13006_v41, %v4396_v13 }
 0x3e9   : > { %v4569_v56 = vadd.f32 %v4505_v12, %v12805_v54  ;;  %v4508_v57 = vmul.f32 %v13009_v43, %v4396_v13  ;;  %v4509_v48 = vmul.f32 %v13012_v49, %v4396_v13  ;;  %v4730_v59 = vmul.f32 %v12988_v32, %v4632_v53 }
 0x3ea   : > { %v4731_v42 = vmul.f32 %v12991_v19, %v4632_v53  ;;  %v4732_v25 = vmul.f32 %v12997_v51, %v4632_v53  ;;  %v13185_v54 = vpack.c.bf16 %v4851_v15, %v4847_v5  ;;  %v4570_v22 = vadd.f32 %v4506_v61, %v13032_v26  ;;  %v10561_v26 = vld [vmem:[%s14727_s11 + $0x3c4] ss:$28 sps:$4 sm:$0xff]  }
 0x3eb   : > { %v4640_v40 = vpop.permute.xlu0 %4639  ;;  %v4572_v45 = vadd.f32 %v4508_v57, %v12811_v7  ;;  %v4573_v35 = vadd.f32 %v4509_v48, %v12817_v10  ;;  %v4733_v13 = vmul.f32 %v13000_v38, %v4632_v53  ;;  %v4794_v23 = vadd.f32 %v4730_v59, %v4566_v52  ;;  %v10564_v7 = vld [vmem:[%s14727_s11 + $0x3bc] ss:$28 sps:$4 sm:$0xff]  }
 0x3ec   : > { %14803 = vst [vmem:[#allocation39_spill] sm:$0xff] %v13185_v54  ;;  %v4636_v21 = vpop.permute.xlu1 %4635  ;;  %v4795_v12 = vadd.f32 %v4731_v42, %v4567_v6  ;;  %6419 = vmatprep.mubr.bf16.mxu0 %v13185_v54  ;;  %6645 = vmatprep.mubr.bf16.mxu1 %v13185_v54  ;;  %v4571_v10 = vadd.f32 %v4507_v30, %v13036_v60  ;;  %v10562_v42 = vld [vmem:[%s14727_s11 + $0x3b8] ss:$28 sps:$4 sm:$0xff]  }
 0x3ed   : > { %v13207_v5 = vadd.f32 %v4732_v25, %v4568_v8  ;;  %v4738_v53 = vmul.f32 %v12988_v32, %v4640_v40  ;;  %6420 = vmatmul.mubr.bf16.vlgmr.msra.gmra.mrb[96].mxu0 %v13151_v17  ;;  %6646 = vmatmul.mubr.bf16.vlgmr.msra.gmra.mrb[96].mxu1 %v13151_v17  ;;  %v13212_v52 = vadd.f32 %v4733_v13, %v4569_v56  ;;  %v4858_v59 = vmax.f32 %v4794_v23, 0.0  ;;  %v10559_v56 = vld [vmem:[%s14727_s11 + $0x3c0] ss:$28 sps:$4 sm:$0xff]  }
 0x3ee   : > { %v4739_v6 = vmul.f32 %v12991_v19, %v4640_v40  ;;  %v4740_v61 = vmul.f32 %v12997_v51, %v4640_v40  ;;  %v4741_v60 = vmul.f32 %v13000_v38, %v4640_v40  ;;  %v4734_v8 = vmul.f32 %v12988_v32, %v4636_v21  ;;  %6727 = vmatpush1.bf16.msra.mxu1 %v10553_v50  ;;  %v10567_v50 = vld [vmem:[%s14727_s11 + $0x3fc] ss:$28 sps:$4 sm:$0xff]  }
 0x3ef   : > { %v4644_v57 = vpop.permute.xlu0 %4643  ;;  %v4735_v30 = vmul.f32 %v12991_v19, %v4636_v21  ;;  %6501 = vmatpush1.bf16.msra.mxu0 %v10556_v58  ;;  %v4859_v25 = vmax.f32 %v4795_v12, 0.0  ;;  %v4736_v23 = vmul.f32 %v12997_v51, %v4636_v21  ;;  %v4737_v40 = vmul.f32 %v13000_v38, %v4636_v21  ;;  %6728 = vmatprep.subr.bf16.mxu1 %v10561_v26  ;;  %v10570_v58 = vld [vmem:[%s14727_s11 + $0x3f4] ss:$28 sps:$4 sm:$0xff]  }
 0x3f0   : > { %6502 = vmatprep.subr.bf16.mxu0 %v10564_v7  ;;  %v13235_v15 = vadd.f32 %v4734_v8, %v4570_v22  ;;  %v4742_v13 = vmul.f32 %v12988_v32, %v4644_v57  ;;  %v4744_v36 = vmul.f32 %v12997_v51, %v4644_v57  ;;  %v4745_v7 = vmul.f32 %v13000_v38, %v4644_v57 }
 0x3f1   : > { %v4401_v62 = vpop.permute.xlu1 %4400  ;;  %v13237_v12 = vadd.f32 %v4735_v30, %v4571_v10  ;;  %v13241_v21 = vadd.f32 %v4736_v23, %v4572_v45  ;;  %v13243_v26 = vadd.f32 %v4737_v40, %v4573_v35  ;;  %v4743_v46 = vmul.f32 %v12991_v19, %v4644_v57  ;;  %v14804_v57 = vld [vmem:[#allocation7_spill] sm:$0xff] }
 0x3f2   : > { %v4510_v48 = vmul.f32 %v13003_v18, %v4401_v62  ;;  %v4511_v22 = vmul.f32 %v13006_v41, %v4401_v62  ;;  %v4512_v10 = vmul.f32 %v13009_v43, %v4401_v62  ;;  %6729 = vmatpush1.bf16.msra.mxu1 %v10559_v56  ;;  %v4862_v8 = vmax.f32 %v13235_v15, 0.0 }
 0x3f3   : > { %6503 = vmatpush1.bf16.msra.mxu0 %v10562_v42  ;;  %v4513_v35 = vmul.f32 %v13012_v49, %v4401_v62  ;;  %6730 = vmatprep.subr.bf16.mxu1 %v10567_v50  ;;  %v14805_v17 = vmax.f32 %v13160_v44, 0.0  ;;  %v14807_v56 = vmax.f32 %v13158_v31, 0.0  ;;  %v14809_v62 = vld [vmem:[#allocation8_spill] sm:$0xff] }
 0x3f4   : > { %v4574_v30 = vadd.f32 %v4510_v48, %v13039_v1  ;;  %6504 = vmatprep.subr.bf16.mxu0 %v10570_v58  ;;  %v4575_v40 = vadd.f32 %v4511_v22, %v13043_v20  ;;  %v4576_v0 = vadd.f32 %v4512_v10, %v14804_v57  ;;  %v10565_v1 = vld [vmem:[%s14727_s11 + $0x3f8] ss:$28 sps:$4 sm:$0xff]  }
 0x3f5   : > { %v4406_v23 = vpop.permute.xlu1 %4405  ;;  %v13259_v54 = vpack.c.bf16 %v4859_v25, %v14805_v17  ;;  %v13263_v42 = vpack.c.bf16 %v4858_v59, %v14807_v56  ;;  %v4577_v48 = vadd.f32 %v4513_v35, %v14809_v62  ;;  %v10568_v17 = vld [vmem:[%s14727_s11 + $0x3f0] ss:$28 sps:$4 sm:$0xff]  }
 0x3f6   : > { %v4416_v45 = vpop.permute.xlu0 %4415  ;;  %v13269_v50 = vadd.f32 %v4738_v53, %v4574_v30  ;;  %v4514_v20 = vmul.f32 %v13003_v18, %v4406_v23  ;;  %v4515_v58 = vmul.f32 %v13006_v41, %v4406_v23  ;;  %v13277_v44 = vadd.f32 %v4739_v6, %v4575_v40  ;;  %v10573_v25 = vld [vmem:[%s14727_s11 + $0x434] ss:$28 sps:$4 sm:$0xff]   ;;  %v10576_v35 = vld [vmem:[%s14727_s11 + $0x42c] ss:$28 sps:$4 sm:$0xff]   ;;  %v14810_v40 = vld [vmem:[#allocation9_spill] sm:$0xff]  ;;  %6731 = vmatpush1.bf16.msra.mxu1 %v10565_v1 }
 0x3f7   : > { %14806 = vst [vmem:[#allocation7_spill] sm:$0xff] %v13259_v54  ;;  %14808 = vst [vmem:[#allocation40_spill] sm:$0xff] %v13263_v42  ;;  %v13279_v59 = vadd.f32 %v4740_v61, %v4576_v0  ;;  %6429 = vmatprep.mubr.bf16.mxu0 %v13259_v54  ;;  %6655 = vmatprep.mubr.bf16.mxu1 %v13259_v54  ;;  %v4516_v53 = vmul.f32 %v13009_v43, %v4406_v23 }
 0x3f8   : > { %v13287_v22 = vadd.f32 %v4741_v60, %v4577_v48  ;;  %6430 = vmatmul.mubr.bf16.gmra.mrb[100].mxu0 %v13263_v42  ;;  %6656 = vmatmul.mubr.bf16.gmra.mrb[100].mxu1 %v13263_v42  ;;  %v4517_v6 = vmul.f32 %v13012_v49, %v4406_v23  ;;  %v4578_v0 = vadd.f32 %v4514_v20, %v13046_v29  ;;  %v4866_v10 = vmax.f32 %v13269_v50, 0.0  ;;  %v10571_v29 = vld [vmem:[%s14727_s11 + $0x430] ss:$28 sps:$4 sm:$0xff]   ;;  %v14811_v23 = vld [vmem:[#allocation10_spill] sm:$0xff] }
 0x3f9   : > { %v4411_v61 = vpop.permute.xlu1 %4410  ;;  %v4579_v30 = vadd.f32 %v4515_v58, %v13050_v39  ;;  %v4580_v60 = vadd.f32 %v4516_v53, %v14810_v40  ;;  %v4522_v57 = vmul.f32 %v13003_v18, %v4416_v45  ;;  %v4523_v56 = vmul.f32 %v13006_v41, %v4416_v45  ;;  %6505 = vmatpush1.bf16.msra.mxu0 %v10568_v17  ;;  %v10574_v58 = vld [vmem:[%s14727_s11 + $0x428] ss:$28 sps:$4 sm:$0xff]  }
 0x3fa   : > { %v4581_v62 = vadd.f32 %v4517_v6, %v14811_v23  ;;  %v13305_v48 = vadd.f32 %v4742_v13, %v4578_v0  ;;  %v4524_v50 = vmul.f32 %v13009_v43, %v4416_v45  ;;  %v4525_v20 = vmul.f32 %v13012_v49, %v4416_v45  ;;  %6732 = vmatprep.subr.bf16.mxu1 %v10573_v25  ;;  %v10579_v45 = vld [vmem:[%s14727_s11 + $0x46c] ss:$28 sps:$4 sm:$0xff]   ;;  %v10582_v17 = vld [vmem:[%s14727_s11 + $0x464] ss:$28 sps:$4 sm:$0xff]  }
 0x3fb   : > { %v4656_v39 = vpop.permute.xlu0 %4655  ;;  %v13312_v53 = vadd.f32 %v4743_v46, %v4579_v30  ;;  %v13314_v1 = vadd.f32 %v4744_v36, %v4580_v60  ;;  %v13317_v40 = vadd.f32 %v4522_v57, %v13060_v9  ;;  %v13320_v13 = vadd.f32 %v4523_v56, %v13064_v4  ;;  %v14812_v46 = vld [vmem:[#allocation13_spill] sm:$0xff]  ;;  %v14813_v0 = vld [vmem:[#allocation14_spill] sm:$0xff]  ;;  %6506 = vmatprep.subr.bf16.mxu0 %v10576_v35 }
 0x3fc   : > { %v13328_v6 = vadd.f32 %v4745_v7, %v4581_v62  ;;  %v13331_v36 = vadd.f32 %v4524_v50, %v14812_v46  ;;  %v13334_v9 = vadd.f32 %v4525_v20, %v14813_v0  ;;  %v4518_v4 = vmul.f32 %v13003_v18, %v4411_v61  ;;  %6733 = vmatpush1.bf16.msra.mxu1 %v10571_v29  ;;  %v10577_v56 = vld [vmem:[%s14727_s11 + $0x468] ss:$28 sps:$4 sm:$0xff]   ;;  %v10580_v29 = vld [vmem:[%s14727_s11 + $0x460] ss:$28 sps:$4 sm:$0xff]  }
 0x3fd   : > { %v4519_v25 = vmul.f32 %v13006_v41, %v4411_v61  ;;  %v4520_v30 = vmul.f32 %v13009_v43, %v4411_v61  ;;  %v4521_v60 = vmul.f32 %v13012_v49, %v4411_v61  ;;  %v13341_v57 = vmul.f32 %v12988_v32, %v4656_v39  ;;  %6507 = vmatpush1.bf16.msra.mxu0 %v10574_v58  ;;  %v14814_v46 = vld [vmem:[#allocation11_spill] sm:$0xff] }
 0x3fe   : > { %v4648_v7 = vpop.permute.xlu1 %4647  ;;  %v4582_v23 = vadd.f32 %v4518_v4, %v13053_v55  ;;  %v13348_v62 = vmul.f32 %v12991_v19, %v4656_v39  ;;  %v13351_v35 = vmul.f32 %v12997_v51, %v4656_v39  ;;  %v13354_v50 = vmul.f32 %v13000_v38, %v4656_v39  ;;  %v14815_v55 = vld [vmem:[#allocation12_spill] sm:$0xff]  ;;  %6734 = vmatprep.subr.bf16.mxu1 %v10579_v45 }
 0x3ff   : > { %v4660_v61 = vpop.permute.xlu0 %4659  ;;  %v4583_v20 = vadd.f32 %v4519_v25, %v13057_v34  ;;  %v4584_v0 = vadd.f32 %v4520_v30, %v14814_v46  ;;  %v4585_v4 = vadd.f32 %v4521_v60, %v14815_v55  ;;  %v4867_v31 = vmax.f32 %v13277_v44, 0.0  ;;  %6508 = vmatprep.subr.bf16.mxu0 %v10582_v17 }
 0x400   : > { %v13365_v39 = vpack.c.bf16 %v4866_v10, %v4862_v8  ;;  %v4746_v58 = vmul.f32 %v12988_v32, %v4648_v7  ;;  %v4747_v42 = vmul.f32 %v12991_v19, %v4648_v7  ;;  %v4748_v54 = vmul.f32 %v12997_v51, %v4648_v7  ;;  %6735 = vmatpush1.bf16.msra.mxu1 %v10577_v56  ;;  %v10585_v8 = vld [vmem:[%s14727_s11 + $0x4a4] ss:$28 sps:$4 sm:$0xff]  }
 0x401   : > { %v14817_v34 = vmax.f32 %v13237_v12, 0.0  ;;  %v4749_v30 = vmul.f32 %v13000_v38, %v4648_v7  ;;  %v13376_v44 = vmul.f32 %v12988_v32, %v4660_v61  ;;  %v13379_v45 = vmul.f32 %v12991_v19, %v4660_v61  ;;  %v10588_v12 = vld [vmem:[%s14727_s11 + $0x49c] ss:$28 sps:$4 sm:$0xff]   ;;  %6509 = vmatpush1.bf16.msra.mxu0 %v10580_v29  ;;  %6736 = vmatprep.subr.bf16.mxu1 %v10585_v8 }
 0x402   : > { %14816 = vst [vmem:[#allocation8_spill] sm:$0xff] %v13365_v39  ;;  %v4652_v15 = vpop.permute.xlu1 %4651  ;;  %v4811_v10 = vadd.f32 %v4747_v42, %v4583_v20  ;;  %v13389_v17 = vadd.f32 %v4748_v54, %v4584_v0  ;;  %v13392_v60 = vmul.f32 %v12997_v51, %v4660_v61  ;;  %v10583_v7 = vld [vmem:[%s14727_s11 + $0x4a0] ss:$28 sps:$4 sm:$0xff]   ;;  %v13403_v42 = vmul.f32 %v13000_v38, %v4660_v61 }
 0x403   : > { %v13372_v25 = vpack.c.bf16 %v4867_v31, %v14817_v34  ;;  %v13387_v31 = vadd.f32 %v4746_v58, %v4582_v23  ;;  %v13400_v46 = vadd.f32 %v4749_v30, %v4585_v4  ;;  %v4750_v54 = vmul.f32 %v12988_v32, %v4652_v15  ;;  %v10586_v23 = vld [vmem:[%s14727_s11 + $0x498] ss:$28 sps:$4 sm:$0xff]   ;;  %6510 = vmatprep.subr.bf16.mxu0 %v10588_v12 }
 0x404   : > { %14819 = vst [vmem:[#allocation10_spill] sm:$0xff] %v13389_v17  ;;  %v10591_v29 = vld [vmem:[%s14727_s11 + $0x4dc] ss:$28 sps:$4 sm:$0xff]   ;;  %v4875_v0 = vmax.f32 %v4811_v10, 0.0  ;;  %v4751_v61 = vmul.f32 %v12991_v19, %v4652_v15  ;;  %v4871_v55 = vmax.f32 %v13312_v53, 0.0  ;;  %v4752_v34 = vmul.f32 %v12997_v51, %v4652_v15  ;;  %6737 = vmatpush1.bf16.msra.mxu1 %v10583_v7  ;;  %v14829_v17 = vld [vmem:[#allocation16_spill] sm:$0xff] }
 0x405   : > { %14818 = vst [vmem:[#allocation9_spill] sm:$0xff] %v13372_v25  ;;  %6439 = vmatprep.mubr.bf16.mxu0 %v13372_v25  ;;  %6665 = vmatprep.mubr.bf16.mxu1 %v13372_v25  ;;  %14820 = vst [vmem:[#allocation13_spill] sm:$0xff] %v13400_v46  ;;  %v4874_v20 = vmax.f32 %v13387_v31, 0.0  ;;  %v10594_v4 = vld [vmem:[%s14727_s11 + $0x4d4] ss:$28 sps:$4 sm:$0xff]   ;;  %v4753_v30 = vmul.f32 %v13000_v38, %v4652_v15  ;;  %v13424_v56 = vadd.f32 %v4750_v54, %v13317_v40 }
 0x406   : > { %6440 = vmatmul.mubr.bf16.gmra.mrb[104].mxu0 %v13365_v39  ;;  %6666 = vmatmul.mubr.bf16.gmra.mrb[104].mxu1 %v13365_v39  ;;  %v4436_v39 = vpop.permute.xlu0 %4435  ;;  %v13427_v31 = vadd.f32 %v4751_v61, %v13320_v13  ;;  %v10589_v15 = vld [vmem:[%s14727_s11 + $0x4d8] ss:$28 sps:$4 sm:$0xff]   ;;  %v13437_v8 = vadd.f32 %v4752_v34, %v13331_v36  ;;  %v10592_v7 = vld [vmem:[%s14727_s11 + $0x4d0] ss:$28 sps:$4 sm:$0xff]  }
 0x407   : > { %v4538_v53 = vmul.f32 %v13003_v18, %v4436_v39  ;;  %v4539_v10 = vmul.f32 %v13006_v41, %v4436_v39  ;;  %v4540_v25 = vmul.f32 %v13009_v43, %v4436_v39  ;;  %v4421_v58 = vpop.permute.xlu1 %4420  ;;  %v13440_v13 = vadd.f32 %v4753_v30, %v13334_v9  ;;  %6511 = vmatpush1.bf16.msra.mxu0 %v10586_v23  ;;  %v10597_v54 = vld [vmem:[%s14727_s11 + $0x514] ss:$28 sps:$4 sm:$0xff]   ;;  %v14823_v9 = vld [vmem:[#allocation21_spill] sm:$0xff]  ;;  %v10600_v36 = vld [vmem:[%s14727_s11 + $0x50c] ss:$28 sps:$4 sm:$0xff]  }
 0x408   : > { %14821 = vst [vmem:[#allocation14_spill] sm:$0xff] %v13437_v8  ;;  %v4541_v12 = vmul.f32 %v13012_v49, %v4436_v39  ;;  %6738 = vmatprep.subr.bf16.mxu1 %v10591_v29  ;;  %6512 = vmatprep.subr.bf16.mxu0 %v10594_v4  ;;  %v14824_v29 = vld [vmem:[#allocation22_spill] sm:$0xff]  ;;  %v4526_v47 = vmul.f32 %v13003_v18, %v4421_v58  ;;  %v4870_v39 = vmax.f32 %v13305_v48, 0.0 }
 0x409   : > { %14822 = vst [vmem:[#allocation11_spill] sm:$0xff] %v13440_v13  ;;  %v13452_v34 = vadd.f32 %v4538_v53, %v13095_v37  ;;  %v13455_v30 = vadd.f32 %v4540_v25, %v14823_v9  ;;  %v13459_v23 = vadd.f32 %v4539_v10, %v13099_v11  ;;  %v4527_v37 = vmul.f32 %v13006_v41, %v4421_v58  ;;  %v10595_v10 = vld [vmem:[%s14727_s11 + $0x510] ss:$28 sps:$4 sm:$0xff]  }
 0x40a   : > { %v13462_v40 = vadd.f32 %v4541_v12, %v14824_v29  ;;  %v4528_v25 = vmul.f32 %v13009_v43, %v4421_v58  ;;  %v4529_v4 = vmul.f32 %v13012_v49, %v4421_v58  ;;  %v13471_v53 = vpack.c.bf16 %v4875_v0, %v4871_v55  ;;  %6739 = vmatpush1.bf16.msra.mxu1 %v10589_v15  ;;  %v14826_v12 = vld [vmem:[#allocation29_spill] sm:$0xff]  ;;  %v14827_v55 = vld [vmem:[#allocation30_spill] sm:$0xff] }
 0x40b   : > { %v4426_v9 = vpop.permute.xlu1 %4425  ;;  %v4672_v11 = vpop.permute.xlu0 %4671  ;;  %v4590_v29 = vadd.f32 %v4526_v47, %v14826_v12  ;;  %6513 = vmatpush1.bf16.msra.mxu0 %v10592_v7  ;;  %6740 = vmatprep.subr.bf16.mxu1 %v10597_v54  ;;  %v4591_v58 = vadd.f32 %v4527_v37, %v14827_v55  ;;  %v10598_v47 = vld [vmem:[%s14727_s11 + $0x508] ss:$28 sps:$4 sm:$0xff]   ;;  %v13490_v7 = vpack.c.bf16 %v4874_v20, %v4870_v39  ;;  %v14833_v12 = vld [vmem:[#allocation17_spill] sm:$0xff] }
 0x40c   : > { %14825 = vst [vmem:[#allocation12_spill] sm:$0xff] %v13471_v53  ;;  %v4530_v61 = vmul.f32 %v13003_v18, %v4426_v9  ;;  %v4531_v8 = vmul.f32 %v13006_v41, %v4426_v9  ;;  %v4592_v15 = vadd.f32 %v4528_v25, %v14828_v28  ;;  %v4593_v46 = vadd.f32 %v4529_v4, %v14829_v17  ;;  %v10603_v28 = vld [vmem:[%s14727_s11 + $0x54c] ss:$28 sps:$4 sm:$0xff]   ;;  %v14840_v0 = vld [vmem:[#allocation34_spill] sm:$0xff] }
 0x40d   : > { %6449 = vmatprep.mubr.bf16.mxu0 %v13471_v53  ;;  %6675 = vmatprep.mubr.bf16.mxu1 %v13471_v53  ;;  %v4818_v48 = vadd.f32 %v13341_v57, %v4590_v29  ;;  %14830 = vst [vmem:[#allocation21_spill] sm:$0xff] %v13490_v7  ;;  %v4532_v54 = vmul.f32 %v13009_v43, %v4426_v9  ;;  %v14831_v57 = vld [vmem:[#allocation31_spill] sm:$0xff]  ;;  %v14834_v29 = vld [vmem:[#allocation18_spill] sm:$0xff]  ;;  %v14842_v53 = vld [vmem:[#allocation20_spill] sm:$0xff] }
 0x40e   : > { %v4533_v37 = vmul.f32 %v13012_v49, %v4426_v9  ;;  %6514 = vmatprep.subr.bf16.mxu0 %v10600_v36  ;;  %v4819_v17 = vadd.f32 %v13348_v62, %v4591_v58  ;;  %v13499_v25 = vadd.f32 %v13351_v35, %v4592_v15  ;;  %v13502_v4 = vadd.f32 %v13354_v50, %v4593_v46  ;;  %v10606_v36 = vld [vmem:[%s14727_s11 + $0x544] ss:$28 sps:$4 sm:$0xff]   ;;  %v14832_v9 = vld [vmem:[#allocation32_spill] sm:$0xff]  ;;  %v14841_v46 = vld [vmem:[#allocation19_spill] sm:$0xff] }
 0x40f   : > { %v4594_v20 = vadd.f32 %v4530_v61, %v14831_v57  ;;  %v4431_v39 = vpop.permute.xlu1 %4430  ;;  %6741 = vmatpush1.bf16.msra.mxu1 %v10595_v10  ;;  %6450 = vmatmul.mubr.bf16.gmra.mrb[108].mxu0 %v13490_v7  ;;  %v4595_v62 = vadd.f32 %v4531_v8, %v14832_v9  ;;  %v4596_v35 = vadd.f32 %v4532_v54, %v14833_v12  ;;  %v10601_v50 = vld [vmem:[%s14727_s11 + $0x548] ss:$28 sps:$4 sm:$0xff]   ;;  %v4676_v8 = vpop.permute.xlu0 %4675  ;;  %v4882_v15 = vmax.f32 %v4818_v48, 0.0  ;;  %v10604_v54 = vld [vmem:[%s14727_s11 + $0x540] ss:$28 sps:$4 sm:$0xff]  }
 0x410   : > { %6676 = vmatmul.mubr.bf16.gmra.mrb[108].mxu1 %v13490_v7  ;;  %v4597_v55 = vadd.f32 %v4533_v37, %v14834_v29  ;;  %v13521_v10 = vmul.f32 %v12988_v32, %v4672_v11  ;;  %v13524_v58 = vmul.f32 %v12997_v51, %v4672_v11  ;;  %6515 = vmatpush1.bf16.msra.mxu0 %v10598_v47  ;;  %v10609_v47 = vld [vmem:[%s14727_s11 + $0x584] ss:$28 sps:$4 sm:$0xff]   ;;  %v10612_v48 = vld [vmem:[%s14727_s11 + $0x57c] ss:$28 sps:$4 sm:$0xff]   ;;  %v4883_v13 = vmax.f32 %v4819_v17, 0.0 }
 0x411   : > { %v13518_v61 = vadd.f32 %v13376_v44, %v4594_v20  ;;  %v13530_v37 = vadd.f32 %v13379_v45, %v4595_v62  ;;  %v13533_v57 = vadd.f32 %v13392_v60, %v4596_v35  ;;  %v13539_v20 = vmul.f32 %v12991_v19, %v4672_v11  ;;  %6742 = vmatprep.subr.bf16.mxu1 %v10603_v28 }
 0x412   : > { %v13536_v44 = vadd.f32 %v13403_v42, %v4597_v55  ;;  %v4534_v45 = vmul.f32 %v13003_v18, %v4431_v39  ;;  %v4535_v60 = vmul.f32 %v13006_v41, %v4431_v39  ;;  %v4536_v9 = vmul.f32 %v13009_v43, %v4431_v39  ;;  %6516 = vmatprep.subr.bf16.mxu0 %v10606_v36  ;;  %v10607_v55 = vld [vmem:[%s14727_s11 + $0x580] ss:$28 sps:$4 sm:$0xff]  }
 0x413   : > { %14835 = vst [vmem:[#allocation22_spill] sm:$0xff] %v13533_v57  ;;  %v4537_v42 = vmul.f32 %v13012_v49, %v4431_v39  ;;  %v13552_v62 = vmul.f32 %v13000_v38, %v4672_v11  ;;  %v13555_v28 = vmul.f32 %v12988_v32, %v4676_v8  ;;  %v13558_v12 = vmul.f32 %v12991_v19, %v4676_v8  ;;  %v14839_v39 = vld [vmem:[#allocation33_spill] sm:$0xff] }
 0x414   : > { %14836 = vst [vmem:[#allocation29_spill] sm:$0xff] %v13536_v44  ;;  %v13561_v35 = vmul.f32 %v12997_v51, %v4676_v8  ;;  %v4664_v29 = vpop.permute.xlu1 %4663  ;;  %6743 = vmatpush1.bf16.msra.mxu1 %v10601_v50  ;;  %v4598_v36 = vadd.f32 %v4534_v45, %v14839_v39  ;;  %v4599_v11 = vadd.f32 %v4535_v60, %v14840_v0  ;;  %v10610_v44 = vld [vmem:[%s14727_s11 + $0x578] ss:$28 sps:$4 sm:$0xff]   ;;  %v14843_v50 = vmax.f32 %v13424_v56, 0.0 }
 0x415   : > { %14837 = vst [vmem:[#allocation30_spill] sm:$0xff] %v13558_v12  ;;  %v4600_v7 = vadd.f32 %v4536_v9, %v14841_v46  ;;  %v4601_v57 = vadd.f32 %v4537_v42, %v14842_v53  ;;  %6517 = vmatpush1.bf16.msra.mxu0 %v10604_v54  ;;  %v4762_v12 = vmul.f32 %v12988_v32, %v4664_v29  ;;  %v4887_v46 = vmax.f32 %v13530_v37, 0.0 }
 0x416   : > { %14838 = vst [vmem:[#allocation15_spill] sm:$0xff] %v13561_v35  ;;  %v13575_v35 = vpack.c.bf16 %v4882_v15, %v14843_v50  ;;  %v4763_v45 = vmul.f32 %v12991_v19, %v4664_v29  ;;  %6744 = vmatprep.subr.bf16.mxu1 %v10609_v47  ;;  %6518 = vmatprep.subr.bf16.mxu0 %v10612_v48  ;;  %v4886_v54 = vmax.f32 %v13518_v61, 0.0  ;;  %v14844_v17 = vmax.f32 %v13427_v31, 0.0  ;;  %v10615_v47 = vld [vmem:[%s14727_s11 + $0x5bc] ss:$28 sps:$4 sm:$0xff]  }
 0x417   : > { %v4764_v0 = vmul.f32 %v12997_v51, %v4664_v29  ;;  %v4765_v53 = vmul.f32 %v13000_v38, %v4664_v29  ;;  %v4826_v56 = vadd.f32 %v4762_v12, %v4598_v36  ;;  %v14845_v48 = vmax.f32 %v13121_v3, 0.0  ;;  %v10613_v12 = vld [vmem:[%s14727_s11 + $0x5b8] ss:$28 sps:$4 sm:$0xff]   ;;  %v10616_v50 = vld [vmem:[%s14727_s11 + $0x5b0] ss:$28 sps:$4 sm:$0xff]  }
 0x418   : > { %v13585_v60 = vpack.c.bf16 %v4883_v13, %v14844_v17  ;;  %v4827_v15 = vadd.f32 %v4763_v45, %v4599_v11  ;;  %v4668_v9 = vpop.permute.xlu1 %4667  ;;  %6745 = vmatpush1.bf16.msra.mxu1 %v10607_v55  ;;  %v14846_v42 = vmax.f32 %v13143_v14, 0.0  ;;  %v10618_v3 = vld [vmem:[%s14727_s11 + $0x5b4] ss:$28 sps:$4 sm:$0xff]  }
 0x419   : > { %v13596_v37 = vadd.f32 %v4764_v0, %v4600_v7  ;;  %v13598_v61 = vadd.f32 %v4765_v53, %v4601_v57  ;;  %v4766_v31 = vmul.f32 %v12988_v32, %v4668_v9  ;;  %v4767_v13 = vmul.f32 %v12991_v19, %v4668_v9  ;;  %6519 = vmatpush1.bf16.msra.mxu0 %v10610_v44 }
 0x41a   : > { %v13594_v29 = vpack.c.bf16 %v14846_v42, %v14845_v48  ;;  %6459 = vmatprep.mubr.bf16.mxu0 %v13585_v60  ;;  %6685 = vmatprep.mubr.bf16.mxu1 %v13585_v60  ;;  %v4890_v14 = vmax.f32 %v4826_v56, 0.0  ;;  %v4891_v7 = vmax.f32 %v4827_v15, 0.0  ;;  %v4768_v57 = vmul.f32 %v12997_v51, %v4668_v9 }
 0x41b   : > { %v4769_v55 = vmul.f32 %v13000_v38, %v4668_v9  ;;  %v13613_v44 = vmul.f32 %v13000_v38, %v4676_v8  ;;  %6460 = vmatmul.mubr.bf16.gmra.mrb[112].mxu0 %v13575_v35  ;;  %6686 = vmatmul.mubr.bf16.gmra.mrb[112].mxu1 %v13575_v35  ;;  %v4892_v39 = vmax.f32 %v13596_v37, 0.0  ;;  %v13619_v36 = vadd.f32 %v4766_v31, %v13452_v34  ;;  %v10621_v8 = vld [vmem:[%s14727_s11 + $0x5f4] ss:$28 sps:$4 sm:$0xff]  }
 0x41c   : > { %v13622_v11 = vadd.f32 %v4767_v13, %v13459_v23  ;;  %v13631_v45 = vadd.f32 %v4768_v57, %v13455_v30  ;;  %v13636_v53 = vpack.c.bf16 %v4891_v7, %v4887_v46  ;;  %v13638_v34 = vpack.c.bf16 %v4890_v14, %v4886_v54  ;;  %6746 = vmatprep.subr.bf16.mxu1 %v10615_v47  ;;  %v10624_v23 = vld [vmem:[%s14727_s11 + $0x5ec] ss:$28 sps:$4 sm:$0xff]  }
 0x41d   : > { %v13634_v0 = vadd.f32 %v4769_v55, %v13462_v40  ;;  %v4893_v17 = vmax.f32 %v13598_v61, 0.0  ;;  %v4894_v56 = vmax.f32 %v13619_v36, 0.0  ;;  %v4441_v15 = vpop.permute.xlu1 %4440  ;;  %6520 = vmatprep.subr.bf16.mxu0 %v10618_v3  ;;  %6747 = vmatpush1.bf16.msra.mxu1 %v10613_v12  ;;  %v10619_v40 = vld [vmem:[%s14727_s11 + $0x5f0] ss:$28 sps:$4 sm:$0xff]   ;;  %v14847_v30 = vmax.f32 %v13165_v33, 0.0 }
 0x41e   : > { %v14848_v46 = vmax.f32 %v13212_v52, 0.0  ;;  %v14849_v9 = vmax.f32 %v13163_v2, 0.0  ;;  %v14850_v47 = vmax.f32 %v13207_v5, 0.0  ;;  %v4895_v42 = vmax.f32 %v13622_v11, 0.0  ;;  %6469 = vmatprep.mubr.bf16.mxu0 %v13636_v53  ;;  %6695 = vmatprep.mubr.bf16.mxu1 %v13636_v53  ;;  %v10627_v2 = vld [vmem:[%s14727_s11 + $0x62c] ss:$28 sps:$4 sm:$0xff]  }
 0x41f   : > { %v4896_v31 = vmax.f32 %v13631_v45, 0.0  ;;  %v4542_v13 = vmul.f32 %v13003_v18, %v4441_v15  ;;  %v4543_v12 = vmul.f32 %v13006_v41, %v4441_v15  ;;  %v4544_v33 = vmul.f32 %v13009_v43, %v4441_v15  ;;  %6521 = vmatpush1.bf16.msra.mxu0 %v10616_v50  ;;  %6748 = vmatprep.subr.bf16.mxu1 %v10621_v8  ;;  %v14867_v36 = vld [vmem:[#allocation28_spill] sm:$0xff]  ;;  %v10648_v61 = vld [vmem:[%s14727_s11 + $0x6cc] ss:$28 sps:$4 sm:$0xff]  }
 0x420   : > { %v13652_v54 = vpack.c.bf16 %v14848_v46, %v14847_v30  ;;  %v13658_v48 = vpack.c.bf16 %v14850_v47, %v14849_v9  ;;  %v4545_v5 = vmul.f32 %v13012_v49, %v4441_v15  ;;  %v14851_v52 = vmax.f32 %v13243_v26, 0.0  ;;  %v10622_v30 = vld [vmem:[%s14727_s11 + $0x5e8] ss:$28 sps:$4 sm:$0xff]   ;;  %6522 = vmatprep.subr.bf16.mxu0 %v10624_v23 }
 0x421   : > { %v14852_v3 = vmax.f32 %v13287_v22, 0.0  ;;  %v4868_v7 = vmax.f32 %v13279_v59, 0.0  ;;  %v4606_v57 = vadd.f32 %v4542_v13, %v13102_v63  ;;  %v4607_v55 = vadd.f32 %v4543_v12, %v13108_v24  ;;  %v14853_v26 = vld [vmem:[#allocation23_spill] sm:$0xff]  ;;  %v14854_v22 = vld [vmem:[#allocation24_spill] sm:$0xff]  ;;  %v4446_v9 = vpop.permute.xlu1 %4445  ;;  %6749 = vmatpush1.bf16.msra.mxu1 %v10619_v40  ;;  %v10630_v24 = vld [vmem:[%s14727_s11 + $0x624] ss:$28 sps:$4 sm:$0xff]  }
 0x422   : > { %v4873_v50 = vmax.f32 %v13328_v6, 0.0  ;;  %v4872_v8 = vmax.f32 %v13314_v1, 0.0  ;;  %v4608_v15 = vadd.f32 %v4544_v33, %v14853_v26  ;;  %v4609_v46 = vadd.f32 %v4545_v5, %v14854_v22  ;;  %v10625_v63 = vld [vmem:[%s14727_s11 + $0x628] ss:$28 sps:$4 sm:$0xff]   ;;  %6750 = vmatprep.subr.bf16.mxu1 %v10627_v2 }
 0x423   : > { %v13675_v14 = vpack.c.bf16 %v14852_v3, %v14851_v52  ;;  %v14855_v59 = vmax.f32 %v13241_v21, 0.0  ;;  %v4885_v1 = vmax.f32 %v13502_v4, 0.0  ;;  %v4834_v6 = vadd.f32 %v13521_v10, %v4606_v57  ;;  %v10633_v12 = vld [vmem:[%s14727_s11 + $0x664] ss:$28 sps:$4 sm:$0xff]   ;;  %6470 = vmatmul.mubr.bf16.gmra.mrb[116].mxu0 %v13638_v34  ;;  %6696 = vmatmul.mubr.bf16.gmra.mrb[116].mxu1 %v13638_v34 }
 0x424   : > { %v4835_v47 = vadd.f32 %v13539_v20, %v4607_v55  ;;  %v4546_v40 = vmul.f32 %v13003_v18, %v4446_v9  ;;  %v4547_v13 = vmul.f32 %v13006_v41, %v4446_v9  ;;  %v13706_v33 = vadd.f32 %v13524_v58, %v4608_v15  ;;  %6523 = vmatpush1.bf16.msra.mxu0 %v10622_v30  ;;  %v10628_v58 = vld [vmem:[%s14727_s11 + $0x620] ss:$28 sps:$4 sm:$0xff]   ;;  %v10646_v45 = vld [vmem:[%s14727_s11 + $0x6c8] ss:$28 sps:$4 sm:$0xff]  }
 0x425   : > { %v13695_v23 = vpack.c.bf16 %v4868_v7, %v14855_v59  ;;  %v13709_v21 = vadd.f32 %v13552_v62, %v4609_v46  ;;  %v4548_v4 = vmul.f32 %v13009_v43, %v4446_v9  ;;  %v4884_v10 = vmax.f32 %v13499_v25, 0.0  ;;  %v14856_v62 = vld [vmem:[#allocation25_spill] sm:$0xff]  ;;  %v4451_v7 = vpop.permute.xlu1 %4450  ;;  %6524 = vmatprep.subr.bf16.mxu0 %v10630_v24  ;;  %6751 = vmatpush1.bf16.msra.mxu1 %v10625_v63  ;;  %v14859_v26 = vld [vmem:[#allocation10_spill] sm:$0xff] }
 0x426   : > { %v4549_v20 = vmul.f32 %v13012_v49, %v4446_v9  ;;  %v4610_v2 = vadd.f32 %v4546_v40, %v13111_v16  ;;  %v4611_v5 = vadd.f32 %v4547_v13, %v13115_v27  ;;  %v4899_v52 = vmax.f32 %v4835_v47, 0.0  ;;  %v10631_v25 = vld [vmem:[%s14727_s11 + $0x660] ss:$28 sps:$4 sm:$0xff]   ;;  %6752 = vmatprep.subr.bf16.mxu1 %v10633_v12  ;;  %v14863_v47 = vld [vmem:[#allocation15_spill] sm:$0xff] }
 0x427   : > { %v4612_v3 = vadd.f32 %v4548_v4, %v14856_v62  ;;  %v4898_v57 = vmax.f32 %v4834_v6, 0.0  ;;  %v10636_v16 = vld [vmem:[%s14727_s11 + $0x65c] ss:$28 sps:$4 sm:$0xff]   ;;  %v14860_v15 = vmax.f32 %v14859_v26, 0.0  ;;  %v14861_v46 = vld [vmem:[#allocation26_spill] sm:$0xff]  ;;  %v4550_v6 = vmul.f32 %v13003_v18, %v4451_v7  ;;  %v14864_v12 = vld [vmem:[#allocation35_spill] sm:$0xff] }
 0x428   : > { %v14857_v27 = vld [vmem:[#allocation13_spill] sm:$0xff]  ;;  %v4613_v9 = vadd.f32 %v4549_v20, %v14861_v46  ;;  %v13738_v63 = vadd.f32 %v13555_v28, %v4610_v2  ;;  %v14862_v24 = vld [vmem:[#allocation30_spill] sm:$0xff]  ;;  %v4552_v13 = vmul.f32 %v13009_v43, %v4451_v7  ;;  %v13755_v28 = vpack.c.bf16 %v4899_v52, %v4895_v42  ;;  %6525 = vmatpush1.bf16.msra.mxu0 %v10628_v58  ;;  %v14866_v42 = vld [vmem:[#allocation27_spill] sm:$0xff] }
 0x429   : > { %v14858_v55 = vmax.f32 %v14857_v27, 0.0  ;;  %v13734_v22 = vpack.c.bf16 %v14860_v15, %v4872_v8  ;;  %v13741_v59 = vadd.f32 %v14862_v24, %v4611_v5  ;;  %v13745_v40 = vadd.f32 %v14863_v47, %v4612_v3  ;;  %v10639_v43 = vld [vmem:[%s14727_s11 + $0x69c] ss:$28 sps:$4 sm:$0xff]   ;;  %6526 = vmatprep.subr.bf16.mxu0 %v10636_v16  ;;  %6753 = vmatpush1.bf16.msra.mxu1 %v10631_v25  ;;  %v10642_v52 = vld [vmem:[%s14727_s11 + $0x694] ss:$28 sps:$4 sm:$0xff]   ;;  %v14868_v3 = vld [vmem:[#allocation11_spill] sm:$0xff] }
 0x42a   : > { %v4553_v8 = vmul.f32 %v13012_v49, %v4451_v7  ;;  %v13751_v4 = vadd.f32 %v13613_v44, %v4613_v9  ;;  %v13759_v18 = vpack.c.bf16 %v4898_v57, %v4894_v56  ;;  %v4614_v20 = vadd.f32 %v4550_v6, %v14864_v12  ;;  %v14865_v44 = vld [vmem:[#allocation36_spill] sm:$0xff]  ;;  %6479 = vmatprep.mubr.bf16.mxu0 %v13755_v28  ;;  %v14870_v25 = vld [vmem:[#allocation14_spill] sm:$0xff] }
 0x42b   : > { %v13730_v30 = vpack.c.bf16 %v14858_v55, %v4873_v50  ;;  %v4551_v50 = vmul.f32 %v13006_v41, %v4451_v7  ;;  %v10634_v41 = vld [vmem:[%s14727_s11 + $0x658] ss:$28 sps:$4 sm:$0xff]   ;;  %v4897_v49 = vmax.f32 %v13634_v0, 0.0  ;;  %v4616_v2 = vadd.f32 %v4552_v13, %v14866_v42  ;;  %6705 = vmatprep.mubr.bf16.mxu1 %v13755_v28  ;;  %v4680_v0 = vpop.permute.xlu1 %4679  ;;  %v14873_v24 = vld [vmem:[#allocation22_spill] sm:$0xff]  ;;  %6754 = vmatprep.subr.bf16.mxu1 %v10639_v43 }
 0x42c   : > { %v4617_v56 = vadd.f32 %v4553_v8, %v14867_v36  ;;  %v10637_v5 = vld [vmem:[%s14727_s11 + $0x698] ss:$28 sps:$4 sm:$0xff]   ;;  %v4903_v58 = vmax.f32 %v13741_v59, 0.0  ;;  %v14869_v7 = vmax.f32 %v14868_v3, 0.0  ;;  %v14871_v16 = vmax.f32 %v14870_v25, 0.0  ;;  %6480 = vmatmul.mubr.bf16.gmra.mrb[120].mxu0 %v13759_v18  ;;  %6706 = vmatmul.mubr.bf16.gmra.mrb[120].mxu1 %v13759_v18 }
 0x42d   : > { %v4615_v11 = vadd.f32 %v4551_v50, %v14865_v44  ;;  %v10645_v62 = vld [vmem:[%s14727_s11 + $0x6d4] ss:$28 sps:$4 sm:$0xff]   ;;  %v14872_v55 = vld [vmem:[#allocation29_spill] sm:$0xff]  ;;  %v4778_v15 = vmul.f32 %v12988_v32, %v4680_v0  ;;  %v4779_v46 = vmul.f32 %v12991_v19, %v4680_v0  ;;  %v4780_v9 = vmul.f32 %v12997_v51, %v4680_v0  ;;  %6527 = vmatpush1.bf16.msra.mxu0 %v10634_v41  ;;  %v10669_v3 = vld [vmem:[%s14727_s11 + $0x88] ss:$28 sps:$4 sm:$0xff]  }
 0x42e   : > { %v13786_v57 = vpack.c.bf16 %v4885_v1, %v14869_v7  ;;  %v13790_v27 = vpack.c.bf16 %v4884_v10, %v14871_v16  ;;  %v4889_v26 = vmax.f32 %v14872_v55, 0.0  ;;  %v4888_v59 = vmax.f32 %v14873_v24, 0.0  ;;  %v10640_v10 = vld [vmem:[%s14727_s11 + $0x690] ss:$28 sps:$4 sm:$0xff]   ;;  %6528 = vmatprep.subr.bf16.mxu0 %v10642_v52  ;;  %6755 = vmatpush1.bf16.msra.mxu1 %v10637_v5  ;;  %v10654_v52 = vld [vmem:[%s14727_s11 + $0x48] ss:$28 sps:$4 sm:$0xff]  }
 0x42f   : > { %v4781_v1 = vmul.f32 %v13000_v38, %v4680_v0  ;;  %v4901_v32 = vmax.f32 %v13709_v21, 0.0  ;;  %v4900_v19 = vmax.f32 %v13706_v33, 0.0  ;;  %v4842_v47 = vadd.f32 %v4778_v15, %v4614_v20  ;;  %v10643_v38 = vld [vmem:[%s14727_s11 + $0x6d0] ss:$28 sps:$4 sm:$0xff]   ;;  %6756 = vmatprep.subr.bf16.mxu1 %v10645_v62  ;;  %v10649_v33 = vld [vmem:[%s14727_s11 + $0x1d8] ss:$28 sps:$4 sm:$0xff]  }
 0x430   : > { %v13805_v6 = vpack.c.bf16 %v4893_v17, %v4889_v26  ;;  %v4843_v51 = vadd.f32 %v4779_v46, %v4615_v11  ;;  %v4844_v50 = vadd.f32 %v4780_v9, %v4616_v2  ;;  %v4902_v13 = vmax.f32 %v13738_v63, 0.0  ;;  %v10656_v2 = vld [vmem:[%s14727_s11 + $0x4c] ss:$28 sps:$4 sm:$0xff]   ;;  %v10658_v62 = vld [vmem:[%s14727_s11 + $0x80] ss:$28 sps:$4 sm:$0xff]  }
 0x431   : > { %v4845_v17 = vadd.f32 %v4781_v1, %v4617_v56  ;;  %v13821_v21 = vpack.c.bf16 %v4892_v39, %v4888_v59  ;;  %v13823_v63 = vpack.c.bf16 %v4901_v32, %v4897_v49  ;;  %v13827_v8 = vpack.c.bf16 %v4900_v19, %v4896_v31  ;;  %6529 = vmatpush1.bf16.msra.mxu0 %v10640_v10  ;;  %v10650_v49 = vld [vmem:[%s14727_s11 + $0x10] ss:$28 sps:$4 sm:$0xff]   ;;  %v14874_v56 = vld [vmem:[#allocation38_spill] sm:$0xff]  ;;  %v10664_v7 = vld [vmem:[%s14727_s11 + $0xbc] ss:$28 sps:$4 sm:$0xff]  }
 0x432   : > { %v4906_v12 = vmax.f32 %v4842_v47, 0.0  ;;  %v4907_v20 = vmax.f32 %v4843_v51, 0.0  ;;  %v4908_v41 = vmax.f32 %v4844_v50, 0.0  ;;  %v4904_v43 = vmax.f32 %v13745_v40, 0.0  ;;  %6530 = vmatprep.subr.bf16.mxu0 %v10648_v61  ;;  %6757 = vmatpush1.bf16.msra.mxu1 %v10643_v38  ;;  %v10652_v40 = vld [vmem:[%s14727_s11 + $0x14] ss:$28 sps:$4 sm:$0xff]  }
 0x433   : > { %v4909_v44 = vmax.f32 %v4845_v17, 0.0  ;;  %v4905_v11 = vmax.f32 %v13751_v4, 0.0  ;;  %9435 = vmatprep.subr.bf16.mxu1 %v10649_v33  ;;  %v10653_v4 = vld [vmem:[%s14727_s11 + $0x18] ss:$28 sps:$4 sm:$0xff]   ;;  %v10657_v36 = vld [vmem:[%s14727_s11 + $0x210] ss:$28 sps:$4 sm:$0xff]  }
 0x434   : > { %v13831_v42 = vpack.c.bf16 %v4907_v20, %v4903_v58  ;;  %v13833_v37 = vpack.c.bf16 %v4906_v12, %v4902_v13  ;;  %v13835_v39 = vpack.c.bf16 %v4908_v41, %v4904_v43  ;;  %v10661_v5 = vld [vmem:[%s14727_s11 + $0x50] ss:$28 sps:$4 sm:$0xff]   ;;  %v10665_v0 = vld [vmem:[%s14727_s11 + $0x248] ss:$28 sps:$4 sm:$0xff]   ;;  %v10673_v25 = vld [vmem:[%s14727_s11 + $0x280] ss:$28 sps:$4 sm:$0xff]  }
 0x435   : > { %v13840_v31 = vpack.c.bf16 %v4909_v44, %v4905_v11  ;;  %6531 = vmatpush1.bf16.msra.mxu0 %v10646_v45  ;;  %v10660_v58 = vld [vmem:[%s14727_s11 + $0x84] ss:$28 sps:$4 sm:$0xff]   ;;  %v10662_v16 = vld [vmem:[%s14727_s11 + $0xb8] ss:$28 sps:$4 sm:$0xff]   ;;  %v10666_v46 = vld [vmem:[%s14727_s11 + $0xf0] ss:$28 sps:$4 sm:$0xff]  }
 0x436   : > { %6489 = vmatprep.mubr.bf16.mxu0 %v13831_v42  ;;  %6715 = vmatprep.mubr.bf16.mxu1 %v13831_v42  ;;  %v10677_v55 = vld [vmem:[%s14727_s11 + $0xc0] ss:$28 sps:$4 sm:$0xff]   ;;  %v10668_v26 = vld [vmem:[%s14727_s11 + $0xf4] ss:$28 sps:$4 sm:$0xff]   ;;  %v10672_v24 = vld [vmem:[%s14727_s11 + $0x12c] ss:$28 sps:$4 sm:$0xff]  }
 0x437   : > { %6490 = vmatmul.mubr.bf16.gmra.mrb[124].mxu0 %v13833_v37  ;;  %6716 = vmatmul.mubr.bf16.gmra.mrb[124].mxu1 %v13833_v37  ;;  %v10681_v15 = vld [vmem:[%s14727_s11 + $0x2b8] ss:$28 sps:$4 sm:$0xff]   ;;  %v10689_v59 = vld [vmem:[%s14727_s11 + $0x2f0] ss:$28 sps:$4 sm:$0xff]   ;;  %v10670_v1 = vld [vmem:[%s14727_s11 + $0x128] ss:$28 sps:$4 sm:$0xff]  }
 0x438   : > { %6532 = vmatprep.mubr.bf16.mxu0 %v13594_v29  ;;  %6758 = vmatprep.mubr.bf16.mxu1 %v13594_v29  ;;  %v10685_v9 = vld [vmem:[%s14727_s11 + $0xf8] ss:$28 sps:$4 sm:$0xff]   ;;  %v10693_v10 = vld [vmem:[%s14727_s11 + $0x130] ss:$28 sps:$4 sm:$0xff]   ;;  %v10676_v32 = vld [vmem:[%s14727_s11 + $0x164] ss:$28 sps:$4 sm:$0xff]  }
 0x439   : > { %6839 = vmatprep.subr.bf16.mxu0 %v10652_v40  ;;  %v10697_v19 = vld [vmem:[%s14727_s11 + $0x328] ss:$28 sps:$4 sm:$0xff]   ;;  %v10674_v47 = vld [vmem:[%s14727_s11 + $0x160] ss:$28 sps:$4 sm:$0xff]   ;;  %v10678_v38 = vld [vmem:[%s14727_s11 + $0x198] ss:$28 sps:$4 sm:$0xff]  }
 0x43a   : > { %v10701_v51 = vld [vmem:[%s14727_s11 + $0x168] ss:$28 sps:$4 sm:$0xff]   ;;  %v10680_v50 = vld [vmem:[%s14727_s11 + $0x19c] ss:$28 sps:$4 sm:$0xff]   ;;  %v10684_v17 = vld [vmem:[%s14727_s11 + $0x1d4] ss:$28 sps:$4 sm:$0xff]  }
 0x43b   : > { %v10705_v13 = vld [vmem:[%s14727_s11 + $0x360] ss:$28 sps:$4 sm:$0xff]   ;;  %v10713_v33 = vld [vmem:[%s14727_s11 + $0x558] ss:$28 sps:$4 sm:$0xff]   ;;  %v10682_v12 = vld [vmem:[%s14727_s11 + $0x1d0] ss:$28 sps:$4 sm:$0xff]  }
 0x43c   : > { %v10709_v61 = vld [vmem:[%s14727_s11 + $0x1a0] ss:$28 sps:$4 sm:$0xff]   ;;  %v10688_v20 = vld [vmem:[%s14727_s11 + $0x20c] ss:$28 sps:$4 sm:$0xff]   ;;  %v10694_v45 = vld [vmem:[%s14727_s11 + $0x278] ss:$28 sps:$4 sm:$0xff]  }
 0x43d   : > { %v10686_v41 = vld [vmem:[%s14727_s11 + $0x208] ss:$28 sps:$4 sm:$0xff]   ;;  %v10690_v44 = vld [vmem:[%s14727_s11 + $0x240] ss:$28 sps:$4 sm:$0xff]   ;;  %v10700_v40 = vld [vmem:[%s14727_s11 + $0x2b4] ss:$28 sps:$4 sm:$0xff]  }
 0x43e   : > { %v10692_v43 = vld [vmem:[%s14727_s11 + $0x244] ss:$28 sps:$4 sm:$0xff]   ;;  %v10696_v11 = vld [vmem:[%s14727_s11 + $0x27c] ss:$28 sps:$4 sm:$0xff]  }
 0x43f   : > { %6533 = vmatmul.mubr.bf16.vlgmr.msra.gmra.mrb[96].mxu0 %v14874_v56  ;;  %6759 = vmatmul.mubr.bf16.vlgmr.msra.gmra.mrb[96].mxu1 %v14874_v56 }
 0x440   : > { %9436 = vmatpush3.bf16.msra.mxu1 %v10653_v4  ;;  %6542 = vmatprep.mubr.bf16.mxu0 %v13652_v54  ;;  %v10698_v4 = vld [vmem:[%s14727_s11 + $0x2b0] ss:$28 sps:$4 sm:$0xff]  }
 0x441   : > { %6768 = vmatprep.mubr.bf16.mxu1 %v13652_v54  ;;  %6840 = vmatpush1.bf16.msra.mxu0 %v10650_v49  ;;  %v10704_v49 = vld [vmem:[%s14727_s11 + $0x2ec] ss:$28 sps:$4 sm:$0xff]  }
 0x442   : > { %6841 = vmatprep.subr.bf16.mxu0 %v10656_v2  ;;  %9437 = vmatprep.subr.bf16.mxu1 %v10657_v36  ;;  %v10702_v2 = vld [vmem:[%s14727_s11 + $0x2e8] ss:$28 sps:$4 sm:$0xff]  }
 0x443   : > { %v10708_v36 = vld [vmem:[%s14727_s11 + $0x324] ss:$28 sps:$4 sm:$0xff]  }
 0x444   : > { %9438 = vmatpush3.bf16.msra.mxu1 %v10661_v5  ;;  %v10706_v5 = vld [vmem:[%s14727_s11 + $0x320] ss:$28 sps:$4 sm:$0xff]  }
 0x445   : > { %6842 = vmatpush1.bf16.msra.mxu0 %v10654_v52  ;;  %9439 = vmatprep.subr.bf16.mxu1 %v10665_v0  ;;  %v10712_v52 = vld [vmem:[%s14727_s11 + $0x35c] ss:$28 sps:$4 sm:$0xff]   ;;  %v14875_v0 = vld [vmem:[#allocation39_spill] sm:$0xff] }
 0x446   : > { %6843 = vmatprep.subr.bf16.mxu0 %v10660_v58  ;;  %v10710_v58 = vld [vmem:[%s14727_s11 + $0x358] ss:$28 sps:$4 sm:$0xff]  }
 0x447   : > { %6543 = vmatmul.mubr.bf16.gmra.mrb[100].mxu0 %v13658_v48  ;;  %6769 = vmatmul.mubr.bf16.gmra.mrb[100].mxu1 %v13658_v48 }
 0x448   : > { %6552 = vmatprep.mubr.bf16.mxu0 %v13675_v14  ;;  %6778 = vmatprep.mubr.bf16.mxu1 %v13675_v14 }
 0x449   : > { %6844 = vmatpush1.bf16.msra.mxu0 %v10658_v62  ;;  %9440 = vmatpush3.bf16.msra.mxu1 %v10669_v3  ;;  %v10716_v62 = vld [vmem:[%s14727_s11 + $0x394] ss:$28 sps:$4 sm:$0xff]  }
 0x44a   : > { %6845 = vmatprep.subr.bf16.mxu0 %v10664_v7  ;;  %9441 = vmatprep.subr.bf16.mxu1 %v10673_v25  ;;  %v10717_v3 = vld [vmem:[%s14727_s11 + $0x398] ss:$28 sps:$4 sm:$0xff]   ;;  %v10714_v7 = vld [vmem:[%s14727_s11 + $0x390] ss:$28 sps:$4 sm:$0xff]  }
 0x44b   : > { %v10720_v25 = vld [vmem:[%s14727_s11 + $0x3cc] ss:$28 sps:$4 sm:$0xff]  }
 0x44d   : > { %6846 = vmatpush1.bf16.msra.mxu0 %v10662_v16  ;;  %9442 = vmatpush3.bf16.msra.mxu1 %v10677_v55  ;;  %v14876_v16 = vld [vmem:[#allocation37_spill] sm:$0xff]  ;;  %v10721_v55 = vld [vmem:[%s14727_s11 + $0x590] ss:$28 sps:$4 sm:$0xff]  }
 0x44e   : > { %6847 = vmatprep.subr.bf16.mxu0 %v10668_v26  ;;  %9443 = vmatprep.subr.bf16.mxu1 %v10681_v15  ;;  %v10725_v26 = vld [vmem:[%s14727_s11 + $0x3d0] ss:$28 sps:$4 sm:$0xff]  }
 0x44f   : > { %6553 = vmatmul.mubr.bf16.gmra.mrb[104].mxu0 %v13695_v23  ;;  %6779 = vmatmul.mubr.bf16.gmra.mrb[104].mxu1 %v13695_v23  ;;  %v14877_v15 = vld [vmem:[#allocation7_spill] sm:$0xff] }
 0x450   : > { %6562 = vmatprep.mubr.bf16.mxu0 %v13730_v30  ;;  %6788 = vmatprep.mubr.bf16.mxu1 %v13730_v30 }
 0x451   : > { %6848 = vmatpush1.bf16.msra.mxu0 %v10666_v46  ;;  %9444 = vmatpush3.bf16.msra.mxu1 %v10685_v9  ;;  %v10718_v46 = vld [vmem:[%s14727_s11 + $0x3c8] ss:$28 sps:$4 sm:$0xff]  }
 0x452   : > { %6849 = vmatprep.subr.bf16.mxu0 %v10672_v24  ;;  %9445 = vmatprep.subr.bf16.mxu1 %v10689_v59  ;;  %v10729_v9 = vld [vmem:[%s14727_s11 + $0x5c8] ss:$28 sps:$4 sm:$0xff]   ;;  %v10722_v59 = vld [vmem:[%s14727_s11 + $0x400] ss:$28 sps:$4 sm:$0xff]  }
 0x453   : > { %v10724_v24 = vld [vmem:[%s14727_s11 + $0x404] ss:$28 sps:$4 sm:$0xff]  }
 0x455   : > { %6850 = vmatpush1.bf16.msra.mxu0 %v10670_v1  ;;  %9446 = vmatpush3.bf16.msra.mxu1 %v10693_v10  ;;  %v10728_v1 = vld [vmem:[%s14727_s11 + $0x43c] ss:$28 sps:$4 sm:$0xff]   ;;  %v10733_v10 = vld [vmem:[%s14727_s11 + $0x408] ss:$28 sps:$4 sm:$0xff]  }
 0x456   : > { %6851 = vmatprep.subr.bf16.mxu0 %v10676_v32  ;;  %9447 = vmatprep.subr.bf16.mxu1 %v10697_v19  ;;  %v14878_v32 = vld [vmem:[#allocation40_spill] sm:$0xff]  ;;  %v10737_v19 = vld [vmem:[%s14727_s11 + $0x600] ss:$28 sps:$4 sm:$0xff]  }
 0x457   : > { %6563 = vmatmul.mubr.bf16.gmra.mrb[108].mxu0 %v13734_v22  ;;  %6789 = vmatmul.mubr.bf16.gmra.mrb[108].mxu1 %v13734_v22 }
 0x458   : > { %6572 = vmatprep.mubr.bf16.mxu0 %v13786_v57  ;;  %6798 = vmatprep.mubr.bf16.mxu1 %v13786_v57 }
 0x459   : > { %6852 = vmatpush1.bf16.msra.mxu0 %v10674_v47  ;;  %9448 = vmatpush3.bf16.msra.mxu1 %v10701_v51  ;;  %v14879_v47 = vld [vmem:[#allocation9_spill] sm:$0xff] }
 0x45a   : > { %6853 = vmatprep.subr.bf16.mxu0 %v10680_v50  ;;  %9449 = vmatprep.subr.bf16.mxu1 %v10705_v13  ;;  %v10726_v51 = vld [vmem:[%s14727_s11 + $0x438] ss:$28 sps:$4 sm:$0xff]   ;;  %v10741_v13 = vld [vmem:[%s14727_s11 + $0x440] ss:$28 sps:$4 sm:$0xff]  }
 0x45b   : > { %v10732_v50 = vld [vmem:[%s14727_s11 + $0x474] ss:$28 sps:$4 sm:$0xff]  }
 0x45d   : > { %6854 = vmatpush1.bf16.msra.mxu0 %v10678_v38  ;;  %9450 = vmatpush3.bf16.msra.mxu1 %v10709_v61  ;;  %v10745_v38 = vld [vmem:[%s14727_s11 + $0x638] ss:$28 sps:$4 sm:$0xff]   ;;  %v10730_v61 = vld [vmem:[%s14727_s11 + $0x470] ss:$28 sps:$4 sm:$0xff]  }
 0x45e   : > { %6855 = vmatprep.subr.bf16.mxu0 %v10684_v17  ;;  %9499 = vmatprep.subr.bf16.mxu1 %v10713_v33  ;;  %v10736_v17 = vld [vmem:[%s14727_s11 + $0x4ac] ss:$28 sps:$4 sm:$0xff]   ;;  %v10749_v33 = vld [vmem:[%s14727_s11 + $0x478] ss:$28 sps:$4 sm:$0xff]  }
 0x45f   : > { %6573 = vmatmul.mubr.bf16.gmra.mrb[112].mxu0 %v13790_v27  ;;  %6799 = vmatmul.mubr.bf16.gmra.mrb[112].mxu1 %v13790_v27 }
 0x460   : > { %6582 = vmatprep.mubr.bf16.mxu0 %v13805_v6  ;;  %6808 = vmatprep.mubr.bf16.mxu1 %v13805_v6 }
 0x461   : > { %6856 = vmatpush1.bf16.msra.mxu0 %v10682_v12  ;;  %v14880_v12 = vld [vmem:[#allocation8_spill] sm:$0xff] }
 0x462   : > { %6857 = vmatprep.subr.bf16.mxu0 %v10688_v20  ;;  %v10753_v20 = vld [vmem:[%s14727_s11 + $0x670] ss:$28 sps:$4 sm:$0xff]  }
 0x465   : > { %6858 = vmatpush1.bf16.msra.mxu0 %v10686_v41  ;;  %v14881_v41 = vld [vmem:[#allocation12_spill] sm:$0xff] }
 0x466   : > { %6859 = vmatprep.subr.bf16.mxu0 %v10692_v43  ;;  %v10734_v43 = vld [vmem:[%s14727_s11 + $0x4a8] ss:$28 sps:$4 sm:$0xff]  }
 0x467   : > { %6583 = vmatmul.mubr.bf16.gmra.mrb[116].mxu0 %v13821_v21  ;;  %6809 = vmatmul.mubr.bf16.gmra.mrb[116].mxu1 %v13821_v21 }
 0x468   : > { %6592 = vmatprep.mubr.bf16.mxu0 %v13823_v63  ;;  %6818 = vmatprep.mubr.bf16.mxu1 %v13823_v63 }
 0x469   : > { %6860 = vmatpush1.bf16.msra.mxu0 %v10690_v44  ;;  %v10740_v44 = vld [vmem:[%s14727_s11 + $0x4e4] ss:$28 sps:$4 sm:$0xff]  }
 0x46a   : > { %6861 = vmatprep.subr.bf16.mxu0 %v10696_v11  ;;  %v10757_v11 = vld [vmem:[%s14727_s11 + $0x4b0] ss:$28 sps:$4 sm:$0xff]  }
 0x46d   : > { %6862 = vmatpush1.bf16.msra.mxu0 %v10694_v45  ;;  %v10761_v45 = vld [vmem:[%s14727_s11 + $0x6a8] ss:$28 sps:$4 sm:$0xff]  }
 0x46e   : > { %6863 = vmatprep.subr.bf16.mxu0 %v10700_v40  ;;  %v10738_v40 = vld [vmem:[%s14727_s11 + $0x4e0] ss:$28 sps:$4 sm:$0xff]  }
 0x46f   : > { %6593 = vmatmul.mubr.bf16.gmra.mrb[120].mxu0 %v13827_v8  ;;  %6819 = vmatmul.mubr.bf16.gmra.mrb[120].mxu1 %v13827_v8 }
 0x470   : > { %6602 = vmatprep.mubr.bf16.mxu0 %v13840_v31  ;;  %6828 = vmatprep.mubr.bf16.mxu1 %v13840_v31 }
 0x471   : > { %6864 = vmatpush1.bf16.msra.mxu0 %v10698_v4  ;;  %v10744_v4 = vld [vmem:[%s14727_s11 + $0x51c] ss:$28 sps:$4 sm:$0xff]  }
 0x472   : > { %6865 = vmatprep.subr.bf16.mxu0 %v10704_v49  ;;  %v10765_v49 = vld [vmem:[%s14727_s11 + $0x4e8] ss:$28 sps:$4 sm:$0xff]  }
 0x475   : > { %6866 = vmatpush1.bf16.msra.mxu0 %v10702_v2  ;;  %v14882_v2 = vld [vmem:[#allocation21_spill] sm:$0xff] }
 0x476   : > { %6867 = vmatprep.subr.bf16.mxu0 %v10708_v36  ;;  %v10769_v36 = vld [vmem:[%s14727_s11 + $0x6e0] ss:$28 sps:$4 sm:$0xff]  }
 0x477   : > { %6603 = vmatmul.mubr.bf16.gmra.mrb[124].mxu0 %v13835_v39  ;;  %6829 = vmatmul.mubr.bf16.gmra.mrb[124].mxu1 %v13835_v39 }
 0x478   : > { %6871 = vmatprep.mubr.bf16.mxu0 %v14875_v0  ;;  %7097 = vmatprep.mubr.bf16.mxu1 %v14875_v0  ;;  %v10773_v0 = vld [vmem:[%s14727_s11 + $0x520] ss:$28 sps:$4 sm:$0xff]  }
 0x479   : > { %6868 = vmatpush1.bf16.msra.mxu0 %v10706_v5  ;;  %v10742_v5 = vld [vmem:[%s14727_s11 + $0x518] ss:$28 sps:$4 sm:$0xff]  }
 0x47a   : > { %6869 = vmatprep.subr.bf16.mxu0 %v10712_v52  ;;  %v10748_v52 = vld [vmem:[%s14727_s11 + $0x554] ss:$28 sps:$4 sm:$0xff]  }
 0x47d   : > { %6870 = vmatpush1.bf16.msra.mxu0 %v10710_v58  ;;  %v10752_v58 = vld [vmem:[%s14727_s11 + $0x58c] ss:$28 sps:$4 sm:$0xff]  }
 0x47e   : > { %6952 = vmatprep.subr.bf16.mxu0 %v10716_v62  ;;  %v10750_v62 = vld [vmem:[%s14727_s11 + $0x588] ss:$28 sps:$4 sm:$0xff]  }
 0x47f   : > { %7098 = vmatmul.mubr.bf16.vlgmr.msra.gmra.mrb[128].mxu1 %v14876_v16 }
 0x480   : > { %6872 = vmatmul.mubr.bf16.vlgmr.msra.gmra.mrb[128].mxu0 %v14876_v16  ;;  %9500 = vmatpush3.bf16.msra.mxu1 %v10717_v3  ;;  %v10756_v3 = vld [vmem:[%s14727_s11 + $0x5c4] ss:$28 sps:$4 sm:$0xff]   ;;  %v10762_v16 = vld [vmem:[%s14727_s11 + $0x630] ss:$28 sps:$4 sm:$0xff]  }
 0x481   : > { %6881 = vmatprep.mubr.bf16.mxu0 %v14877_v15  ;;  %6953 = vmatpush1.bf16.msra.mxu0 %v10714_v7  ;;  %v10754_v7 = vld [vmem:[%s14727_s11 + $0x5c0] ss:$28 sps:$4 sm:$0xff]  }
 0x482   : > { %7105 = vmatprep.mubr.bf16.mxu1 %v14877_v15  ;;  %6954 = vmatprep.subr.bf16.mxu0 %v10720_v25  ;;  %v10764_v25 = vld [vmem:[%s14727_s11 + $0x634] ss:$28 sps:$4 sm:$0xff]  }
 0x483   : > { %9501 = vmatprep.subr.bf16.mxu1 %v10721_v55  ;;  %v10772_v55 = vld [vmem:[%s14727_s11 + $0x6a4] ss:$28 sps:$4 sm:$0xff]  }
 0x484   : > { %9502 = vmatpush3.bf16.msra.mxu1 %v10725_v26  ;;  %v10770_v26 = vld [vmem:[%s14727_s11 + $0x6a0] ss:$28 sps:$4 sm:$0xff]  }
 0x485   : > { %6955 = vmatpush1.bf16.msra.mxu0 %v10718_v46  ;;  %9503 = vmatprep.subr.bf16.mxu1 %v10729_v9 }
 0x486   : > { %6956 = vmatprep.subr.bf16.mxu0 %v10724_v24 }
 0x487   : > { %7106 = vmatmul.mubr.bf16.gmra.mrb[132].mxu1 %v14878_v32 }
 0x488   : > { %6882 = vmatmul.mubr.bf16.gmra.mrb[132].mxu0 %v14878_v32  ;;  %7113 = vmatprep.mubr.bf16.mxu1 %v14879_v47 }
 0x489   : > { %6891 = vmatprep.mubr.bf16.mxu0 %v14879_v47  ;;  %6957 = vmatpush1.bf16.msra.mxu0 %v10722_v59 }
 0x48a   : > { %6958 = vmatprep.subr.bf16.mxu0 %v10728_v1  ;;  %9504 = vmatpush3.bf16.msra.mxu1 %v10733_v10 }
 0x48b   : > { %9505 = vmatprep.subr.bf16.mxu1 %v10737_v19 }
 0x48d   : > { %6959 = vmatpush1.bf16.msra.mxu0 %v10726_v51 }
 0x48e   : > { %6960 = vmatprep.subr.bf16.mxu0 %v10732_v50  ;;  %9506 = vmatpush3.bf16.msra.mxu1 %v10741_v13 }
 0x48f   : > { %7114 = vmatmul.mubr.bf16.gmra.mrb[136].mxu1 %v14880_v12  ;;  %9507 = vmatprep.subr.bf16.mxu1 %v10745_v38 }
 0x490   : > { %6892 = vmatmul.mubr.bf16.gmra.mrb[136].mxu0 %v14880_v12  ;;  %7121 = vmatprep.mubr.bf16.mxu1 %v14881_v41 }
 0x491   : > { %6901 = vmatprep.mubr.bf16.mxu0 %v14881_v41  ;;  %6961 = vmatpush1.bf16.msra.mxu0 %v10730_v61 }
 0x492   : > { %6962 = vmatprep.subr.bf16.mxu0 %v10736_v17  ;;  %9508 = vmatpush3.bf16.msra.mxu1 %v10749_v33 }
 0x493   : > { %9509 = vmatprep.subr.bf16.mxu1 %v10753_v20 }
 0x495   : > { %6963 = vmatpush1.bf16.msra.mxu0 %v10734_v43 }
 0x496   : > { %6964 = vmatprep.subr.bf16.mxu0 %v10740_v44  ;;  %9510 = vmatpush3.bf16.msra.mxu1 %v10757_v11 }
 0x497   : > { %7122 = vmatmul.mubr.bf16.gmra.mrb[140].mxu1 %v14882_v2  ;;  %9511 = vmatprep.subr.bf16.mxu1 %v10761_v45 }
 0x498   : > { %6902 = vmatmul.mubr.bf16.gmra.mrb[140].mxu0 %v14882_v2  ;;  %7129 = vmatprep.mubr.bf16.mxu1 %v13585_v60 }
 0x499   : > { %6911 = vmatprep.mubr.bf16.mxu0 %v13585_v60  ;;  %6965 = vmatpush1.bf16.msra.mxu0 %v10738_v40  ;;  %v10746_v60 = vld [vmem:[%s14727_s11 + $0x550] ss:$28 sps:$4 sm:$0xff]  }
 0x49a   : > { %6966 = vmatprep.subr.bf16.mxu0 %v10744_v4  ;;  %9512 = vmatpush3.bf16.msra.mxu1 %v10765_v49 }
 0x49b   : > { %9513 = vmatprep.subr.bf16.mxu1 %v10769_v36 }
 0x49d   : > { %6967 = vmatpush1.bf16.msra.mxu0 %v10742_v5 }
 0x49e   : > { %6968 = vmatprep.subr.bf16.mxu0 %v10748_v52  ;;  %9514 = vmatpush3.bf16.msra.mxu1 %v10773_v0 }
 0x49f   : > { %7130 = vmatmul.mubr.bf16.gmra.mrb[144].mxu1 %v13575_v35 }
 0x4a0   : > { %6912 = vmatmul.mubr.bf16.gmra.mrb[144].mxu0 %v13575_v35  ;;  %7137 = vmatprep.mubr.bf16.mxu1 %v13636_v53  ;;  %v10760_v35 = vld [vmem:[%s14727_s11 + $0x5fc] ss:$28 sps:$4 sm:$0xff]  }
 0x4a1   : > { %6921 = vmatprep.mubr.bf16.mxu0 %v13636_v53  ;;  %6969 = vmatpush1.bf16.msra.mxu0 %v10746_v60  ;;  %v10758_v53 = vld [vmem:[%s14727_s11 + $0x5f8] ss:$28 sps:$4 sm:$0xff]  }
 0x4a2   : > { %6970 = vmatprep.subr.bf16.mxu0 %v10752_v58 }
 0x4a5   : > { %6971 = vmatpush1.bf16.msra.mxu0 %v10750_v62 }
 0x4a6   : > { %6972 = vmatprep.subr.bf16.mxu0 %v10756_v3 }
 0x4a7   : > { %7138 = vmatmul.mubr.bf16.gmra.mrb[148].mxu1 %v13638_v34 }
 0x4a8   : > { %6922 = vmatmul.mubr.bf16.gmra.mrb[148].mxu0 %v13638_v34  ;;  %7145 = vmatprep.mubr.bf16.mxu1 %v13755_v28  ;;  %v10768_v34 = vld [vmem:[%s14727_s11 + $0x66c] ss:$28 sps:$4 sm:$0xff]  }
 0x4a9   : > { %6931 = vmatprep.mubr.bf16.mxu0 %v13755_v28  ;;  %6973 = vmatpush1.bf16.msra.mxu0 %v10754_v7  ;;  %v10766_v28 = vld [vmem:[%s14727_s11 + $0x668] ss:$28 sps:$4 sm:$0xff]  }
 0x4aa   : > { %6974 = vmatprep.subr.bf16.mxu0 %v10760_v35 }
 0x4ad   : > { %6975 = vmatpush1.bf16.msra.mxu0 %v10758_v53 }
 0x4ae   : > { %6976 = vmatprep.subr.bf16.mxu0 %v10764_v25 }
 0x4af   : > { %7146 = vmatmul.mubr.bf16.gmra.mrb[152].mxu1 %v13759_v18 }
 0x4b0   : > { %6932 = vmatmul.mubr.bf16.gmra.mrb[152].mxu0 %v13759_v18  ;;  %7153 = vmatprep.mubr.bf16.mxu1 %v13831_v42  ;;  %v10776_v18 = vld [vmem:[%s14727_s11 + $0x6dc] ss:$28 sps:$4 sm:$0xff]  }
 0x4b1   : > { %6941 = vmatprep.mubr.bf16.mxu0 %v13831_v42  ;;  %6977 = vmatpush1.bf16.msra.mxu0 %v10762_v16  ;;  %v10774_v42 = vld [vmem:[%s14727_s11 + $0x6d8] ss:$28 sps:$4 sm:$0xff]  }
 0x4b2   : > { %6978 = vmatprep.subr.bf16.mxu0 %v10768_v34 }
 0x4b5   : > { %6979 = vmatpush1.bf16.msra.mxu0 %v10766_v28 }
 0x4b6   : > { %6980 = vmatprep.subr.bf16.mxu0 %v10772_v55 }
 0x4b7   : > { %7154 = vmatmul.mubr.bf16.gmra.mrb[156].mxu1 %v13833_v37 }
 0x4b8   : > { %6942 = vmatmul.mubr.bf16.gmra.mrb[156].mxu0 %v13833_v37  ;;  %7194 = vmatprep.mubr.bf16.mxu1 %v13594_v29 }
 0x4b9   : > { %6981 = vmatpush1.bf16.msra.mxu0 %v10770_v26  ;;  %6984 = vmatprep.mubr.bf16.mxu0 %v13594_v29  ;;  %v5198_v29 = vld [vmem:[%s14728_s12] sm:$0x7f] }
 0x4ba   : > { %6982 = vmatprep.subr.bf16.mxu0 %v10776_v18 }
 0x4bd   : > { %6983 = vmatpush1.bf16.msra.mxu0 %v10774_v42 }
 0x4bf   : > { %7195 = vmatmul.mubr.bf16.vlgmr.msra.gmra.mrb[160].mxu1 %v14874_v56 }
 0x4c0   : > { %6985 = vmatmul.mubr.bf16.vlgmr.msra.gmra.mrb[128].mxu0 %v14874_v56  ;;  %7202 = vmatprep.mubr.bf16.mxu1 %v13652_v54 }
 0x4c1   : > { %6994 = vmatprep.mubr.bf16.mxu0 %v13652_v54  ;;  %v14883_v54 = vld [vmem:[#allocation3_spill] sm:$0xff] }
 0x4c7   : > { %7203 = vmatmul.mubr.bf16.gmra.mrb[164].mxu1 %v13658_v48 }
 0x4c8   : > { %6995 = vmatmul.mubr.bf16.gmra.mrb[132].mxu0 %v13658_v48  ;;  %7210 = vmatprep.mubr.bf16.mxu1 %v13675_v14  ;;  %v14231_v48 = vrot.slane %v5198_v29, %v14883_v54 }
 0x4c9   : > { %7004 = vmatprep.mubr.bf16.mxu0 %v13675_v14  ;;  %v14884_v14 = vld [vmem:[#allocation4_spill] sm:$0xff] }
 0x4cf   : > { %7211 = vmatmul.mubr.bf16.gmra.mrb[168].mxu1 %v13695_v23 }
 0x4d0   : > { %7005 = vmatmul.mubr.bf16.gmra.mrb[136].mxu0 %v13695_v23  ;;  %7218 = vmatprep.mubr.bf16.mxu1 %v13730_v30  ;;  %v14234_v23 = vrot.slane %v5198_v29, %v14884_v14 }
 0x4d1   : > { %7014 = vmatprep.mubr.bf16.mxu0 %v13730_v30  ;;  %v14885_v30 = vld [vmem:[#allocation5_spill] sm:$0xff] }
 0x4d7   : > { %7219 = vmatmul.mubr.bf16.gmra.mrb[172].mxu1 %v13734_v22 }
 0x4d8   : > { %7015 = vmatmul.mubr.bf16.gmra.mrb[140].mxu0 %v13734_v22  ;;  %7226 = vmatprep.mubr.bf16.mxu1 %v13786_v57  ;;  %v14237_v22 = vrot.slane %v5198_v29, %v14885_v30 }
 0x4d9   : > { %7024 = vmatprep.mubr.bf16.mxu0 %v13786_v57  ;;  %v14886_v57 = vld [vmem:[#allocation6_spill] sm:$0xff] }
 0x4df   : > { %7227 = vmatmul.mubr.bf16.gmra.mrb[176].mxu1 %v13790_v27 }
 0x4e0   : > { %7025 = vmatmul.mubr.bf16.gmra.mrb[144].mxu0 %v13790_v27  ;;  %7234 = vmatprep.mubr.bf16.mxu1 %v13805_v6  ;;  %v14240_v27 = vrot.slane %v5198_v29, %v14886_v57 }
 0x4e1   : > { %7034 = vmatprep.mubr.bf16.mxu0 %v13805_v6 }
 0x4e7   : > { %7235 = vmatmul.mubr.bf16.gmra.mrb[180].mxu1 %v13821_v21 }
 0x4e8   : > { %7035 = vmatmul.mubr.bf16.gmra.mrb[148].mxu0 %v13821_v21  ;;  %7242 = vmatprep.mubr.bf16.mxu1 %v13823_v63 }
 0x4e9   : > { %7044 = vmatprep.mubr.bf16.mxu0 %v13823_v63 }
 0x4ef   : > { %7243 = vmatmul.mubr.bf16.gmra.mrb[184].mxu1 %v13827_v8 }
 0x4f0   : > { %7045 = vmatmul.mubr.bf16.gmra.mrb[152].mxu0 %v13827_v8  ;;  %7250 = vmatprep.mubr.bf16.mxu1 %v13840_v31 }
 0x4f1   : > { %7054 = vmatprep.mubr.bf16.mxu0 %v13840_v31 }
 0x4f7   : > { %7251 = vmatmul.mubr.bf16.gmra.mrb[188].mxu1 %v13835_v39 }
 0x4f8   : > { %7055 = vmatmul.mubr.bf16.gmra.mrb[156].mxu0 %v13835_v39 }
 0x512   : > { %v6534_v6 = vpop.f32.mrb[96].mxu0  ;;  %v6760_v21 = vpop.f32.mrb[96].mxu1 }
 0x513   : > { %v9563_v63 = vadd.f32 %v6534_v6, %v14231_v48  ;;  %v9595_v8 = vadd.f32 %v6760_v21, %v14234_v23  ;;  %v6536_v37 = vpop.f32.mrb[97].mxu0  ;;  %v6762_v39 = vpop.f32.mrb[97].mxu1 }
 0x514   : > { %v9564_v31 = vadd.f32 %v6536_v37, %v14237_v22  ;;  %v9596_v56 = vadd.f32 %v6762_v39, %v14240_v27  ;;  %v6538_v15 = vpop.f32.mrb[98].mxu0  ;;  %v6764_v46 = vpop.f32.mrb[98].mxu1 }
 0x515   : > { %v9065_v9 = vmul.f32 -1.442695, %v9563_v63  ;;  %v9067_v24 = vmul.f32 -1.442695, %v9595_v8  ;;  %v9565_v59 = vadd.f32 %v6538_v15, %v14231_v48  ;;  %v9597_v1 = vadd.f32 %v6764_v46, %v14234_v23  ;;  %v6540_v10 = vpop.f32.mrb[99].mxu0  ;;  %v6766_v32 = vpop.f32.mrb[99].mxu1 }
 0x516   : > { %v9066_v19 = vmul.f32 -1.442695, %v9564_v31  ;;  %v9068_v47 = vmul.f32 -1.442695, %v9596_v56  ;;  %v9566_v51 = vadd.f32 %v6540_v10, %v14237_v22  ;;  %v9598_v50 = vadd.f32 %v6766_v32, %v14240_v27 }
 0x517   : > { %10809 = vpow2.f32 %v9065_v9  ;;  %v9072_v13 = vmul.f32 -1.442695, %v9565_v59  ;;  %v9074_v38 = vmul.f32 -1.442695, %v9597_v1 }
 0x518   : > { %10811 = vpow2.f32 %v9067_v24  ;;  %v9073_v61 = vmul.f32 -1.442695, %v9566_v51  ;;  %v9075_v17 = vmul.f32 -1.442695, %v9598_v50 }
 0x519   : > { %10813 = vpow2.f32 %v9066_v19 }
 0x51a   : > { %10815 = vpow2.f32 %v9068_v47  ;;  %v6544_v33 = vpop.f32.mrb[100].mxu0  ;;  %v6770_v12 = vpop.f32.mrb[100].mxu1 }
 0x51b   : > { %10817 = vpow2.f32 %v9072_v13  ;;  %v9567_v20 = vadd.f32 %v6544_v33, %v14231_v48  ;;  %v9599_v41 = vadd.f32 %v6770_v12, %v14234_v23  ;;  %v6546_v43 = vpop.f32.mrb[101].mxu0  ;;  %v6772_v44 = vpop.f32.mrb[101].mxu1 }
 0x51c   : > { %10819 = vpow2.f32 %v9074_v38  ;;  %v9568_v11 = vadd.f32 %v6546_v43, %v14237_v22  ;;  %v9600_v45 = vadd.f32 %v6772_v44, %v14240_v27  ;;  %v6548_v40 = vpop.f32.mrb[102].mxu0  ;;  %v6774_v4 = vpop.f32.mrb[102].mxu1 }
 0x51d   : > { %10821 = vpow2.f32 %v9073_v61  ;;  %v9079_v49 = vmul.f32 -1.442695, %v9567_v20  ;;  %v9081_v2 = vmul.f32 -1.442695, %v9599_v41  ;;  %v9569_v36 = vadd.f32 %v6548_v40, %v14231_v48  ;;  %v6550_v5 = vpop.f32.mrb[103].mxu0  ;;  %v6776_v52 = vpop.f32.mrb[103].mxu1 }
 0x51e   : > { %10823 = vpow2.f32 %v9075_v17  ;;  %v9080_v0 = vmul.f32 -1.442695, %v9568_v11  ;;  %v9082_v60 = vmul.f32 -1.442695, %v9600_v45  ;;  %v9601_v56 = vadd.f32 %v6774_v4, %v14234_v23 }
 0x51f   : > { %10825 = vpow2.f32 %v9079_v49  ;;  %v9086_v58 = vmul.f32 -1.442695, %v9569_v36  ;;  %v9570_v9 = vadd.f32 %v6550_v5, %v14237_v22  ;;  %v9602_v10 = vadd.f32 %v6776_v52, %v14240_v27 }
 0x520   : > { %10827 = vpow2.f32 %v9081_v2  ;;  %v9088_v33 = vmul.f32 -1.442695, %v9601_v56 }
 0x521   : > { %v10810_v62 = vpop.eup %10809  ;;  %10829 = vpow2.f32 %v9080_v0  ;;  %v9087_v11 = vmul.f32 -1.442695, %v9570_v9  ;;  %v9089_v49 = vmul.f32 -1.442695, %v9602_v10 }
 0x522   : > { %v10812_v3 = vpop.eup %10811  ;;  %v7595_v7 = vadd.f32 1.0, %v10810_v62  ;;  %10831 = vpow2.f32 %v9082_v60  ;;  %v6554_v35 = vpop.f32.mrb[104].mxu0 }
 0x523   : > { %v6780_v53 = vpop.f32.mrb[104].mxu1  ;;  %v10814_v25 = vpop.eup %10813  ;;  %v7597_v16 = vadd.f32 1.0, %v10812_v3  ;;  %10833 = vpow2.f32 %v9086_v58  ;;  %v9571_v50 = vadd.f32 %v6554_v35, %v14231_v48 }
 0x524   : > { %v6556_v34 = vpop.f32.mrb[105].mxu0  ;;  %v6782_v28 = vpop.f32.mrb[105].mxu1  ;;  %10835 = vrcp.f32 %v7595_v7  ;;  %v7596_v26 = vadd.f32 1.0, %v10814_v25  ;;  %v9603_v12 = vadd.f32 %v6780_v53, %v14234_v23 }
 0x525   : > { %v10816_v55 = vpop.eup %10815  ;;  %v6558_v18 = vpop.f32.mrb[106].mxu0  ;;  %10837 = vrcp.f32 %v7597_v16  ;;  %v9572_v45 = vadd.f32 %v6556_v34, %v14237_v22  ;;  %v9604_v2 = vadd.f32 %v6782_v28, %v14240_v27  ;;  %v9093_v5 = vmul.f32 -1.442695, %v9571_v50 }
 0x526   : > { %v6784_v42 = vpop.f32.mrb[106].mxu1  ;;  %v10818_v29 = vpop.eup %10817  ;;  %v7598_v54 = vadd.f32 1.0, %v10816_v55  ;;  %10839 = vrcp.f32 %v7596_v26  ;;  %v9573_v52 = vadd.f32 %v6558_v18, %v14231_v48  ;;  %v9095_v58 = vmul.f32 -1.442695, %v9603_v12 }
 0x527   : > { %v14255_v14 = vpop.f32.mrb[107].mxu0  ;;  %v10820_v30 = vpop.eup %10819  ;;  %v7602_v57 = vadd.f32 1.0, %v10818_v29  ;;  %v9605_v62 = vadd.f32 %v6784_v42, %v14234_v23  ;;  %v9094_v35 = vmul.f32 -1.442695, %v9572_v45  ;;  %v9096_v28 = vmul.f32 -1.442695, %v9604_v2 }
 0x528   : > { %v14257_v6 = vpop.f32.mrb[107].mxu1  ;;  %v10822_v21 = vpop.eup %10821  ;;  %10841 = vrcp.f32 %v7598_v54  ;;  %v7604_v63 = vadd.f32 1.0, %v10820_v30  ;;  %v9574_v53 = vadd.f32 %v14255_v14, %v14237_v22  ;;  %v9100_v29 = vmul.f32 -1.442695, %v9573_v52 }
 0x529   : > { %v10824_v8 = vpop.eup %10823  ;;  %10843 = vrcp.f32 %v7602_v57  ;;  %v7603_v37 = vadd.f32 1.0, %v10822_v21  ;;  %v9606_v55 = vadd.f32 %v14257_v6, %v14240_v27 }
 0x52a   : > { %v10826_v39 = vpop.eup %10825  ;;  %10845 = vrcp.f32 %v7604_v63  ;;  %v7605_v31 = vadd.f32 1.0, %v10824_v8  ;;  %v6564_v24 = vpop.f32.mrb[108].mxu0  ;;  %v9102_v63 = vmul.f32 -1.442695, %v9605_v62  ;;  %v9101_v56 = vmul.f32 -1.442695, %v9574_v53 }
 0x52b   : > { %v10828_v15 = vpop.eup %10827  ;;  %10847 = vrcp.f32 %v7603_v37  ;;  %v7609_v46 = vadd.f32 1.0, %v10826_v39  ;;  %v6790_v32 = vpop.f32.mrb[108].mxu1  ;;  %v9575_v54 = vadd.f32 %v6564_v24, %v14231_v48 }
 0x52c   : > { %v10830_v59 = vpop.eup %10829  ;;  %10849 = vrcp.f32 %v7605_v31  ;;  %v7611_v1 = vadd.f32 1.0, %v10828_v15  ;;  %v14262_v19 = vpop.f32.mrb[109].mxu0  ;;  %v9607_v6 = vadd.f32 %v6790_v32, %v14234_v23 }
 0x52d   : > { %v10832_v47 = vpop.eup %10831  ;;  %10851 = vrcp.f32 %v7609_v46  ;;  %v7610_v51 = vadd.f32 1.0, %v10830_v59  ;;  %v14265_v13 = vpop.f32.mrb[109].mxu1  ;;  %v9103_v46 = vmul.f32 -1.442695, %v9606_v55  ;;  %v9107_v59 = vmul.f32 -1.442695, %v9575_v54 }
 0x52e   : > { %v14267_v38 = vpop.f32.mrb[110].mxu0  ;;  %v10834_v61 = vpop.eup %10833  ;;  %10853 = vrcp.f32 %v7611_v1  ;;  %v7612_v17 = vadd.f32 1.0, %v10832_v47  ;;  %v9109_v47 = vmul.f32 -1.442695, %v9607_v6 }
 0x52f   : > { %v14270_v20 = vpop.f32.mrb[110].mxu1  ;;  %v14272_v41 = vpop.f32.mrb[111].mxu0  ;;  %10855 = vrcp.f32 %v7610_v51  ;;  %v7616_v44 = vadd.f32 1.0, %v10834_v61  ;;  %v9576_v61 = vadd.f32 %v14262_v19, %v14237_v22 }
 0x530   : > { %v10836_v43 = vpop.eup %10835  ;;  %v14275_v40 = vpop.f32.mrb[111].mxu1  ;;  %10857 = vrcp.f32 %v7612_v17 }
 0x531   : > { %v10838_v4 = vpop.eup %10837  ;;  %10859 = vrcp.f32 %v7616_v44 }
 0x532   : > { %v10840_v36 = vpop.eup %10839  ;;  %10861 = vpow2.f32 %v9088_v33  ;;  %v14289_v25 = vpop.f32.mrb[112].mxu0 }
 0x533   : > { %v10842_v0 = vpop.eup %10841  ;;  %v9243_v60 = vpack.c.bf16 %v10840_v36, %v10836_v43  ;;  %10863 = vpow2.f32 %v9087_v11  ;;  %v14291_v16 = vpop.f32.mrb[112].mxu1 }
 0x534   : > { %v10844_v3 = vpop.eup %10843  ;;  %v9244_v7 = vpack.c.bf16 %v10842_v0, %v10838_v4  ;;  %10865 = vpow2.f32 %v9089_v49  ;;  %v14296_v26 = vpop.f32.mrb[113].mxu0 }
 0x535   : > { %v10846_v34 = vpop.eup %10845  ;;  %8283 = vst [vmem:[%s14283_s25] sm:$0xff] %v9243_v60  ;;  %v14298_v18 = vpop.f32.mrb[113].mxu1  ;;  %10867 = vpow2.f32 %v9093_v5  ;;  %v9608_v60 = vadd.f32 %v14265_v13, %v14240_v27 }
 0x536   : > { %v10848_v42 = vpop.eup %10847  ;;  %8284 = vst [vmem:[%s14283_s25 + $0x8] sm:$0xff] %v9244_v7  ;;  %v14302_v14 = vpop.f32.mrb[114].mxu0  ;;  %10869 = vpow2.f32 %v9095_v58  ;;  %v14335_v7 = vmul.f32 -1.442695, %v9576_v61 }
 0x537   : > { %v6804_v30 = vpop.f32.mrb[114].mxu1  ;;  %v10850_v57 = vpop.eup %10849  ;;  %v9247_v21 = vpack.c.bf16 %v10848_v42, %v10844_v3  ;;  %10871 = vpow2.f32 %v9094_v35 }
 0x538   : > { %v14305_v8 = vpop.f32.mrb[115].mxu0  ;;  %v6806_v37 = vpop.f32.mrb[115].mxu1  ;;  %v9248_v31 = vpack.c.bf16 %v10850_v57, %v10846_v34  ;;  %10873 = vpow2.f32 %v9096_v28  ;;  %v14309_v9 = vadd.f32 %v6804_v30, %v14234_v23 }
 0x539   : > { %v10852_v39 = vpop.eup %10851  ;;  %8288 = vst [vmem:[%s14283_s25 + $0x1c] sm:$0xff] %v9247_v21  ;;  %10875 = vpow2.f32 %v9100_v29  ;;  %v14313_v1 = vadd.f32 %v6806_v37, %v14240_v27  ;;  %v14349_v21 = vmul.f32 -1.442695, %v9608_v60 }
 0x53a   : > { %v10854_v15 = vpop.eup %10853  ;;  %8289 = vst [vmem:[%s14283_s25 + $0x24] sm:$0xff] %v9248_v31  ;;  %10877 = vpow2.f32 %v9102_v63  ;;  %v6584_v17 = vpop.f32.mrb[116].mxu0  ;;  %v9577_v63 = vadd.f32 %v14267_v38, %v14231_v48  ;;  %v9578_v31 = vadd.f32 %v14272_v41, %v14237_v22 }
 0x53b   : > { %v10856_v24 = vpop.eup %10855  ;;  %10879 = vpow2.f32 %v9101_v56  ;;  %v6810_v33 = vpop.f32.mrb[116].mxu1  ;;  %v14321_v43 = vadd.f32 %v6584_v17, %v14231_v48 }
 0x53c   : > { %v10858_v10 = vpop.eup %10857  ;;  %v9251_v32 = vpack.c.bf16 %v10856_v24, %v10852_v39  ;;  %10881 = vpow2.f32 %v9103_v46  ;;  %v14324_v44 = vadd.f32 %v6810_v33, %v14234_v23  ;;  %v6586_v11 = vpop.f32.mrb[117].mxu0  ;;  %v9609_v39 = vadd.f32 %v14270_v20, %v14234_v23 }
 0x53d   : > { %v14315_v51 = vpop.eup %10859  ;;  %v9252_v50 = vpack.c.bf16 %v10858_v10, %v10854_v15  ;;  %v6812_v45 = vpop.f32.mrb[117].mxu1  ;;  %10883 = vpow2.f32 %v9107_v59  ;;  %v14328_v2 = vadd.f32 %v6586_v11, %v14237_v22  ;;  %v9610_v24 = vadd.f32 %v14275_v40, %v14240_v27 }
 0x53e   : > { %v10862_v12 = vpop.eup %10861  ;;  %8292 = vst [vmem:[%s14283_s25 + $0x38] sm:$0xff] %v9251_v32  ;;  %v14331_v19 = vadd.f32 %v6812_v45, %v14240_v27  ;;  %v6588_v36 = vpop.f32.mrb[118].mxu0  ;;  %10885 = vpow2.f32 %v9109_v47  ;;  %v9114_v40 = vmul.f32 -1.442695, %v9577_v63 }
 0x53f   : > { %v10864_v4 = vpop.eup %10863  ;;  %8293 = vst [vmem:[%s14283_s25 + $0x40] sm:$0xff] %v9252_v50  ;;  %v7618_v49 = vadd.f32 1.0, %v10862_v12  ;;  %v6814_v5 = vpop.f32.mrb[118].mxu1  ;;  %v14338_v28 = vadd.f32 %v6588_v36, %v14231_v48  ;;  %v9116_v36 = vmul.f32 -1.442695, %v9609_v39 }
 0x540   : > { %v10866_v52 = vpop.eup %10865  ;;  %v7617_v0 = vadd.f32 1.0, %v10864_v4  ;;  %v6590_v58 = vpop.f32.mrb[119].mxu0  ;;  %v14341_v55 = vadd.f32 %v6814_v5, %v14234_v23  ;;  %v9115_v5 = vmul.f32 -1.442695, %v9578_v31 }
 0x541   : > { %v10868_v62 = vpop.eup %10867  ;;  %10887 = vrcp.f32 %v7618_v49  ;;  %v7619_v3 = vadd.f32 1.0, %v10866_v52  ;;  %v6816_v35 = vpop.f32.mrb[119].mxu1  ;;  %v14344_v13 = vadd.f32 %v6590_v58, %v14237_v22  ;;  %v9579_v58 = vadd.f32 %v14289_v25, %v14231_v48 }
 0x542   : > { %v10870_v53 = vpop.eup %10869  ;;  %10889 = vrcp.f32 %v7617_v0  ;;  %v7623_v34 = vadd.f32 1.0, %v10868_v62  ;;  %v14347_v54 = vadd.f32 %v6816_v35, %v14240_v27  ;;  %v6594_v56 = vpop.f32.mrb[120].mxu0 }
 0x543   : > { %v10872_v42 = vpop.eup %10871  ;;  %10891 = vrcp.f32 %v7619_v3  ;;  %v7625_v29 = vadd.f32 1.0, %v10870_v53  ;;  %v14360_v59 = vadd.f32 %v6594_v56, %v14231_v48  ;;  %v6820_v38 = vpop.f32.mrb[120].mxu1 }
 0x544   : > { %v10874_v30 = vpop.eup %10873  ;;  %10893 = vrcp.f32 %v7623_v34  ;;  %v7624_v57 = vadd.f32 1.0, %v10872_v42  ;;  %v6596_v10 = vpop.f32.mrb[121].mxu0  ;;  %v14363_v20 = vadd.f32 %v6820_v38, %v14234_v23 }
 0x545   : > { %v10876_v6 = vpop.eup %10875  ;;  %10895 = vrcp.f32 %v7625_v29  ;;  %v7626_v37 = vadd.f32 1.0, %v10874_v30  ;;  %v14366_v41 = vadd.f32 %v6596_v10, %v14237_v22  ;;  %v6822_v50 = vpop.f32.mrb[121].mxu1  ;;  %v9117_v29 = vmul.f32 -1.442695, %v9610_v24 }
 0x546   : > { %v10878_v15 = vpop.eup %10877  ;;  %10897 = vrcp.f32 %v7624_v57  ;;  %v7630_v46 = vadd.f32 1.0, %v10876_v6  ;;  %v6598_v61 = vpop.f32.mrb[122].mxu0  ;;  %v14369_v12 = vadd.f32 %v6822_v50, %v14240_v27  ;;  %v9611_v30 = vadd.f32 %v14291_v16, %v14234_v23 }
 0x547   : > { %v10880_v32 = vpop.eup %10879  ;;  %10899 = vrcp.f32 %v7626_v37  ;;  %v7632_v47 = vadd.f32 1.0, %v10878_v15  ;;  %v6824_v11 = vpop.f32.mrb[122].mxu1  ;;  %v14374_v62 = vadd.f32 %v6598_v61, %v14231_v48  ;;  %v9580_v6 = vadd.f32 %v14296_v26, %v14237_v22 }
 0x548   : > { %v10882_v17 = vpop.eup %10881  ;;  %10901 = vrcp.f32 %v7630_v46  ;;  %v7631_v33 = vadd.f32 1.0, %v10880_v32  ;;  %v6600_v45 = vpop.f32.mrb[123].mxu0  ;;  %v14377_v53 = vadd.f32 %v6824_v11, %v14234_v23  ;;  %v9612_v37 = vadd.f32 %v14298_v18, %v14240_v27 }
 0x549   : > { %v10884_v4 = vpop.eup %10883  ;;  %10903 = vrcp.f32 %v7632_v47  ;;  %v7633_v49 = vadd.f32 1.0, %v10882_v17  ;;  %v6826_v52 = vpop.f32.mrb[123].mxu1  ;;  %v14380_v34 = vadd.f32 %v6600_v45, %v14237_v22  ;;  %v9121_v16 = vmul.f32 -1.442695, %v9579_v58 }
 0x54a   : > { %v10886_v0 = vpop.eup %10885  ;;  %10905 = vrcp.f32 %v7631_v33  ;;  %v7637_v60 = vadd.f32 1.0, %v10884_v4  ;;  %v14385_v25 = vadd.f32 %v6826_v52, %v14240_v27  ;;  %v6604_v39 = vpop.f32.mrb[124].mxu0  ;;  %v9581_v50 = vadd.f32 %v14302_v14, %v14231_v48 }
 0x54b   : > { %v10888_v3 = vpop.eup %10887  ;;  %10907 = vrcp.f32 %v7633_v49  ;;  %v7639_v35 = vadd.f32 1.0, %v10886_v0  ;;  %v6830_v31 = vpop.f32.mrb[124].mxu1  ;;  %v14394_v46 = vadd.f32 %v6604_v39, %v14231_v48  ;;  %v9123_v4 = vmul.f32 -1.442695, %v9611_v30 }
 0x54c   : > { %v10890_v42 = vpop.eup %10889  ;;  %10909 = vrcp.f32 %v7637_v60  ;;  %v6606_v24 = vpop.f32.mrb[125].mxu0  ;;  %v14399_v26 = vadd.f32 %v6830_v31, %v14234_v23  ;;  %v9582_v14 = vadd.f32 %v14305_v8, %v14237_v22  ;;  %v9128_v58 = vmul.f32 -1.442695, %v9581_v50 }
 0x54d   : > { %v10892_v57 = vpop.eup %10891  ;;  %v9255_v63 = vpack.c.bf16 %v10890_v42, %v14315_v51  ;;  %10911 = vrcp.f32 %v7639_v35  ;;  %v6832_v51 = vpop.f32.mrb[125].mxu1  ;;  %v14402_v18 = vadd.f32 %v6606_v24, %v14237_v22  ;;  %v9130_v8 = vmul.f32 -1.442695, %v14309_v9 }
 0x54e   : > { %v10894_v56 = vpop.eup %10893  ;;  %v9256_v15 = vpack.c.bf16 %v10892_v57, %v10888_v3  ;;  %10913 = vpow2.f32 %v14335_v7  ;;  %v14405_v10 = vadd.f32 %v6832_v51, %v14240_v27  ;;  %v6608_v7 = vpop.f32.mrb[126].mxu0 }
 0x54f   : > { %v10896_v38 = vpop.eup %10895  ;;  %8296 = vst [vmem:[%s14283_s25 + $0x54] sm:$0xff] %v9255_v63  ;;  %10915 = vpow2.f32 %v14349_v21  ;;  %v6834_v32 = vpop.f32.mrb[126].mxu1  ;;  %v14411_v21 = vadd.f32 %v6608_v7, %v14231_v48  ;;  %v9124_v48 = vmul.f32 -1.442695, %v9612_v37 }
 0x550   : > { %v10898_v47 = vpop.eup %10897  ;;  %8297 = vst [vmem:[%s14283_s25 + $0x5c] sm:$0xff] %v9256_v15  ;;  %10917 = vpow2.f32 %v9114_v40  ;;  %v14414_v61 = vadd.f32 %v6834_v32, %v14234_v23  ;;  %v6610_v17 = vpop.f32.mrb[127].mxu0  ;;  %v9122_v40 = vmul.f32 -1.442695, %v9580_v6 }
 0x551   : > { %v6836_v33 = vpop.f32.mrb[127].mxu1  ;;  %v10900_v11 = vpop.eup %10899  ;;  %v9259_v45 = vpack.c.bf16 %v10898_v47, %v10894_v56  ;;  %10919 = vpow2.f32 %v9116_v36  ;;  %v14420_v23 = vadd.f32 %v6610_v17, %v14237_v22  ;;  %v9129_v22 = vmul.f32 -1.442695, %v9582_v14 }
 0x552   : > { %v10902_v49 = vpop.eup %10901  ;;  %v9260_v52 = vpack.c.bf16 %v10900_v11, %v10896_v38  ;;  %10921 = vpow2.f32 %v9115_v5  ;;  %v14423_v60 = vadd.f32 %v6836_v33, %v14240_v27  ;;  %v9451_v35 = vpop.f32.mrb[128].mxu1 }
 0x553   : > { %v10904_v0 = vpop.eup %10903  ;;  %8300 = vst [vmem:[%s14283_s25 + $0x70] sm:$0xff] %v9259_v45  ;;  %10923 = vpow2.f32 %v9117_v29  ;;  %v9452_v30 = vpop.f32.mrb[129].mxu1 }
 0x554   : > { %v10906_v36 = vpop.eup %10905  ;;  %8301 = vst [vmem:[%s14283_s25 + $0x78] sm:$0xff] %v9260_v52  ;;  %10925 = vpow2.f32 %v9121_v16  ;;  %v14432_v57 = vadd.f32 %v9452_v30, %v9451_v35  ;;  %v9454_v63 = vpop.f32.mrb[130].mxu1 }
 0x555   : > { %v10908_v5 = vpop.eup %10907  ;;  %v9263_v3 = vpack.c.bf16 %v10906_v36, %v10902_v49  ;;  %10927 = vpow2.f32 %v9123_v4  ;;  %v9455_v37 = vpop.f32.mrb[131].mxu1 }
 0x556   : > { %v14427_v42 = vpop.eup %10909  ;;  %v9264_v29 = vpack.c.bf16 %v10908_v5, %v10904_v0  ;;  %10929 = vpow2.f32 %v9122_v40  ;;  %v14435_v31 = vadd.f32 %v9455_v37, %v9454_v63 }
 0x557   : > { %v14429_v27 = vpop.eup %10911  ;;  %8304 = vst [vmem:[%s14283_s25 + $0x8c] sm:$0xff] %v9263_v3  ;;  %10931 = vpow2.f32 %v9124_v48 }
 0x558   : > { %v10914_v6 = vpop.eup %10913  ;;  %8305 = vst [vmem:[%s14283_s25 + $0x94] sm:$0xff] %v9264_v29  ;;  %10933 = vpow2.f32 %v9128_v58 }
 0x559   : > { %v10916_v39 = vpop.eup %10915  ;;  %v7638_v9 = vadd.f32 1.0, %v10914_v6  ;;  %10935 = vpow2.f32 %v9130_v8  ;;  %v9135_v6 = vmul.f32 -1.442695, %v14321_v43  ;;  %v9138_v43 = vmul.f32 -1.442695, %v14331_v19 }
 0x55a   : > { %v10918_v56 = vpop.eup %10917  ;;  %v7640_v15 = vadd.f32 1.0, %v10916_v39  ;;  %10937 = vpow2.f32 %v9129_v22  ;;  %v9457_v47 = vpop.f32.mrb[132].mxu1  ;;  %v9131_v22 = vmul.f32 -1.442695, %v14313_v1  ;;  %v9136_v1 = vmul.f32 -1.442695, %v14328_v2 }
 0x55b   : > { %v10920_v16 = vpop.eup %10919  ;;  %10939 = vrcp.f32 %v7638_v9  ;;  %v7644_v24 = vadd.f32 1.0, %v10918_v56  ;;  %v9458_v33 = vpop.f32.mrb[133].mxu1  ;;  %v9137_v56 = vmul.f32 -1.442695, %v14324_v44  ;;  %v9142_v44 = vmul.f32 -1.442695, %v14338_v28 }
 0x55c   : > { %v10922_v51 = vpop.eup %10921  ;;  %10941 = vrcp.f32 %v7640_v15  ;;  %v7646_v38 = vadd.f32 1.0, %v10920_v16  ;;  %v14437_v4 = vadd.f32 %v9458_v33, %v9457_v47  ;;  %v9460_v49 = vpop.f32.mrb[134].mxu1  ;;  %v9143_v19 = vmul.f32 -1.442695, %v14344_v13 }
 0x55d   : > { %v10924_v7 = vpop.eup %10923  ;;  %10943 = vrcp.f32 %v7644_v24  ;;  %v7645_v32 = vadd.f32 1.0, %v10922_v51  ;;  %v9461_v14 = vpop.f32.mrb[135].mxu1  ;;  %v9149_v28 = vmul.f32 -1.442695, %v14360_v59  ;;  %v9152_v59 = vmul.f32 -1.442695, %v14369_v12 }
 0x55e   : > { %v10926_v50 = vpop.eup %10925  ;;  %10945 = vrcp.f32 %v7646_v38  ;;  %v7647_v17 = vadd.f32 1.0, %v10924_v7  ;;  %v14439_v36 = vadd.f32 %v9461_v14, %v9460_v49 }
 0x55f   : > { %v10928_v11 = vpop.eup %10927  ;;  %10947 = vrcp.f32 %v7645_v32  ;;  %v7651_v45 = vadd.f32 1.0, %v10926_v50  ;;  %v9144_v50 = vmul.f32 -1.442695, %v14341_v55  ;;  %v9151_v55 = vmul.f32 -1.442695, %v14363_v20 }
 0x560   : > { %v10930_v52 = vpop.eup %10929  ;;  %10949 = vrcp.f32 %v7647_v17  ;;  %v7653_v40 = vadd.f32 1.0, %v10928_v11 }
 0x561   : > { %v10932_v0 = vpop.eup %10931  ;;  %10951 = vrcp.f32 %v7651_v45  ;;  %v7652_v48 = vadd.f32 1.0, %v10930_v52  ;;  %v9145_v45 = vmul.f32 -1.442695, %v14347_v54 }
 0x562   : > { %v10934_v58 = vpop.eup %10933  ;;  %10953 = vrcp.f32 %v7653_v40  ;;  %v7654_v5 = vadd.f32 1.0, %v10932_v0  ;;  %v9463_v37 = vpop.f32.mrb[136].mxu1 }
 0x563   : > { %v10936_v3 = vpop.eup %10935  ;;  %10955 = vrcp.f32 %v7652_v48  ;;  %v7658_v8 = vadd.f32 1.0, %v10934_v58  ;;  %v9464_v15 = vpop.f32.mrb[137].mxu1  ;;  %v9150_v58 = vmul.f32 -1.442695, %v14366_v41 }
 0x564   : > { %v10938_v35 = vpop.eup %10937  ;;  %10957 = vrcp.f32 %v7654_v5  ;;  %v7660_v29 = vadd.f32 1.0, %v10936_v3  ;;  %v14447_v51 = vadd.f32 %v9464_v15, %v9463_v37  ;;  %v9466_v38 = vpop.f32.mrb[138].mxu1 }
 0x565   : > { %v10940_v30 = vpop.eup %10939  ;;  %10959 = vrcp.f32 %v7658_v8  ;;  %v7659_v63 = vadd.f32 1.0, %v10938_v35 }
 0x566   : > { %v10942_v39 = vpop.eup %10941  ;;  %v9267_v9 = vpack.c.bf16 %v10940_v30, %v14427_v42  ;;  %10961 = vrcp.f32 %v7660_v29  ;;  %v9467_v42 = vpop.f32.mrb[139].mxu1 }
 0x567   : > { %v10944_v16 = vpop.eup %10943  ;;  %v9268_v24 = vpack.c.bf16 %v10942_v39, %v14429_v27  ;;  %10963 = vrcp.f32 %v7659_v63  ;;  %v14453_v27 = vadd.f32 %v9467_v42, %v9466_v38 }
 0x568   : > { %v10946_v7 = vpop.eup %10945  ;;  %8308 = vst [vmem:[%s14283_s25 + $0xa8] sm:$0xff] %v9267_v9  ;;  %10965 = vpow2.f32 %v9131_v22 }
 0x569   : > { %v10948_v32 = vpop.eup %10947  ;;  %8309 = vst [vmem:[%s14283_s25 + $0xb0] sm:$0xff] %v9268_v24  ;;  %10967 = vpow2.f32 %v9135_v6 }
 0x56a   : > { %v10950_v47 = vpop.eup %10949  ;;  %v9271_v2 = vpack.c.bf16 %v10948_v32, %v10944_v16  ;;  %10969 = vpow2.f32 %v9137_v56  ;;  %v9469_v52 = vpop.f32.mrb[140].mxu1 }
 0x56b   : > { %v10952_v17 = vpop.eup %10951  ;;  %v9272_v33 = vpack.c.bf16 %v10950_v47, %v10946_v7  ;;  %10971 = vpow2.f32 %v9136_v1  ;;  %v9470_v0 = vpop.f32.mrb[141].mxu1 }
 0x56c   : > { %v10954_v11 = vpop.eup %10953  ;;  %8312 = vst [vmem:[%s14283_s25 + $0xc4] sm:$0xff] %v9271_v2  ;;  %10973 = vpow2.f32 %v9138_v43  ;;  %v14463_v54 = vadd.f32 %v9470_v0, %v9469_v52  ;;  %v9472_v5 = vpop.f32.mrb[142].mxu1 }
 0x56d   : > { %v10956_v49 = vpop.eup %10955  ;;  %8313 = vst [vmem:[%s14283_s25 + $0xcc] sm:$0xff] %v9272_v33  ;;  %10975 = vpow2.f32 %v9142_v44  ;;  %v9473_v8 = vpop.f32.mrb[143].mxu1 }
 0x56e   : > { %v10958_v40 = vpop.eup %10957  ;;  %v9275_v14 = vpack.c.bf16 %v10956_v49, %v10952_v17  ;;  %10977 = vpow2.f32 %v9144_v50  ;;  %v14470_v20 = vadd.f32 %v9473_v8, %v9472_v5 }
 0x56f   : > { %v10960_v13 = vpop.eup %10959  ;;  %v9276_v48 = vpack.c.bf16 %v10958_v40, %v10954_v11  ;;  %10979 = vpow2.f32 %v9143_v19 }
 0x570   : > { %v14465_v3 = vpop.eup %10961  ;;  %8316 = vst [vmem:[%s14283_s25 + $0xe0] sm:$0xff] %v9275_v14  ;;  %10981 = vpow2.f32 %v9145_v45  ;;  %v9156_v14 = vmul.f32 -1.442695, %v14374_v62  ;;  %v9159_v62 = vmul.f32 -1.442695, %v14385_v25 }
 0x571   : > { %v10964_v35 = vpop.eup %10963  ;;  %8317 = vst [vmem:[%s14283_s25 + $0xe8] sm:$0xff] %v9276_v48  ;;  %10983 = vpow2.f32 %v9149_v28  ;;  %v9158_v48 = vmul.f32 -1.442695, %v14377_v53  ;;  %v9163_v53 = vmul.f32 -1.442695, %v14394_v46 }
 0x572   : > { %v10966_v29 = vpop.eup %10965  ;;  %v9279_v22 = vpack.c.bf16 %v10964_v35, %v10960_v13  ;;  %10985 = vpow2.f32 %v9151_v55  ;;  %v9475_v12 = vpop.f32.mrb[144].mxu1  ;;  %v9157_v35 = vmul.f32 -1.442695, %v14380_v34  ;;  %v9166_v25 = vmul.f32 -1.442695, %v14405_v10 }
 0x573   : > { %v10968_v41 = vpop.eup %10967  ;;  %v7661_v30 = vadd.f32 1.0, %v10966_v29  ;;  %10987 = vpow2.f32 %v9150_v58  ;;  %v9476_v15 = vpop.f32.mrb[145].mxu1  ;;  %v9170_v46 = vmul.f32 -1.442695, %v14411_v21 }
 0x574   : > { %v10970_v63 = vpop.eup %10969  ;;  %8320 = vst [vmem:[%s14283_s25 + $0xfc] sm:$0xff] %v9279_v22  ;;  %v7665_v6 = vadd.f32 1.0, %v10968_v41  ;;  %10989 = vpow2.f32 %v9152_v59  ;;  %v14473_v1 = vadd.f32 %v9476_v15, %v9475_v12  ;;  %v9478_v38 = vpop.f32.mrb[146].mxu1  ;;  %v14887_v15 = vld [vmem:[#allocation2_spill] sm:$0xff] }
 0x575   : > { %v10972_v37 = vpop.eup %10971  ;;  %10991 = vrcp.f32 %v7661_v30  ;;  %v7667_v39 = vadd.f32 1.0, %v10970_v63  ;;  %v9479_v42 = vpop.f32.mrb[147].mxu1 }
 0x576   : > { %v10974_v9 = vpop.eup %10973  ;;  %10993 = vrcp.f32 %v7665_v6  ;;  %v7666_v56 = vadd.f32 1.0, %v10972_v37  ;;  %v14475_v47 = vadd.f32 %v9479_v42, %v9478_v38 }
 0x577   : > { %v10976_v16 = vpop.eup %10975  ;;  %10995 = vrcp.f32 %v7667_v39  ;;  %v7668_v24 = vadd.f32 1.0, %v10974_v9  ;;  %v9164_v39 = vmul.f32 -1.442695, %v14402_v18 }
 0x578   : > { %v10978_v7 = vpop.eup %10977  ;;  %10997 = vrcp.f32 %v7666_v56  ;;  %v7672_v43 = vadd.f32 1.0, %v10976_v16  ;;  %v14888_v16 = vsub.s32 6, %v14887_v15 }
 0x579   : > { %v10980_v32 = vpop.eup %10979  ;;  %10999 = vrcp.f32 %v7668_v24  ;;  %v7674_v44 = vadd.f32 1.0, %v10978_v7  ;;  %v9172_v7 = vmul.f32 -1.442695, %v14414_v61 }
 0x57a   : > { %v10982_v2 = vpop.eup %10981  ;;  %11001 = vrcp.f32 %v7672_v43  ;;  %v7673_v50 = vadd.f32 1.0, %v10980_v32  ;;  %v9481_v28 = vpop.f32.mrb[148].mxu1 }
 0x57b   : > { %v10984_v17 = vpop.eup %10983  ;;  %11003 = vrcp.f32 %v7674_v44  ;;  %v7675_v33 = vadd.f32 1.0, %v10982_v2  ;;  %v9482_v55 = vpop.f32.mrb[149].mxu1  ;;  %v9171_v44 = vmul.f32 -1.442695, %v14420_v23 }
 0x57c   : > { %v10986_v19 = vpop.eup %10985  ;;  %11005 = vrcp.f32 %v7673_v50  ;;  %v7679_v11 = vadd.f32 1.0, %v10984_v17  ;;  %v14479_v58 = vadd.f32 %v9482_v55, %v9481_v28  ;;  %v9484_v5 = vpop.f32.mrb[150].mxu1  ;;  %v9173_v17 = vmul.f32 -1.442695, %v14423_v60 }
 0x57d   : > { %v10988_v45 = vpop.eup %10987  ;;  %11007 = vrcp.f32 %v7675_v33  ;;  %v7681_v49 = vadd.f32 1.0, %v10986_v19  ;;  %v9485_v29 = vpop.f32.mrb[151].mxu1 }
 0x57e   : > { %v10990_v52 = vpop.eup %10989  ;;  %11009 = vrcp.f32 %v7679_v11  ;;  %v7680_v40 = vadd.f32 1.0, %v10988_v45  ;;  %v14484_v41 = vadd.f32 %v9485_v29, %v9484_v5 }
 0x57f   : > { %v10992_v0 = vpop.eup %10991  ;;  %11011 = vrcp.f32 %v7681_v49  ;;  %v7682_v13 = vadd.f32 1.0, %v10990_v52 }
 0x580   : > { %v10994_v59 = vpop.eup %10993  ;;  %v9280_v8 = vpack.c.bf16 %v10992_v0, %v14465_v3  ;;  %11013 = vrcp.f32 %v7680_v40  ;;  %v9165_v3 = vmul.f32 -1.442695, %v14399_v26  ;;  %v14497_v26 = vld [vmem:[%s14728_s12] sm:$0x7f] }
 0x581   : > { %v10996_v22 = vpop.eup %10995  ;;  %11015 = vrcp.f32 %v7682_v13  ;;  %v14502_v18 = vrot.slane %v14497_v26, %v14888_v16 }
 0x582   : > { %v10998_v30 = vpop.eup %10997  ;;  %8321 = vst [vmem:[%s14283_s25 + $0x104] sm:$0xff] %v9280_v8  ;;  %11017 = vpow2.f32 %v9156_v14  ;;  %v9487_v9 = vpop.f32.mrb[152].mxu1 }
 0x583   : > { %v11000_v63 = vpop.eup %10999  ;;  %v9283_v6 = vpack.c.bf16 %v10998_v30, %v10994_v59  ;;  %11019 = vpow2.f32 %v9158_v48  ;;  %v9488_v24 = vpop.f32.mrb[153].mxu1 }
 0x584   : > { %v11002_v34 = vpop.eup %11001  ;;  %v9284_v37 = vpack.c.bf16 %v11000_v63, %v10996_v22  ;;  %11021 = vpow2.f32 %v9157_v35  ;;  %v9489_v43 = vadd.f32 %v9488_v24, %v9487_v9  ;;  %v9490_v21 = vpop.f32.mrb[154].mxu1 }
 0x585   : > { %v11004_v12 = vpop.eup %11003  ;;  %8324 = vst [vmem:[%s14283_s25 + $0x118] sm:$0xff] %v9283_v6  ;;  %11023 = vpow2.f32 %v9159_v62  ;;  %v9491_v2 = vpop.f32.mrb[155].mxu1 }
 0x586   : > { %v11006_v56 = vpop.eup %11005  ;;  %8325 = vst [vmem:[%s14283_s25 + $0x120] sm:$0xff] %v9284_v37  ;;  %11025 = vpow2.f32 %v9163_v53  ;;  %v14509_v33 = vadd.f32 %v9489_v43, %v14502_v18  ;;  %v9492_v19 = vadd.f32 %v9491_v2, %v9490_v21  ;;  %v7100_v43 = vadd.f32 %v14432_v57, %v14502_v18 }
 0x587   : > { %v11008_v38 = vpop.eup %11007  ;;  %v9287_v10 = vpack.c.bf16 %v11006_v56, %v11002_v34  ;;  %11027 = vpow2.f32 %v9165_v3  ;;  %v14890_v56 = vsub.s32 5, %v14887_v15 }
 0x588   : > { %v11010_v42 = vpop.eup %11009  ;;  %v9288_v32 = vpack.c.bf16 %v11008_v38, %v11004_v12  ;;  %11029 = vpow2.f32 %v9164_v39  ;;  %v14513_v23 = vadd.f32 %v9492_v19, %v14502_v18  ;;  %v14889_v39 = vsub.s32 4, %v14887_v15 }
 0x589   : > { %v11012_v50 = vpop.eup %11011  ;;  %8328 = vst [vmem:[%s14283_s25 + $0x134] sm:$0xff] %v9287_v10  ;;  %11031 = vpow2.f32 %v9166_v25  ;;  %v7103_v19 = vadd.f32 %v14435_v31, %v14502_v18 }
 0x58a   : > { %v11014_v11 = vpop.eup %11013  ;;  %8329 = vst [vmem:[%s14283_s25 + $0x13c] sm:$0xff] %v9288_v32  ;;  %11033 = vpow2.f32 %v9170_v46  ;;  %v9493_v40 = vpop.f32.mrb[156].mxu1  ;;  %v14526_v12 = vrot.slane %v14497_v26, %v14889_v39  ;;  %v14531_v46 = vrot.slane %v14497_v26, %v14890_v56  ;;  %v7108_v39 = vadd.f32 %v14437_v4, %v14502_v18 }
 0x58b   : > { %v11016_v61 = vpop.eup %11015  ;;  %v9291_v45 = vpack.c.bf16 %v11014_v11, %v11010_v42  ;;  %11035 = vpow2.f32 %v9172_v7  ;;  %v9494_v0 = vpop.f32.mrb[157].mxu1 }
 0x58c   : > { %v11018_v49 = vpop.eup %11017  ;;  %v9292_v28 = vpack.c.bf16 %v11016_v61, %v11012_v50  ;;  %11037 = vpow2.f32 %v9171_v44  ;;  %v9495_v5 = vadd.f32 %v9494_v0, %v9493_v40  ;;  %v9496_v59 = vpop.f32.mrb[158].mxu1 }
 0x58d   : > { %v11020_v52 = vpop.eup %11019  ;;  %8332 = vst [vmem:[%s14283_s25 + $0x150] sm:$0xff] %v9291_v45  ;;  %v7686_v60 = vadd.f32 1.0, %v11018_v49  ;;  %11039 = vpow2.f32 %v9173_v17  ;;  %v9497_v29 = vpop.f32.mrb[159].mxu1 }
 0x58e   : > { %v11022_v14 = vpop.eup %11021  ;;  %8333 = vst [vmem:[%s14283_s25 + $0x158] sm:$0xff] %v9292_v28  ;;  %v7688_v55 = vadd.f32 1.0, %v11020_v52  ;;  %v14518_v30 = vadd.f32 %v9495_v5, %v14502_v18  ;;  %v9498_v53 = vadd.f32 %v9497_v29, %v9496_v59 }
 0x58f   : > { %v11024_v13 = vpop.eup %11023  ;;  %11041 = vrcp.f32 %v7686_v60  ;;  %v7687_v48 = vadd.f32 1.0, %v11022_v14 }
 0x590   : > { %v11026_v8 = vpop.eup %11025  ;;  %11043 = vrcp.f32 %v7688_v55  ;;  %v7689_v35 = vadd.f32 1.0, %v11024_v13  ;;  %v14521_v37 = vadd.f32 %v9498_v53, %v14502_v18 }
 0x591   : > { %v11028_v22 = vpop.eup %11027  ;;  %11045 = vrcp.f32 %v7687_v48  ;;  %v7693_v62 = vadd.f32 1.0, %v11026_v8 }
 0x592   : > { %v11030_v63 = vpop.eup %11029  ;;  %11047 = vrcp.f32 %v7689_v35  ;;  %v7695_v6 = vadd.f32 1.0, %v11028_v22  ;;  %v9515_v38 = vpop.f32.mrb[160].mxu1 }
 0x593   : > { %v11032_v3 = vpop.eup %11031  ;;  %11049 = vrcp.f32 %v7693_v62  ;;  %v7694_v34 = vadd.f32 1.0, %v11030_v63  ;;  %v6986_v21 = vpop.f32.mrb[128].mxu0 }
 0x594   : > { %v11034_v25 = vpop.eup %11033  ;;  %11051 = vrcp.f32 %v7695_v6  ;;  %v7696_v9 = vadd.f32 1.0, %v11032_v3  ;;  %v9516_v42 = vpop.f32.mrb[161].mxu1  ;;  %v9627_v15 = vadd.f32 %v6986_v21, %v14526_v12 }
 0x595   : > { %v11036_v16 = vpop.eup %11035  ;;  %11053 = vrcp.f32 %v7694_v34  ;;  %v7700_v24 = vadd.f32 1.0, %v11034_v25  ;;  %v6988_v2 = vpop.f32.mrb[129].mxu0  ;;  %v9517_v26 = vadd.f32 %v9516_v42, %v9515_v38 }
 0x596   : > { %v11038_v10 = vpop.eup %11037  ;;  %11055 = vrcp.f32 %v7696_v9  ;;  %v7702_v7 = vadd.f32 1.0, %v11036_v16  ;;  %v9518_v50 = vpop.f32.mrb[162].mxu1  ;;  %v9628_v11 = vadd.f32 %v6988_v2, %v14531_v46  ;;  %v9069_v49 = vmul.f32 -1.442695, %v9627_v15 }
 0x597   : > { %v11040_v32 = vpop.eup %11039  ;;  %11057 = vrcp.f32 %v7700_v24  ;;  %v7701_v44 = vadd.f32 1.0, %v11038_v10  ;;  %v6990_v61 = vpop.f32.mrb[130].mxu0  ;;  %v7197_v28 = vadd.f32 %v9517_v26, %v7100_v43  ;;  %v7111_v26 = vadd.f32 %v14439_v36, %v14502_v18 }
 0x598   : > { %11059 = vrcp.f32 %v7702_v7  ;;  %v7703_v17 = vadd.f32 1.0, %v11040_v32  ;;  %v9519_v45 = vpop.f32.mrb[163].mxu1  ;;  %v9629_v52 = vadd.f32 %v6990_v61, %v14526_v12  ;;  %v6992_v60 = vpop.f32.mrb[131].mxu0  ;;  %v9070_v14 = vmul.f32 -1.442695, %v9628_v11 }
 0x599   : > { %v11042_v57 = vpop.eup %11041  ;;  %11061 = vrcp.f32 %v7701_v44  ;;  %v9630_v55 = vadd.f32 %v6992_v60, %v14531_v46  ;;  %v9520_v0 = vadd.f32 %v9519_v45, %v9518_v50  ;;  %v9071_v31 = vmul.f32 -1.442695, %v7197_v28 }
 0x59a   : > { %v11044_v40 = vpop.eup %11043  ;;  %11063 = vrcp.f32 %v7703_v17  ;;  %v9076_v48 = vmul.f32 -1.442695, %v9629_v52  ;;  %v9521_v62 = vpop.f32.mrb[164].mxu1 }
 0x59b   : > { %v11046_v13 = vpop.eup %11045  ;;  %11065 = vpow2.f32 %v9069_v49  ;;  %v9077_v8 = vmul.f32 -1.442695, %v9630_v55  ;;  %v7200_v35 = vadd.f32 %v9520_v0, %v7103_v19  ;;  %v6996_v6 = vpop.f32.mrb[132].mxu0  ;;  %v7116_v55 = vadd.f32 %v14447_v51, %v14502_v18 }
 0x59c   : > { %v11048_v5 = vpop.eup %11047  ;;  %v9295_v59 = vpack.c.bf16 %v11046_v13, %v11042_v57  ;;  %11067 = vpow2.f32 %v9070_v14  ;;  %v9522_v3 = vpop.f32.mrb[165].mxu1  ;;  %v9631_v25 = vadd.f32 %v6996_v6, %v14526_v12 }
 0x59d   : > { %v11050_v29 = vpop.eup %11049  ;;  %v9296_v22 = vpack.c.bf16 %v11048_v5, %v11044_v40  ;;  %11069 = vpow2.f32 %v9071_v31  ;;  %v9078_v63 = vmul.f32 -1.442695, %v7200_v35  ;;  %v6998_v9 = vpop.f32.mrb[133].mxu0  ;;  %v9523_v56 = vadd.f32 %v9522_v3, %v9521_v62 }
 0x59e   : > { %v11052_v53 = vpop.eup %11051  ;;  %8336 = vst [vmem:[%s14283_s25 + $0x16c] sm:$0xff] %v9295_v59  ;;  %11071 = vpow2.f32 %v9076_v48  ;;  %v9524_v16 = vpop.f32.mrb[166].mxu1  ;;  %v9632_v10 = vadd.f32 %v6998_v9, %v14531_v46  ;;  %v9083_v32 = vmul.f32 -1.442695, %v9631_v25 }
 0x59f   : > { %v11054_v34 = vpop.eup %11053  ;;  %8337 = vst [vmem:[%s14283_s25 + $0x174] sm:$0xff] %v9296_v22  ;;  %11073 = vpow2.f32 %v9077_v8  ;;  %v7000_v7 = vpop.f32.mrb[134].mxu0  ;;  %v7205_v44 = vadd.f32 %v9523_v56, %v7108_v39 }
 0x5a0   : > { %v11056_v24 = vpop.eup %11055  ;;  %v9299_v38 = vpack.c.bf16 %v11054_v34, %v11050_v29  ;;  %11075 = vpow2.f32 %v9078_v63  ;;  %v9525_v43 = vpop.f32.mrb[167].mxu1  ;;  %v9633_v4 = vadd.f32 %v7000_v7, %v14526_v12  ;;  %v9084_v50 = vmul.f32 -1.442695, %v9632_v10 }
 0x5a1   : > { %v11058_v21 = vpop.eup %11057  ;;  %v9300_v42 = vpack.c.bf16 %v11056_v24, %v11052_v53  ;;  %v7002_v15 = vpop.f32.mrb[135].mxu0  ;;  %v9526_v19 = vadd.f32 %v9525_v43, %v9524_v16  ;;  %11077 = vpow2.f32 %v9083_v32  ;;  %v9085_v61 = vmul.f32 -1.442695, %v7205_v44 }
 0x5a2   : > { %v11060_v2 = vpop.eup %11059  ;;  %8340 = vst [vmem:[%s14283_s25 + $0x188] sm:$0xff] %v9299_v38  ;;  %v9634_v17 = vadd.f32 %v7002_v15, %v14531_v46  ;;  %v9090_v45 = vmul.f32 -1.442695, %v9633_v4  ;;  %11079 = vpow2.f32 %v9084_v50  ;;  %v9527_v36 = vpop.f32.mrb[168].mxu1  ;;  %v7119_v24 = vadd.f32 %v14453_v27, %v14502_v18 }
 0x5a3   : > { %v11062_v11 = vpop.eup %11061  ;;  %8341 = vst [vmem:[%s14283_s25 + $0x190] sm:$0xff] %v9300_v42  ;;  %v7208_v52 = vadd.f32 %v9526_v19, %v7111_v26  ;;  %11081 = vpow2.f32 %v9085_v61  ;;  %v7006_v13 = vpop.f32.mrb[136].mxu0  ;;  %v7124_v42 = vadd.f32 %v14463_v54, %v14502_v18 }
 0x5a4   : > { %v11064_v57 = vpop.eup %11063  ;;  %v9303_v49 = vpack.c.bf16 %v11062_v11, %v11058_v21  ;;  %v9091_v28 = vmul.f32 -1.442695, %v9634_v17  ;;  %11083 = vpow2.f32 %v9090_v45  ;;  %v9528_v31 = vpop.f32.mrb[169].mxu1  ;;  %v9635_v59 = vadd.f32 %v7006_v13, %v14526_v12 }
 0x5a5   : > { %v11066_v60 = vpop.eup %11065  ;;  %v9304_v40 = vpack.c.bf16 %v11064_v57, %v11060_v2  ;;  %v7008_v8 = vpop.f32.mrb[137].mxu0  ;;  %v9529_v35 = vadd.f32 %v9528_v31, %v9527_v36  ;;  %v9092_v9 = vmul.f32 -1.442695, %v7208_v52  ;;  %v7127_v31 = vadd.f32 %v14470_v20, %v14502_v18 }
 0x5a6   : > { %v11068_v14 = vpop.eup %11067  ;;  %8344 = vst [vmem:[%s14283_s25 + $0x1a4] sm:$0xff] %v9303_v49  ;;  %v7599_v0 = vadd.f32 1.0, %v11066_v60  ;;  %11085 = vpow2.f32 %v9091_v28  ;;  %v9530_v29 = vpop.f32.mrb[170].mxu1  ;;  %v9097_v16 = vmul.f32 -1.442695, %v9635_v59  ;;  %v9636_v7 = vadd.f32 %v7008_v8, %v14531_v46 }
 0x5a7   : > { %v11070_v48 = vpop.eup %11069  ;;  %8345 = vst [vmem:[%s14283_s25 + $0x1ac] sm:$0xff] %v9304_v40  ;;  %v7600_v5 = vadd.f32 1.0, %v11068_v14  ;;  %v7010_v53 = vpop.f32.mrb[138].mxu0  ;;  %v7213_v3 = vadd.f32 %v9529_v35, %v7116_v55 }
 0x5a8   : > { %v11072_v22 = vpop.eup %11071  ;;  %11087 = vrcp.f32 %v7599_v0  ;;  %v7601_v62 = vadd.f32 1.0, %v11070_v48  ;;  %v9531_v63 = vpop.f32.mrb[171].mxu1  ;;  %v9637_v27 = vadd.f32 %v7010_v53, %v14526_v12  ;;  %v9098_v52 = vmul.f32 -1.442695, %v9636_v7 }
 0x5a9   : > { %v11074_v6 = vpop.eup %11073  ;;  %11089 = vrcp.f32 %v7600_v5  ;;  %v7606_v51 = vadd.f32 1.0, %v11072_v22  ;;  %v7012_v34 = vpop.f32.mrb[139].mxu0  ;;  %v9532_v38 = vadd.f32 %v9531_v63, %v9530_v29  ;;  %v9099_v55 = vmul.f32 -1.442695, %v7213_v3 }
 0x5aa   : > { %v11076_v39 = vpop.eup %11075  ;;  %11091 = vrcp.f32 %v7601_v62  ;;  %v7607_v25 = vadd.f32 1.0, %v11074_v6  ;;  %v9533_v43 = vpop.f32.mrb[172].mxu1  ;;  %v9638_v45 = vadd.f32 %v7012_v34, %v14531_v46  ;;  %v9104_v48 = vmul.f32 -1.442695, %v9637_v27 }
 0x5ab   : > { %11093 = vrcp.f32 %v7606_v51  ;;  %v7608_v56 = vadd.f32 1.0, %v11076_v39  ;;  %v11078_v10 = vpop.eup %11077  ;;  %v7216_v44 = vadd.f32 %v9532_v38, %v7119_v24  ;;  %v7016_v4 = vpop.f32.mrb[140].mxu0 }
 0x5ac   : > { %11095 = vrcp.f32 %v7607_v25  ;;  %v11080_v21 = vpop.eup %11079  ;;  %v7613_v32 = vadd.f32 1.0, %v11078_v10  ;;  %v9534_v15 = vpop.f32.mrb[173].mxu1  ;;  %v9639_v0 = vadd.f32 %v7016_v4, %v14526_v12  ;;  %v9105_v35 = vmul.f32 -1.442695, %v9638_v45 }
 0x5ad   : > { %11097 = vrcp.f32 %v7608_v56  ;;  %v11082_v2 = vpop.eup %11081  ;;  %v7614_v26 = vadd.f32 1.0, %v11080_v21  ;;  %v7018_v50 = vpop.f32.mrb[141].mxu0  ;;  %v9535_v17 = vadd.f32 %v9534_v15, %v9533_v43  ;;  %v9106_v29 = vmul.f32 -1.442695, %v7216_v44 }
 0x5ae   : > { %11099 = vpow2.f32 %v9092_v9  ;;  %v9536_v19 = vpop.f32.mrb[174].mxu1  ;;  %v11084_v11 = vpop.eup %11083  ;;  %v7615_v61 = vadd.f32 1.0, %v11082_v2  ;;  %v9640_v53 = vadd.f32 %v7018_v50, %v14531_v46  ;;  %v9111_v20 = vmul.f32 -1.442695, %v9639_v0 }
 0x5af   : > { %11101 = vpow2.f32 %v9097_v16  ;;  %v7020_v54 = vpop.f32.mrb[142].mxu0  ;;  %v9537_v57 = vpop.f32.mrb[175].mxu1  ;;  %v7620_v28 = vadd.f32 1.0, %v11084_v11  ;;  %v7221_v60 = vadd.f32 %v9535_v17, %v7124_v42  ;;  %v7132_v25 = vadd.f32 %v14473_v1, %v14502_v18 }
 0x5b0   : > { %11103 = vrcp.f32 %v7613_v32  ;;  %v11086_v49 = vpop.eup %11085  ;;  %v7022_v40 = vpop.f32.mrb[143].mxu0  ;;  %v9538_v5 = vadd.f32 %v9537_v57, %v9536_v19  ;;  %v9641_v56 = vadd.f32 %v7020_v54, %v14526_v12  ;;  %v9112_v44 = vmul.f32 -1.442695, %v9640_v53 }
 0x5b1   : > { %11105 = vrcp.f32 %v7614_v26  ;;  %v7621_v14 = vadd.f32 1.0, %v11086_v49  ;;  %v9642_v7 = vadd.f32 %v7022_v40, %v14531_v46  ;;  %v9113_v26 = vmul.f32 -1.442695, %v7221_v60 }
 0x5b2   : > { %v11088_v36 = vpop.eup %11087  ;;  %11107 = vrcp.f32 %v7615_v61  ;;  %v7224_v63 = vadd.f32 %v9538_v5, %v7127_v31  ;;  %v9539_v6 = vpop.f32.mrb[176].mxu1  ;;  %v7135_v17 = vadd.f32 %v14475_v47, %v14502_v18  ;;  %v9118_v19 = vmul.f32 -1.442695, %v9641_v56 }
 0x5b3   : > { %v11090_v13 = vpop.eup %11089  ;;  %11109 = vrcp.f32 %v7620_v28  ;;  %v7026_v3 = vpop.f32.mrb[144].mxu0  ;;  %v9119_v54 = vmul.f32 -1.442695, %v9642_v7  ;;  %v7140_v5 = vadd.f32 %v14479_v58, %v14502_v18 }
 0x5b4   : > { %v11092_v59 = vpop.eup %11091  ;;  %v9245_v8 = vpack.c.bf16 %v11090_v13, %v11088_v36  ;;  %11111 = vrcp.f32 %v7621_v14  ;;  %v9540_v34 = vpop.f32.mrb[177].mxu1  ;;  %v9120_v28 = vmul.f32 -1.442695, %v7224_v63  ;;  %v9643_v0 = vadd.f32 %v7026_v3, %v14526_v12 }
 0x5b5   : > { %v11094_v22 = vpop.eup %11093  ;;  %v9246_v62 = vpack.c.bf16 %v11092_v59, %v11092_v59  ;;  %11113 = vpow2.f32 %v9098_v52  ;;  %v7028_v16 = vpop.f32.mrb[145].mxu0  ;;  %v9541_v43 = vadd.f32 %v9540_v34, %v9539_v6  ;;  %v7143_v3 = vadd.f32 %v14484_v41, %v14502_v18 }
 0x5b6   : > { %v11096_v51 = vpop.eup %11095  ;;  %8285 = vst [vmem:[%s14283_s25 + $0x10] sm:$0xff] %v9245_v8  ;;  %11115 = vpow2.f32 %v9099_v55  ;;  %v9542_v24 = vpop.f32.mrb[178].mxu1  ;;  %v9644_v53 = vadd.f32 %v7028_v16, %v14531_v46 }
 0x5b7   : > { %v11098_v39 = vpop.eup %11097  ;;  %8287 = vst.msk [vmem:[%s14283_s25 + $0x18] sm:$0xf] %vm8286_vm4, %v9246_v62  ;;  %v9249_v9 = vpack.c.bf16 %v11096_v51, %v11094_v22  ;;  %11117 = vpow2.f32 %v9104_v48  ;;  %v14576_v21 = vpop.f32.mrb[146].mxu0  ;;  %v14583_v27 = vadd.f32 %v9541_v43, %v7132_v25 }
 0x5b8   : > { %v11100_v38 = vpop.eup %11099  ;;  %v9250_v10 = vpack.c.bf16 %v11098_v39, %v11098_v39  ;;  %11119 = vpow2.f32 %v9105_v35  ;;  %v9543_v42 = vpop.f32.mrb[179].mxu1  ;;  %v9125_v39 = vmul.f32 -1.442695, %v9643_v0  ;;  %v9645_v56 = vadd.f32 %v14576_v21, %v14526_v12 }
 0x5b9   : > { %v11102_v32 = vpop.eup %11101  ;;  %8290 = vst [vmem:[%s14283_s25 + $0x2c] sm:$0xff] %v9249_v9  ;;  %v7622_v1 = vadd.f32 1.0, %v11100_v38  ;;  %11121 = vpow2.f32 %v9106_v29  ;;  %v14579_v4 = vpop.f32.mrb[147].mxu0  ;;  %v9544_v11 = vadd.f32 %v9543_v42, %v9542_v24 }
 0x5ba   : > { %v11104_v15 = vpop.eup %11103  ;;  %8291 = vst.msk [vmem:[%s14283_s25 + $0x34] sm:$0xf] %vm8286_vm4, %v9250_v10  ;;  %v7627_v2 = vadd.f32 1.0, %v11102_v32  ;;  %11123 = vpow2.f32 %v9111_v20  ;;  %v9545_v60 = vpop.f32.mrb[180].mxu1  ;;  %v9126_v10 = vmul.f32 -1.442695, %v9644_v53 }
 0x5bb   : > { %v11106_v50 = vpop.eup %11105  ;;  %11125 = vrcp.f32 %v7622_v1  ;;  %v14587_v52 = vadd.f32 %v9544_v11, %v7135_v17  ;;  %v14590_v36 = vpop.f32.mrb[148].mxu0  ;;  %v9132_v17 = vmul.f32 -1.442695, %v9645_v56 }
 0x5bc   : > { %v11108_v61 = vpop.eup %11107  ;;  %v9253_v45 = vpack.c.bf16 %v11106_v50, %v11104_v15  ;;  %11127 = vrcp.f32 %v7627_v2  ;;  %v9546_v47 = vpop.f32.mrb[181].mxu1 }
 0x5bd   : > { %v11110_v57 = vpop.eup %11109  ;;  %v9254_v49 = vpack.c.bf16 %v11108_v61, %v11108_v61  ;;  %11129 = vpow2.f32 %v9112_v44  ;;  %v14595_v13 = vpop.f32.mrb[149].mxu0  ;;  %v9547_v8 = vadd.f32 %v9546_v47, %v9545_v60  ;;  %v9647_v47 = vadd.f32 %v14590_v36, %v14526_v12 }
 0x5be   : > { %v11112_v40 = vpop.eup %11111  ;;  %8294 = vst [vmem:[%s14283_s25 + $0x48] sm:$0xff] %v9253_v45  ;;  %11131 = vpow2.f32 %v9113_v26  ;;  %v9548_v31 = vpop.f32.mrb[182].mxu1 }
 0x5bf   : > { %v11114_v14 = vpop.eup %11113  ;;  %8295 = vst.msk [vmem:[%s14283_s25 + $0x50] sm:$0xf] %vm8286_vm4, %v9254_v49  ;;  %v9257_v55 = vpack.c.bf16 %v11112_v40, %v11110_v57  ;;  %11133 = vpow2.f32 %v9118_v19  ;;  %v14599_v35 = vpop.f32.mrb[150].mxu0  ;;  %v14605_v20 = vadd.f32 %v9547_v8, %v7140_v5  ;;  %v9646_v57 = vadd.f32 %v14579_v4, %v14531_v46 }
 0x5c0   : > { %v11116_v48 = vpop.eup %11115  ;;  %v7628_v59 = vadd.f32 1.0, %v11114_v14  ;;  %11135 = vpow2.f32 %v9119_v54  ;;  %v9549_v29 = vpop.f32.mrb[183].mxu1  ;;  %v9648_v5 = vadd.f32 %v14595_v13, %v14531_v46 }
 0x5c1   : > { %v11118_v22 = vpop.eup %11117  ;;  %8298 = vst [vmem:[%s14283_s25 + $0x64] sm:$0xff] %v9257_v55  ;;  %v7629_v62 = vadd.f32 1.0, %v11116_v48  ;;  %11137 = vpow2.f32 %v9120_v28  ;;  %v14603_v63 = vpop.f32.mrb[151].mxu0  ;;  %v9550_v16 = vadd.f32 %v9549_v29, %v9548_v31  ;;  %v9127_v31 = vmul.f32 -1.442695, %v14583_v27 }
 0x5c2   : > { %v11120_v6 = vpop.eup %11119  ;;  %11139 = vrcp.f32 %v7628_v59  ;;  %v7634_v51 = vadd.f32 1.0, %v11118_v22  ;;  %v9551_v7 = vpop.f32.mrb[184].mxu1  ;;  %v9133_v29 = vmul.f32 -1.442695, %v9646_v57  ;;  %v9134_v22 = vmul.f32 -1.442695, %v14587_v52 }
 0x5c3   : > { %v11122_v58 = vpop.eup %11121  ;;  %11141 = vrcp.f32 %v7629_v62  ;;  %v7635_v34 = vadd.f32 1.0, %v11120_v6  ;;  %v14611_v41 = vadd.f32 %v9550_v16, %v7143_v3  ;;  %v7046_v18 = vpop.f32.mrb[152].mxu0  ;;  %v9139_v6 = vmul.f32 -1.442695, %v9647_v47 }
 0x5c4   : > { %v11124_v25 = vpop.eup %11123  ;;  %11143 = vrcp.f32 %v7634_v51  ;;  %v7636_v9 = vadd.f32 1.0, %v11122_v58  ;;  %v9552_v32 = vpop.f32.mrb[185].mxu1  ;;  %v14614_v44 = vadd.f32 %v7046_v18, %v14526_v12  ;;  %v9140_v16 = vmul.f32 -1.442695, %v9648_v5 }
 0x5c5   : > { %v11126_v24 = vpop.eup %11125  ;;  %11145 = vrcp.f32 %v7635_v34  ;;  %v7641_v38 = vadd.f32 1.0, %v11124_v25  ;;  %v7048_v21 = vpop.f32.mrb[153].mxu0  ;;  %v9553_v15 = vadd.f32 %v9552_v32, %v9551_v7  ;;  %v9649_v34 = vadd.f32 %v14599_v35, %v14526_v12 }
 0x5c6   : > { %v11128_v43 = vpop.eup %11127  ;;  %v9258_v42 = vpack.c.bf16 %v11126_v24, %v11126_v24  ;;  %11147 = vrcp.f32 %v7636_v9  ;;  %v9554_v2 = vpop.f32.mrb[186].mxu1  ;;  %v14619_v19 = vadd.f32 %v7048_v21, %v14531_v46 }
 0x5c7   : > { %v11130_v1 = vpop.eup %11129  ;;  %11149 = vrcp.f32 %v7641_v38  ;;  %v7050_v11 = vpop.f32.mrb[154].mxu0  ;;  %v14624_v49 = vadd.f32 %v9553_v15, %v14509_v33 }
 0x5c8   : > { %v11132_v26 = vpop.eup %11131  ;;  %8299 = vst.msk [vmem:[%s14283_s25 + $0x6c] sm:$0xf] %vm8286_vm4, %v9258_v42  ;;  %v7642_v50 = vadd.f32 1.0, %v11130_v1  ;;  %11151 = vpow2.f32 %v9125_v39  ;;  %v9555_v61 = vpop.f32.mrb[187].mxu1  ;;  %v14629_v14 = vadd.f32 %v7050_v11, %v14526_v12 }
 0x5c9   : > { %v11134_v45 = vpop.eup %11133  ;;  %v7643_v54 = vadd.f32 1.0, %v11132_v26  ;;  %11153 = vpow2.f32 %v9126_v10  ;;  %v7052_v28 = vpop.f32.mrb[155].mxu0  ;;  %v9556_v59 = vadd.f32 %v9555_v61, %v9554_v2 }
 0x5ca   : > { %v11136_v60 = vpop.eup %11135  ;;  %11155 = vrcp.f32 %v7642_v50  ;;  %v7648_v40 = vadd.f32 1.0, %v11134_v45  ;;  %v14633_v4 = vadd.f32 %v7052_v28, %v14531_v46  ;;  %v9557_v62 = vpop.f32.mrb[188].mxu1  ;;  %v9153_v28 = vmul.f32 -1.442695, %v14614_v44 }
 0x5cb   : > { %v11138_v55 = vpop.eup %11137  ;;  %11157 = vrcp.f32 %v7643_v54  ;;  %v7649_v0 = vadd.f32 1.0, %v11136_v60  ;;  %v14639_v51 = vadd.f32 %v9556_v59, %v14513_v23  ;;  %v7056_v58 = vpop.f32.mrb[156].mxu0 }
 0x5cc   : > { %v11140_v33 = vpop.eup %11139  ;;  %11159 = vrcp.f32 %v7648_v40  ;;  %v7650_v48 = vadd.f32 1.0, %v11138_v55  ;;  %v9558_v3 = vpop.f32.mrb[189].mxu1  ;;  %v14645_v39 = vadd.f32 %v7056_v58, %v14526_v12 }
 0x5cd   : > { %v11142_v36 = vpop.eup %11141  ;;  %v9261_v8 = vpack.c.bf16 %v11140_v33, %v11128_v43  ;;  %11161 = vrcp.f32 %v7649_v0  ;;  %v7058_v52 = vpop.f32.mrb[157].mxu0  ;;  %v9559_v25 = vadd.f32 %v9558_v3, %v9557_v62  ;;  %v9650_v43 = vadd.f32 %v14603_v63, %v14531_v46 }
 0x5ce   : > { %v11144_v53 = vpop.eup %11143  ;;  %v9262_v27 = vpack.c.bf16 %v11142_v36, %v11142_v36  ;;  %11163 = vrcp.f32 %v7650_v48  ;;  %v9560_v9 = vpop.f32.mrb[190].mxu1  ;;  %v14650_v24 = vadd.f32 %v7058_v52, %v14531_v46  ;;  %v9141_v63 = vmul.f32 -1.442695, %v14605_v20 }
 0x5cf   : > { %v11146_v13 = vpop.eup %11145  ;;  %8302 = vst [vmem:[%s14283_s25 + $0x80] sm:$0xff] %v9261_v8  ;;  %11165 = vpow2.f32 %v9127_v31  ;;  %v7060_v38 = vpop.f32.mrb[158].mxu0  ;;  %v14655_v42 = vadd.f32 %v9559_v25, %v14518_v30  ;;  %v9147_v61 = vmul.f32 -1.442695, %v9650_v43  ;;  %v9148_v20 = vmul.f32 -1.442695, %v14611_v41 }
 0x5d0   : > { %v11148_v56 = vpop.eup %11147  ;;  %8303 = vst.msk [vmem:[%s14283_s25 + $0x88] sm:$0xf] %vm8286_vm4, %v9262_v27  ;;  %v9265_v23 = vpack.c.bf16 %v11146_v13, %v11144_v53  ;;  %11167 = vpow2.f32 %v9132_v17  ;;  %v9561_v10 = vpop.f32.mrb[191].mxu1  ;;  %v14659_v1 = vadd.f32 %v7060_v38, %v14526_v12  ;;  %v9146_v17 = vmul.f32 -1.442695, %v9649_v34 }
 0x5d1   : > { %v11150_v35 = vpop.eup %11149  ;;  %v9266_v7 = vpack.c.bf16 %v11148_v56, %v11148_v56  ;;  %11169 = vpow2.f32 %v9133_v29  ;;  %v7062_v18 = vpop.f32.mrb[159].mxu0  ;;  %v9562_v30 = vadd.f32 %v9561_v10, %v9560_v9  ;;  %v9154_v8 = vmul.f32 -1.442695, %v14619_v19 }
 0x5d2   : > { %v11152_v32 = vpop.eup %11151  ;;  %8306 = vst [vmem:[%s14283_s25 + $0x9c] sm:$0xff] %v9265_v23  ;;  %11171 = vpow2.f32 %v9134_v22  ;;  %v14662_v21 = vadd.f32 %v7062_v18, %v14531_v46  ;;  %v9155_v62 = vmul.f32 -1.442695, %v14624_v49  ;;  %v9160_v49 = vmul.f32 -1.442695, %v14629_v14 }
 0x5d3   : > { %v11154_v15 = vpop.eup %11153  ;;  %8307 = vst.msk [vmem:[%s14283_s25 + $0xa4] sm:$0xf] %vm8286_vm4, %v9266_v7  ;;  %v7655_v2 = vadd.f32 1.0, %v11152_v32  ;;  %11173 = vpow2.f32 %v9139_v6  ;;  %v14668_v46 = vadd.f32 %v9562_v30, %v14521_v37  ;;  %v9167_v43 = vmul.f32 -1.442695, %v14645_v39 }
 0x5d4   : > { %v11156_v26 = vpop.eup %11155  ;;  %v7656_v50 = vadd.f32 1.0, %v11154_v15  ;;  %11175 = vpow2.f32 %v9140_v16  ;;  %v9161_v16 = vmul.f32 -1.442695, %v14633_v4  ;;  %v9168_v32 = vmul.f32 -1.442695, %v14650_v24 }
 0x5d5   : > { %v11158_v11 = vpop.eup %11157  ;;  %v9269_v12 = vpack.c.bf16 %v11156_v26, %v11150_v35  ;;  %11177 = vrcp.f32 %v7655_v2  ;;  %v9162_v35 = vmul.f32 -1.442695, %v14639_v51  ;;  %v9169_v2 = vmul.f32 -1.442695, %v14655_v42 }
 0x5d6   : > { %v11160_v45 = vpop.eup %11159  ;;  %v9270_v54 = vpack.c.bf16 %v11158_v11, %v11158_v11  ;;  %11179 = vrcp.f32 %v7656_v50  ;;  %v9174_v24 = vmul.f32 -1.442695, %v14659_v1  ;;  %v9175_v42 = vmul.f32 -1.442695, %v14662_v21 }
 0x5d7   : > { %v11162_v57 = vpop.eup %11161  ;;  %8310 = vst [vmem:[%s14283_s25 + $0xb8] sm:$0xff] %v9269_v12  ;;  %11181 = vpow2.f32 %v9141_v63 }
 0x5d8   : > { %v11164_v60 = vpop.eup %11163  ;;  %8311 = vst.msk [vmem:[%s14283_s25 + $0xc0] sm:$0xf] %vm8286_vm4, %v9270_v54  ;;  %v9273_v40 = vpack.c.bf16 %v11162_v57, %v11160_v45  ;;  %11183 = vpow2.f32 %v9146_v17 }
 0x5d9   : > { %v11166_v47 = vpop.eup %11165  ;;  %v9274_v37 = vpack.c.bf16 %v11164_v60, %v11164_v60  ;;  %11185 = vpow2.f32 %v9147_v61  ;;  %v9176_v61 = vmul.f32 -1.442695, %v14668_v46 }
 0x5da   : > { %v11168_v55 = vpop.eup %11167  ;;  %8314 = vst [vmem:[%s14283_s25 + $0xd4] sm:$0xff] %v9273_v40  ;;  %v7657_v0 = vadd.f32 1.0, %v11166_v47  ;;  %11187 = vpow2.f32 %v9148_v20 }
 0x5db   : > { %v11170_v31 = vpop.eup %11169  ;;  %8315 = vst.msk [vmem:[%s14283_s25 + $0xdc] sm:$0xf] %vm8286_vm4, %v9274_v37  ;;  %v7662_v41 = vadd.f32 1.0, %v11168_v55  ;;  %11189 = vpow2.f32 %v9153_v28 }
 0x5dc   : > { %v11172_v33 = vpop.eup %11171  ;;  %11191 = vrcp.f32 %v7657_v0  ;;  %v7663_v44 = vadd.f32 1.0, %v11170_v31 }
 0x5dd   : > { %v11174_v48 = vpop.eup %11173  ;;  %11193 = vrcp.f32 %v7662_v41  ;;  %v7664_v5 = vadd.f32 1.0, %v11172_v33 }
 0x5de   : > { %v11176_v59 = vpop.eup %11175  ;;  %11195 = vrcp.f32 %v7663_v44  ;;  %v7669_v36 = vadd.f32 1.0, %v11174_v48 }
 0x5df   : > { %v11178_v29 = vpop.eup %11177  ;;  %11197 = vrcp.f32 %v7664_v5  ;;  %v7670_v22 = vadd.f32 1.0, %v11176_v59 }
 0x5e0   : > { %v11180_v53 = vpop.eup %11179  ;;  %11199 = vrcp.f32 %v7669_v36 }
 0x5e1   : > { %v11182_v27 = vpop.eup %11181  ;;  %v9277_v6 = vpack.c.bf16 %v11180_v53, %v11178_v29  ;;  %11201 = vrcp.f32 %v7670_v22 }
 0x5e2   : > { %v11184_v58 = vpop.eup %11183  ;;  %v7671_v3 = vadd.f32 1.0, %v11182_v27  ;;  %11203 = vpow2.f32 %v9154_v8 }
 0x5e3   : > { %v11186_v13 = vpop.eup %11185  ;;  %8318 = vst [vmem:[%s14283_s25 + $0xf0] sm:$0xff] %v9277_v6  ;;  %v7676_v34 = vadd.f32 1.0, %v11184_v58  ;;  %11205 = vpow2.f32 %v9155_v62 }
 0x5e4   : > { %v11188_v52 = vpop.eup %11187  ;;  %11207 = vrcp.f32 %v7671_v3  ;;  %v7677_v19 = vadd.f32 1.0, %v11186_v13 }
 0x5e5   : > { %v11190_v25 = vpop.eup %11189  ;;  %11209 = vrcp.f32 %v7676_v34  ;;  %v7678_v9 = vadd.f32 1.0, %v11188_v52 }
 0x5e6   : > { %v11192_v56 = vpop.eup %11191  ;;  %11211 = vrcp.f32 %v7677_v19  ;;  %v7683_v23 = vadd.f32 1.0, %v11190_v25 }
 0x5e7   : > { %v11194_v38 = vpop.eup %11193  ;;  %v9278_v10 = vpack.c.bf16 %v11192_v56, %v11192_v56  ;;  %11213 = vrcp.f32 %v7678_v9 }
 0x5e8   : > { %v11196_v7 = vpop.eup %11195  ;;  %11215 = vrcp.f32 %v7683_v23 }
 0x5e9   : > { %v11198_v18 = vpop.eup %11197  ;;  %8319 = vst.msk [vmem:[%s14283_s25 + $0xf8] sm:$0xf] %vm8286_vm4, %v9278_v10  ;;  %v9281_v14 = vpack.c.bf16 %v11196_v7, %v11194_v38  ;;  %11217 = vpow2.f32 %v9160_v49 }
 0x5ea   : > { %v11200_v15 = vpop.eup %11199  ;;  %v9282_v4 = vpack.c.bf16 %v11198_v18, %v11198_v18  ;;  %11219 = vpow2.f32 %v9161_v16 }
 0x5eb   : > { %v11202_v63 = vpop.eup %11201  ;;  %8322 = vst [vmem:[%s14283_s25 + $0x10c] sm:$0xff] %v9281_v14  ;;  %11221 = vpow2.f32 %v9162_v35 }
 0x5ec   : > { %v11204_v51 = vpop.eup %11203  ;;  %8323 = vst.msk [vmem:[%s14283_s25 + $0x114] sm:$0xf] %vm8286_vm4, %v9282_v4  ;;  %v9285_v39 = vpack.c.bf16 %v11202_v63, %v11200_v15  ;;  %11223 = vpow2.f32 %v9167_v43 }
 0x5ed   : > { %v11206_v30 = vpop.eup %11205  ;;  %v7684_v26 = vadd.f32 1.0, %v11204_v51  ;;  %11225 = vpow2.f32 %v9168_v32 }
 0x5ee   : > { %v11208_v50 = vpop.eup %11207  ;;  %8326 = vst [vmem:[%s14283_s25 + $0x128] sm:$0xff] %v9285_v39  ;;  %v7685_v17 = vadd.f32 1.0, %v11206_v30  ;;  %11227 = vpow2.f32 %v9169_v2 }
 0x5ef   : > { %v11210_v11 = vpop.eup %11209  ;;  %v9286_v12 = vpack.c.bf16 %v11208_v50, %v11208_v50  ;;  %11229 = vrcp.f32 %v7684_v26 }
 0x5f0   : > { %v11212_v45 = vpop.eup %11211  ;;  %11231 = vrcp.f32 %v7685_v17 }
 0x5f1   : > { %v11214_v54 = vpop.eup %11213  ;;  %8327 = vst.msk [vmem:[%s14283_s25 + $0x130] sm:$0xf] %vm8286_vm4, %v9286_v12  ;;  %v9289_v20 = vpack.c.bf16 %v11212_v45, %v11210_v11  ;;  %11233 = vpow2.f32 %v9174_v24 }
 0x5f2   : > { %v11216_v1 = vpop.eup %11215  ;;  %v9290_v57 = vpack.c.bf16 %v11214_v54, %v11214_v54  ;;  %11235 = vpow2.f32 %v9175_v42 }
 0x5f3   : > { %v11218_v28 = vpop.eup %11217  ;;  %8330 = vst [vmem:[%s14283_s25 + $0x144] sm:$0xff] %v9289_v20  ;;  %11237 = vpow2.f32 %v9176_v61 }
 0x5f4   : > { %v11220_v21 = vpop.eup %11219  ;;  %8331 = vst.msk [vmem:[%s14283_s25 + $0x14c] sm:$0xf] %vm8286_vm4, %v9290_v57  ;;  %v7690_v60 = vadd.f32 1.0, %v11218_v28 }
 0x5f5   : > { %v11222_v40 = vpop.eup %11221  ;;  %v7691_v47 = vadd.f32 1.0, %v11220_v21 }
 0x5f6   : > { %v11224_v46 = vpop.eup %11223  ;;  %11239 = vrcp.f32 %v7690_v60  ;;  %v7692_v37 = vadd.f32 1.0, %v11222_v40 }
 0x5f7   : > { %v11226_v55 = vpop.eup %11225  ;;  %11241 = vrcp.f32 %v7691_v47  ;;  %v7697_v0 = vadd.f32 1.0, %v11224_v46 }
 0x5f8   : > { %v11228_v31 = vpop.eup %11227  ;;  %11243 = vrcp.f32 %v7692_v37  ;;  %v7698_v41 = vadd.f32 1.0, %v11226_v55 }
 0x5f9   : > { %v11230_v33 = vpop.eup %11229  ;;  %11245 = vrcp.f32 %v7697_v0  ;;  %v7699_v44 = vadd.f32 1.0, %v11228_v31 }
 0x5fa   : > { %v11232_v48 = vpop.eup %11231  ;;  %v9293_v5 = vpack.c.bf16 %v11230_v33, %v11216_v1  ;;  %11247 = vrcp.f32 %v7698_v41 }
 0x5fb   : > { %v11234_v59 = vpop.eup %11233  ;;  %v9294_v36 = vpack.c.bf16 %v11232_v48, %v11232_v48  ;;  %11249 = vrcp.f32 %v7699_v44 }
 0x5fc   : > { %v11236_v8 = vpop.eup %11235  ;;  %8334 = vst [vmem:[%s14283_s25 + $0x160] sm:$0xff] %v9293_v5  ;;  %v7704_v29 = vadd.f32 1.0, %v11234_v59 }
 0x5fd   : > { %v11238_v22 = vpop.eup %11237  ;;  %8335 = vst.msk [vmem:[%s14283_s25 + $0x168] sm:$0xf] %vm8286_vm4, %v9294_v36  ;;  %v7705_v62 = vadd.f32 1.0, %v11236_v8 }
 0x5fe   : > { %11251 = vrcp.f32 %v7704_v29  ;;  %v7706_v53 = vadd.f32 1.0, %v11238_v22 }
 0x5ff   : > { %11253 = vrcp.f32 %v7705_v62 }
 0x600   : > { %v11240_v27 = vpop.eup %11239  ;;  %11255 = vrcp.f32 %v7706_v53 }
 0x601   : > { %v11242_v6 = vpop.eup %11241 }
 0x602   : > { %v11244_v58 = vpop.eup %11243  ;;  %v9297_v3 = vpack.c.bf16 %v11242_v6, %v11240_v27 }
 0x603   : > { %v11246_v13 = vpop.eup %11245  ;;  %v9298_v34 = vpack.c.bf16 %v11244_v58, %v11244_v58 }
 0x604   : > { %v11248_v52 = vpop.eup %11247  ;;  %8338 = vst [vmem:[%s14283_s25 + $0x17c] sm:$0xff] %v9297_v3 }
 0x605   : > { %v11250_v19 = vpop.eup %11249  ;;  %8339 = vst.msk [vmem:[%s14283_s25 + $0x184] sm:$0xf] %vm8286_vm4, %v9298_v34  ;;  %v9301_v25 = vpack.c.bf16 %v11248_v52, %v11246_v13 }
 0x606   : > { %v9302_v9 = vpack.c.bf16 %v11250_v19, %v11250_v19 }
 0x607   : > { %8342 = vst [vmem:[%s14283_s25 + $0x198] sm:$0xff] %v9301_v25 }
 0x608   : > { %v11252_v49 = vpop.eup %11251  ;;  %8343 = vst.msk [vmem:[%s14283_s25 + $0x1a0] sm:$0xf] %vm8286_vm4, %v9302_v9 }
 0x609   : > { %v11254_v56 = vpop.eup %11253 }
 0x60a   : > { %v11256_v23 = vpop.eup %11255  ;;  %v9305_v16 = vpack.c.bf16 %v11254_v56, %v11252_v49 }
 0x60b   : > { %v9306_v38 = vpack.c.bf16 %v11256_v23, %v11256_v23 }
 0x60c   : > { %8346 = vst [vmem:[%s14283_s25 + $0x1b4] sm:$0xff] %v9305_v16 }
 0x60d   : > { %8347 = vst.msk [vmem:[%s14283_s25 + $0x1bc] sm:$0xf] %vm8286_vm4, %v9306_v38 }
 0x60e PF: > { %s25_s29 = sadd.s32 1, %s11264_s29  }
 0x60f   : > { %p22_p4 = scmp.ge.s32.totalorder %s25_s29, 4  }
 0x611   :  { %24 = sbr.rel (!%p22_p4) target bundleno = 1 (0x1), region = 120 }

</bundles_post_ra>
